<compile_context>
chip_gen: v6e
topology: v6e:2x2x1
jax: 0.10.0
libtpu: 0.0.40
codegen_flags: <defaults>
</compile_context>

<pallas_src>
import math
import functools

import numpy as np
import jax
import jax.numpy as jnp
from jax import lax
from jax.experimental import pallas as pl
from jax.experimental.pallas import tpu as pltpu

_PI = 3.14159265358979323846


# ----------------------------------------------------------------------------
# atan2 built from basic VPU ops (Cephes-style atanf polynomial, ~1e-7 error).
# TODO(synk): if jnp.arctan2 gains guaranteed Mosaic lowering, use it directly.
# ----------------------------------------------------------------------------
def _atan_poly(x):
    z = x * x
    return ((((8.05374449538e-2 * z - 1.38776856032e-1) * z
              + 1.99777106478e-1) * z - 3.33329491539e-1) * z * x + x)


def _atan(x):
    ax = jnp.abs(x)
    big = ax > 2.414213562373095    # tan(3*pi/8)
    mid = ax > 0.4142135623730951   # tan(pi/8)
    xr = jnp.where(big, -1.0 / ax, jnp.where(mid, (ax - 1.0) / (ax + 1.0), ax))
    yoff = jnp.where(big, _PI / 2.0, jnp.where(mid, _PI / 4.0, 0.0))
    r = yoff + _atan_poly(xr)
    return jnp.where(x < 0, -r, r)


def _atan2(y, x):
    a = _atan(y / x)
    return jnp.where(
        x > 0, a,
        jnp.where(
            x < 0,
            jnp.where(y >= 0, a + _PI, a - _PI),
            jnp.where(y > 0, _PI / 2.0, jnp.where(y < 0, -_PI / 2.0, 0.0))))


# ----------------------------------------------------------------------------
# Pallas kernel: Bt batch images per grid step.
# ----------------------------------------------------------------------------
def _hog_kernel(x_ref, phbd_ref, pw_ref, o_ref, pad_ref, *, nbins, max_angle):
    # x_ref    : (Bt, C, H, W)          unpadded input images
    # phbd_ref : (nbins*Hp, nbins*H)    block-diag row-pooling matrix (entries 1/pool)
    # pw_ref   : (W, Wp)                column-pooling matrix (entries 1/pool)
    # o_ref    : (Bt, nbins*Hp, Wp)     pooled histograms, bins stacked along rows
    # pad_ref  : (Bt, H+9, W+129)       VMEM scratch; image stored at the
    #                                   (sublane, lane)-aligned offset (8, 128)
    #                                   surrounded by a zero halo (conv padding=1)
    Bt, C, H, W = x_ref.shape

    # ---- channel mean (sequential adds: identical fp ordering to reference) --
    x = x_ref[...].astype(jnp.float32)
    acc = x[:, 0]
    for c in range(1, C):
        acc = acc + x[:, c]
    xm = acc * (1.0 / C)                                   # (Bt, H, W)

    # ---- in-kernel zero padding: no jnp.pad / extra HBM pass in the wrapper --
    # Zero every step (keeps the kernel correct when the batch grid axis is
    # split across TensorCores), then drop the image at an aligned offset so
    # the big store is unmasked; only the 18x18 tap reads are rotated.
    pad_ref[...] = jnp.zeros(pad_ref.shape, jnp.float32)
    pad_ref[:, 8:8 + H, 128:128 + W] = xm
    padv = pad_ref[...]                                    # (Bt, H+9, W+129)

    def tap(di, dj):                                       # == xpad[:, i+di, j+dj]
        return padv[:, 7 + di:7 + di + H, 127 + dj:127 + dj + W]

    # F.conv2d is cross-correlation with the fixed kernels
    # w0 = [[1,0,-1],[2,0,-2],[1,0,-1]], w1 = w0.T
    gx = (tap(0, 0) - tap(0, 2)) + 2.0 * (tap(1, 0) - tap(1, 2)) + (tap(2, 0) - tap(2, 2))
    gy = (tap(0, 0) + 2.0 * tap(0, 1) + tap(0, 2)) - (tap(2, 0) + 2.0 * tap(2, 1) + tap(2, 2))
    # TODO(synk): for large images the separable [1,2,1]/[1,0,-1] Sobel could run
    # on the (idle) MXU via banded matrices; kept on the VPU so gx/gy stay
    # bit-identical to the reference and no pixel can flip histogram bins.

    mag = jnp.sqrt(gx * gx + gy * gy)
    phase = _atan2(gx, gy)                                 # atan2(gxy[:,0], gxy[:,1])
    pint = phase / max_angle * nbins                       # same op order as torch

    b0f = jnp.floor(pint)
    b1f = jnp.ceil(pint)
    integral = b0f == b1f                                  # pint exactly integer
    b0 = jnp.where(b0f < 0, b0f + nbins, b0f)              # floored mod nbins
    b0 = jnp.where(b0 >= nbins, b0 - nbins, b0)            # (b0f in [-nbins, nbins])

    # scatter_(floor, mag) then scatter_add_(ceil, 1-mag):
    #   non-integral pint: ceil bin == (floor bin + 1) % nbins
    #   integral pint    : both scatters hit the floor bin (mag + (1-mag) == 1)
    w0 = jnp.where(integral, 1.0, mag)
    w1 = jnp.where(integral, 0.0, 1.0 - mag)

    masks = [b0 == float(k) for k in range(nbins)]         # ONE compare per bin
    out_bins = [jnp.where(masks[k], w0, 0.0) + jnp.where(masks[k - 1], w1, 0.0)
                for k in range(nbins)]                     # (Bt, H, W) each

    # ---- fused pooling: 2 MXU matmuls per image instead of 2 per bin ---------
    # Stack bins along the sublane axis (H is a multiple of pool>=8 -> aligned).
    stacked = jnp.concatenate(out_bins, axis=1)            # (Bt, nbins*H, W)
    phbd = phbd_ref[...]
    pw = pw_ref[...]
    pooled = []
    for b in range(Bt):
        t = jnp.dot(phbd, stacked[b],
                    precision=lax.Precision.HIGHEST,
                    preferred_element_type=jnp.float32)    # (nbins*Hp, W)
        pooled.append(jnp.dot(t, pw,
                              precision=lax.Precision.HIGHEST,
                              preferred_element_type=jnp.float32))  # (nbins*Hp, Wp)
    # single output store per grid step
    o_ref[...] = jnp.stack(pooled, axis=0)                 # (Bt, nbins*Hp, Wp)
    # TODO(synk): for large Wp a lane-dense (Hp, nbins*Wp) output layout would
    # make the store fully unmasked; total output here is tiny so skipped.


# ----------------------------------------------------------------------------
# Wrapper
# ----------------------------------------------------------------------------
def hog_pallas(x, nbins: int = 9, pool: int = 8, max_angle: float = math.pi,
               images_per_step: int = 8):
    N, C, H, W = x.shape
    assert H % pool == 0 and W % pool == 0
    Hp, Wp = H // pool, W // pool
    x = x.astype(jnp.float32)

    # images per grid step: largest divisor of N not exceeding the request
    # (amortises the ~0.35us per-step pipeline overhead for small H, W).
    Bt = 1
    for cand in range(min(N, images_per_step), 0, -1):
        if N % cand == 0:
            Bt = cand
            break
    # TODO(synk): for very large images (>= ~512x512) add a row-band grid axis
    # (band height multiple of 8, 2-row halo) so live intermediates fit v7x's
    # 64 MiB VMEM; unnecessary at these block sizes.

    # pooling matrices: (Ph @ img @ Pw) == AvgPool2d(pool) exactly
    ph = ((jnp.arange(Hp)[:, None] == (jnp.arange(H) // pool)[None, :])
          .astype(jnp.float32) / pool)                           # (Hp, H)
    phbd = jnp.kron(jnp.eye(nbins, dtype=jnp.float32), ph)       # (nbins*Hp, nbins*H)
    pw = (((jnp.arange(W) // pool)[:, None] == jnp.arange(Wp)[None, :])
          .astype(jnp.float32) / pool)                           # (W, Wp)

    kernel = functools.partial(_hog_kernel, nbins=nbins, max_angle=max_angle)

    out = pl.pallas_call(
        kernel,
        out_shape=jax.ShapeDtypeStruct((N, nbins * Hp, Wp), jnp.float32),
        grid_spec=pltpu.PrefetchScalarGridSpec(
            num_scalar_prefetch=0,
            grid=(N // Bt,),
            in_specs=[
                pl.BlockSpec((Bt, C, H, W), lambda n: (n, 0, 0, 0)),
                pl.BlockSpec((nbins * Hp, nbins * H), lambda n: (0, 0)),
                pl.BlockSpec((W, Wp), lambda n: (0, 0)),
            ],
            out_specs=pl.BlockSpec((Bt, nbins * Hp, Wp), lambda n: (n, 0, 0)),
            scratch_shapes=[pltpu.VMEM((Bt, H + 9, W + 129), jnp.float32)],
        ),
        compiler_params=pltpu.CompilerParams(
            dimension_semantics=("parallel",),          # batch images independent
            vmem_limit_bytes=32 * 1024 * 1024,          # above v5e's 16 MiB default
        ),
    )(x, phbd, pw)

    # (N, nbins*Hp, Wp) -> (N, nbins, Hp, Wp)
    return out.reshape(N, nbins, Hp, Wp)


# ----------------------------------------------------------------------------
# Pure-JAX reference (same arithmetic ordering as the kernel)
# ----------------------------------------------------------------------------
def hog_reference(x, nbins=9, pool=8, max_angle=math.pi, atan2_fn=_atan2):
    N, C, H, W = x.shape
    x = x.astype(jnp.float32)
    xm = x[:, 0]
    for c in range(1, C):
        xm = xm + x[:, c]
    xm = xm * (1.0 / C)
    xp = jnp.pad(xm, ((0, 0), (1, 1), (1, 1)))

    def tap(di, dj):
        return xp[:, di:di + H, dj:dj + W]

    gx = (tap(0, 0) - tap(0, 2)) + 2.0 * (tap(1, 0) - tap(1, 2)) + (tap(2, 0) - tap(2, 2))
    gy = (tap(0, 0) + 2.0 * tap(0, 1) + tap(0, 2)) - (tap(2, 0) + 2.0 * tap(2, 1) + tap(2, 2))
    mag = jnp.sqrt(gx * gx + gy * gy)
    phase = atan2_fn(gx, gy)
    pint = phase / max_angle * nbins
    b0 = jnp.floor(pint).astype(jnp.int32) % nbins
    b1 = jnp.ceil(pint).astype(jnp.int32) % nbins
    k = jnp.arange(nbins)[None, :, None, None]
    out = (jnp.where(b0[:, None] == k, mag[:, None], 0.0)
           + jnp.where(b1[:, None] == k, 1.0 - mag[:, None], 0.0))
    out = out.reshape(N, nbins, H // pool, pool, W // pool, pool).mean(axis=(3, 5))
    return out


if __name__ == "__main__":
    key = jax.random.PRNGKey(0)
    N, C, H, W = 2, 4, 16, 16
    nbins, pool = 9, 8
    x = jax.random.normal(key, (N, C, H, W), dtype=jnp.float32)

    # sanity-check the in-kernel atan2 approximation against jnp.arctan2
    k1, k2 = jax.random.split(jax.random.PRNGKey(1))
    ty = jax.random.normal(k1, (512,), dtype=jnp.float32)
    tx = jax.random.normal(k2, (512,), dtype=jnp.float32)
    atan_err = float(jnp.max(jnp.abs(_atan2(ty, tx) - jnp.arctan2(ty, tx))))
    assert atan_err < 1e-5, f"atan2 approximation error too large: {atan_err}"

    out = hog_pallas(x, nbins=nbins, pool=pool)
    out = jax.block_until_ready(out)
    assert out.shape == (N, nbins, H // pool, W // pool)
    assert out.dtype == jnp.float32

    ref = hog_reference(x, nbins=nbins, pool=pool)
    np.testing.assert_allclose(np.asarray(out), np.asarray(ref), rtol=1e-4, atol=1e-4)

    print("KERNEL_OK")
</pallas_src>

<mosaic_0001>
module attributes {stable_mosaic.version = 11 : i64} {
  func.func @_hog_kernel(%arg0: i32, %arg1: memref<2x4x16x16xf32, #tpu.memory_space<vmem>>, %arg2: memref<18x144xf32, #tpu.memory_space<vmem>>, %arg3: memref<16x2xf32, #tpu.memory_space<vmem>>, %arg4: memref<2x18x2xf32, #tpu.memory_space<vmem>>, %arg5: memref<2x25x145xf32, #tpu.memory_space<vmem>>) attributes {dimension_semantics = [#tpu.dimension_semantics<parallel>], iteration_bounds = array<i64: 1>, scalar_prefetch = 0 : i64, scratch_operands = 1 : i64, tpu.core_type = #tpu.core_type<tc>, window_params = [{transform_indices = @transform_0, window_bounds = array<i64: 2, 4, 16, 16>}, {pipeline_mode = #tpu.pipeline_mode<synchronous>, transform_indices = @transform_1, window_bounds = array<i64: 18, 144>}, {pipeline_mode = #tpu.pipeline_mode<synchronous>, transform_indices = @transform_2, window_bounds = array<i64: 16, 2>}, {transform_indices = @transform_3, window_bounds = array<i64: 2, 18, 2>}]} {
    %c0 = arith.constant 0 : index
    %c0_0 = arith.constant 0 : index
    %c0_1 = arith.constant 0 : index
    %c0_2 = arith.constant 0 : index
    %0 = vector.load %arg1[%c0, %c0_0, %c0_1, %c0_2] : memref<2x4x16x16xf32, #tpu.memory_space<vmem>>, vector<2x4x16x16xf32>
    %1 = vector.extract_strided_slice %0 {offsets = [0, 0, 0, 0], sizes = [2, 1, 16, 16], strides = [1, 1, 1, 1]} : vector<2x4x16x16xf32> to vector<2x1x16x16xf32>
    %2 = vector.shape_cast %1 : vector<2x1x16x16xf32> to vector<2x16x16xf32>
    %3 = vector.extract_strided_slice %0 {offsets = [0, 1, 0, 0], sizes = [2, 1, 16, 16], strides = [1, 1, 1, 1]} : vector<2x4x16x16xf32> to vector<2x1x16x16xf32>
    %4 = vector.shape_cast %3 : vector<2x1x16x16xf32> to vector<2x16x16xf32>
    %5 = arith.addf %2, %4 : vector<2x16x16xf32>
    %6 = vector.extract_strided_slice %0 {offsets = [0, 2, 0, 0], sizes = [2, 1, 16, 16], strides = [1, 1, 1, 1]} : vector<2x4x16x16xf32> to vector<2x1x16x16xf32>
    %7 = vector.shape_cast %6 : vector<2x1x16x16xf32> to vector<2x16x16xf32>
    %8 = arith.addf %5, %7 : vector<2x16x16xf32>
    %9 = vector.extract_strided_slice %0 {offsets = [0, 3, 0, 0], sizes = [2, 1, 16, 16], strides = [1, 1, 1, 1]} : vector<2x4x16x16xf32> to vector<2x1x16x16xf32>
    %10 = vector.shape_cast %9 : vector<2x1x16x16xf32> to vector<2x16x16xf32>
    %11 = arith.addf %8, %10 : vector<2x16x16xf32>
    %cst = arith.constant 2.500000e-01 : f32
    %12 = vector.broadcast %cst : f32 to vector<2x16x16xf32>
    %13 = arith.mulf %11, %12 : vector<2x16x16xf32>
    %cst_3 = arith.constant 0.000000e+00 : f32
    %14 = vector.broadcast %cst_3 : f32 to vector<2x25x145xf32>
    %c0_4 = arith.constant 0 : index
    %c0_5 = arith.constant 0 : index
    %c0_6 = arith.constant 0 : index
    %15 = vector.load %arg5[%c0_4, %c0_5, %c0_6] : memref<2x25x145xf32, #tpu.memory_space<vmem>>, vector<2x25x145xf32>
    tpu.vector_store %arg5[%c0_4, %c0_5, %c0_6], %14 {strides = array<i32>} : memref<2x25x145xf32, #tpu.memory_space<vmem>>, vector<2x25x145xf32>,
    %c0_7 = arith.constant 0 : index
    %c8 = arith.constant 8 : index
    %c128 = arith.constant 128 : index
    %16 = vector.load %arg5[%c0_7, %c8, %c128] : memref<2x25x145xf32, #tpu.memory_space<vmem>>, vector<2x16x16xf32>
    tpu.vector_store %arg5[%c0_7, %c8, %c128], %13 {strides = array<i32>} : memref<2x25x145xf32, #tpu.memory_space<vmem>>, vector<2x16x16xf32>,
    %c0_8 = arith.constant 0 : index
    %c0_9 = arith.constant 0 : index
    %c0_10 = arith.constant 0 : index
    %17 = vector.load %arg5[%c0_8, %c0_9, %c0_10] : memref<2x25x145xf32, #tpu.memory_space<vmem>>, vector<2x25x145xf32>
    %18 = vector.extract_strided_slice %17 {offsets = [0, 7, 127], sizes = [2, 16, 16], strides = [1, 1, 1]} : vector<2x25x145xf32> to vector<2x16x16xf32>
    %19 = vector.extract_strided_slice %17 {offsets = [0, 7, 129], sizes = [2, 16, 16], strides = [1, 1, 1]} : vector<2x25x145xf32> to vector<2x16x16xf32>
    %20 = arith.subf %18, %19 : vector<2x16x16xf32>
    %21 = vector.extract_strided_slice %17 {offsets = [0, 8, 127], sizes = [2, 16, 16], strides = [1, 1, 1]} : vector<2x25x145xf32> to vector<2x16x16xf32>
    %22 = vector.extract_strided_slice %17 {offsets = [0, 8, 129], sizes = [2, 16, 16], strides = [1, 1, 1]} : vector<2x25x145xf32> to vector<2x16x16xf32>
    %23 = arith.subf %21, %22 : vector<2x16x16xf32>
    %cst_11 = arith.constant 2.000000e+00 : f32
    %24 = vector.broadcast %cst_11 : f32 to vector<2x16x16xf32>
    %25 = arith.mulf %24, %23 : vector<2x16x16xf32>
    %26 = arith.addf %20, %25 : vector<2x16x16xf32>
    %27 = vector.extract_strided_slice %17 {offsets = [0, 9, 127], sizes = [2, 16, 16], strides = [1, 1, 1]} : vector<2x25x145xf32> to vector<2x16x16xf32>
    %28 = vector.extract_strided_slice %17 {offsets = [0, 9, 129], sizes = [2, 16, 16], strides = [1, 1, 1]} : vector<2x25x145xf32> to vector<2x16x16xf32>
    %29 = arith.subf %27, %28 : vector<2x16x16xf32>
    %30 = arith.addf %26, %29 : vector<2x16x16xf32>
    %31 = vector.extract_strided_slice %17 {offsets = [0, 7, 127], sizes = [2, 16, 16], strides = [1, 1, 1]} : vector<2x25x145xf32> to vector<2x16x16xf32>
    %32 = vector.extract_strided_slice %17 {offsets = [0, 7, 128], sizes = [2, 16, 16], strides = [1, 1, 1]} : vector<2x25x145xf32> to vector<2x16x16xf32>
    %cst_12 = arith.constant 2.000000e+00 : f32
    %33 = vector.broadcast %cst_12 : f32 to vector<2x16x16xf32>
    %34 = arith.mulf %33, %32 : vector<2x16x16xf32>
    %35 = arith.addf %31, %34 : vector<2x16x16xf32>
    %36 = vector.extract_strided_slice %17 {offsets = [0, 7, 129], sizes = [2, 16, 16], strides = [1, 1, 1]} : vector<2x25x145xf32> to vector<2x16x16xf32>
    %37 = arith.addf %35, %36 : vector<2x16x16xf32>
    %38 = vector.extract_strided_slice %17 {offsets = [0, 9, 127], sizes = [2, 16, 16], strides = [1, 1, 1]} : vector<2x25x145xf32> to vector<2x16x16xf32>
    %39 = vector.extract_strided_slice %17 {offsets = [0, 9, 128], sizes = [2, 16, 16], strides = [1, 1, 1]} : vector<2x25x145xf32> to vector<2x16x16xf32>
    %cst_13 = arith.constant 2.000000e+00 : f32
    %40 = vector.broadcast %cst_13 : f32 to vector<2x16x16xf32>
    %41 = arith.mulf %40, %39 : vector<2x16x16xf32>
    %42 = arith.addf %38, %41 : vector<2x16x16xf32>
    %43 = vector.extract_strided_slice %17 {offsets = [0, 9, 129], sizes = [2, 16, 16], strides = [1, 1, 1]} : vector<2x25x145xf32> to vector<2x16x16xf32>
    %44 = arith.addf %42, %43 : vector<2x16x16xf32>
    %45 = arith.subf %37, %44 : vector<2x16x16xf32>
    %46 = arith.mulf %30, %30 : vector<2x16x16xf32>
    %47 = arith.mulf %45, %45 : vector<2x16x16xf32>
    %48 = arith.addf %46, %47 : vector<2x16x16xf32>
    %49 = math.sqrt %48 : vector<2x16x16xf32>
    %50 = arith.divf %30, %45 : vector<2x16x16xf32>
    %51 = math.absf %50 : vector<2x16x16xf32>
    %cst_14 = arith.constant 2.41421366 : f32
    %52 = vector.broadcast %cst_14 : f32 to vector<2x16x16xf32>
    %53 = arith.cmpf ogt, %51, %52 : vector<2x16x16xf32>
    %cst_15 = arith.constant 0.414213568 : f32
    %54 = vector.broadcast %cst_15 : f32 to vector<2x16x16xf32>
    %55 = arith.cmpf ogt, %51, %54 : vector<2x16x16xf32>
    %cst_16 = arith.constant -1.000000e+00 : f32
    %56 = vector.broadcast %cst_16 : f32 to vector<2x16x16xf32>
    %57 = arith.divf %56, %51 : vector<2x16x16xf32>
    %cst_17 = arith.constant 1.000000e+00 : f32
    %58 = vector.broadcast %cst_17 : f32 to vector<2x16x16xf32>
    %59 = arith.subf %51, %58 : vector<2x16x16xf32>
    %cst_18 = arith.constant 1.000000e+00 : f32
    %60 = vector.broadcast %cst_18 : f32 to vector<2x16x16xf32>
    %61 = arith.addf %51, %60 : vector<2x16x16xf32>
    %62 = arith.divf %59, %61 : vector<2x16x16xf32>
    %63 = arith.select %55, %62, %51 : vector<2x16x16xi1>, vector<2x16x16xf32>
    %64 = arith.select %53, %57, %63 : vector<2x16x16xi1>, vector<2x16x16xf32>
    %cst_19 = arith.constant 0.785398185 : f32
    %cst_20 = arith.constant 0.000000e+00 : f32
    %65 = vector.broadcast %cst_19 : f32 to vector<2x16x16xf32>
    %66 = vector.broadcast %cst_20 : f32 to vector<2x16x16xf32>
    %67 = arith.select %55, %65, %66 : vector<2x16x16xi1>, vector<2x16x16xf32>
    %cst_21 = arith.constant 1.57079637 : f32
    %68 = vector.broadcast %cst_21 : f32 to vector<2x16x16xf32>
    %69 = arith.select %53, %68, %67 : vector<2x16x16xi1>, vector<2x16x16xf32>
    %70 = arith.mulf %64, %64 : vector<2x16x16xf32>
    %cst_22 = arith.constant 0.0805374458 : f32
    %71 = vector.broadcast %cst_22 : f32 to vector<2x16x16xf32>
    %72 = arith.mulf %71, %70 : vector<2x16x16xf32>
    %cst_23 = arith.constant 0.138776854 : f32
    %73 = vector.broadcast %cst_23 : f32 to vector<2x16x16xf32>
    %74 = arith.subf %72, %73 : vector<2x16x16xf32>
    %75 = arith.mulf %74, %70 : vector<2x16x16xf32>
    %cst_24 = arith.constant 0.199777111 : f32
    %76 = vector.broadcast %cst_24 : f32 to vector<2x16x16xf32>
    %77 = arith.addf %75, %76 : vector<2x16x16xf32>
    %78 = arith.mulf %77, %70 : vector<2x16x16xf32>
    %cst_25 = arith.constant 0.333329499 : f32
    %79 = vector.broadcast %cst_25 : f32 to vector<2x16x16xf32>
    %80 = arith.subf %78, %79 : vector<2x16x16xf32>
    %81 = arith.mulf %80, %70 : vector<2x16x16xf32>
    %82 = arith.mulf %81, %64 : vector<2x16x16xf32>
    %83 = arith.addf %82, %64 : vector<2x16x16xf32>
    %84 = arith.addf %69, %83 : vector<2x16x16xf32>
    %cst_26 = arith.constant 0.000000e+00 : f32
    %85 = vector.broadcast %cst_26 : f32 to vector<2x16x16xf32>
    %86 = arith.cmpf olt, %50, %85 : vector<2x16x16xf32>
    %cst_27 = arith.constant 0.000000e+00 : f32
    %87 = vector.broadcast %cst_27 : f32 to vector<2x16x16xf32>
    %88 = arith.subf %87, %84 : vector<2x16x16xf32>
    %89 = arith.select %86, %88, %84 : vector<2x16x16xi1>, vector<2x16x16xf32>
    %cst_28 = arith.constant 0.000000e+00 : f32
    %90 = vector.broadcast %cst_28 : f32 to vector<2x16x16xf32>
    %91 = arith.cmpf ogt, %45, %90 : vector<2x16x16xf32>
    %cst_29 = arith.constant 0.000000e+00 : f32
    %92 = vector.broadcast %cst_29 : f32 to vector<2x16x16xf32>
    %93 = arith.cmpf olt, %45, %92 : vector<2x16x16xf32>
    %cst_30 = arith.constant 0.000000e+00 : f32
    %94 = vector.broadcast %cst_30 : f32 to vector<2x16x16xf32>
    %95 = arith.cmpf oge, %30, %94 : vector<2x16x16xf32>
    %cst_31 = arith.constant 3.14159274 : f32
    %96 = vector.broadcast %cst_31 : f32 to vector<2x16x16xf32>
    %97 = arith.addf %89, %96 : vector<2x16x16xf32>
    %cst_32 = arith.constant 3.14159274 : f32
    %98 = vector.broadcast %cst_32 : f32 to vector<2x16x16xf32>
    %99 = arith.subf %89, %98 : vector<2x16x16xf32>
    %100 = arith.select %95, %97, %99 : vector<2x16x16xi1>, vector<2x16x16xf32>
    %cst_33 = arith.constant 0.000000e+00 : f32
    %101 = vector.broadcast %cst_33 : f32 to vector<2x16x16xf32>
    %102 = arith.cmpf ogt, %30, %101 : vector<2x16x16xf32>
    %cst_34 = arith.constant 0.000000e+00 : f32
    %103 = vector.broadcast %cst_34 : f32 to vector<2x16x16xf32>
    %104 = arith.cmpf olt, %30, %103 : vector<2x16x16xf32>
    %cst_35 = arith.constant -1.57079637 : f32
    %cst_36 = arith.constant 0.000000e+00 : f32
    %105 = vector.broadcast %cst_35 : f32 to vector<2x16x16xf32>
    %106 = vector.broadcast %cst_36 : f32 to vector<2x16x16xf32>
    %107 = arith.select %104, %105, %106 : vector<2x16x16xi1>, vector<2x16x16xf32>
    %cst_37 = arith.constant 1.57079637 : f32
    %108 = vector.broadcast %cst_37 : f32 to vector<2x16x16xf32>
    %109 = arith.select %102, %108, %107 : vector<2x16x16xi1>, vector<2x16x16xf32>
    %110 = arith.select %93, %100, %109 : vector<2x16x16xi1>, vector<2x16x16xf32>
    %111 = arith.select %91, %89, %110 : vector<2x16x16xi1>, vector<2x16x16xf32>
    %cst_38 = arith.constant 3.14159274 : f32
    %112 = vector.broadcast %cst_38 : f32 to vector<2x16x16xf32>
    %113 = arith.divf %111, %112 : vector<2x16x16xf32>
    %cst_39 = arith.constant 9.000000e+00 : f32
    %114 = vector.broadcast %cst_39 : f32 to vector<2x16x16xf32>
    %115 = arith.mulf %113, %114 : vector<2x16x16xf32>
    %116 = math.floor %115 : vector<2x16x16xf32>
    %117 = math.ceil %115 : vector<2x16x16xf32>
    %118 = arith.cmpf oeq, %116, %117 : vector<2x16x16xf32>
    %cst_40 = arith.constant 0.000000e+00 : f32
    %119 = vector.broadcast %cst_40 : f32 to vector<2x16x16xf32>
    %120 = arith.cmpf olt, %116, %119 : vector<2x16x16xf32>
    %cst_41 = arith.constant 9.000000e+00 : f32
    %121 = vector.broadcast %cst_41 : f32 to vector<2x16x16xf32>
    %122 = arith.addf %116, %121 : vector<2x16x16xf32>
    %123 = arith.select %120, %122, %116 : vector<2x16x16xi1>, vector<2x16x16xf32>
    %cst_42 = arith.constant 9.000000e+00 : f32
    %124 = vector.broadcast %cst_42 : f32 to vector<2x16x16xf32>
    %125 = arith.cmpf oge, %123, %124 : vector<2x16x16xf32>
    %cst_43 = arith.constant 9.000000e+00 : f32
    %126 = vector.broadcast %cst_43 : f32 to vector<2x16x16xf32>
    %127 = arith.subf %123, %126 : vector<2x16x16xf32>
    %128 = arith.select %125, %127, %123 : vector<2x16x16xi1>, vector<2x16x16xf32>
    %cst_44 = arith.constant 1.000000e+00 : f32
    %129 = vector.broadcast %cst_44 : f32 to vector<2x16x16xf32>
    %130 = arith.select %118, %129, %49 : vector<2x16x16xi1>, vector<2x16x16xf32>
    %cst_45 = arith.constant 1.000000e+00 : f32
    %131 = vector.broadcast %cst_45 : f32 to vector<2x16x16xf32>
    %132 = arith.subf %131, %49 : vector<2x16x16xf32>
    %cst_46 = arith.constant 0.000000e+00 : f32
    %133 = vector.broadcast %cst_46 : f32 to vector<2x16x16xf32>
    %134 = arith.select %118, %133, %132 : vector<2x16x16xi1>, vector<2x16x16xf32>
    %cst_47 = arith.constant 0.000000e+00 : f32
    %135 = vector.broadcast %cst_47 : f32 to vector<2x16x16xf32>
    %136 = arith.cmpf oeq, %128, %135 : vector<2x16x16xf32>
    %cst_48 = arith.constant 1.000000e+00 : f32
    %137 = vector.broadcast %cst_48 : f32 to vector<2x16x16xf32>
    %138 = arith.cmpf oeq, %128, %137 : vector<2x16x16xf32>
    %cst_49 = arith.constant 2.000000e+00 : f32
    %139 = vector.broadcast %cst_49 : f32 to vector<2x16x16xf32>
    %140 = arith.cmpf oeq, %128, %139 : vector<2x16x16xf32>
    %cst_50 = arith.constant 3.000000e+00 : f32
    %141 = vector.broadcast %cst_50 : f32 to vector<2x16x16xf32>
    %142 = arith.cmpf oeq, %128, %141 : vector<2x16x16xf32>
    %cst_51 = arith.constant 4.000000e+00 : f32
    %143 = vector.broadcast %cst_51 : f32 to vector<2x16x16xf32>
    %144 = arith.cmpf oeq, %128, %143 : vector<2x16x16xf32>
    %cst_52 = arith.constant 5.000000e+00 : f32
    %145 = vector.broadcast %cst_52 : f32 to vector<2x16x16xf32>
    %146 = arith.cmpf oeq, %128, %145 : vector<2x16x16xf32>
    %cst_53 = arith.constant 6.000000e+00 : f32
    %147 = vector.broadcast %cst_53 : f32 to vector<2x16x16xf32>
    %148 = arith.cmpf oeq, %128, %147 : vector<2x16x16xf32>
    %cst_54 = arith.constant 7.000000e+00 : f32
    %149 = vector.broadcast %cst_54 : f32 to vector<2x16x16xf32>
    %150 = arith.cmpf oeq, %128, %149 : vector<2x16x16xf32>
    %cst_55 = arith.constant 8.000000e+00 : f32
    %151 = vector.broadcast %cst_55 : f32 to vector<2x16x16xf32>
    %152 = arith.cmpf oeq, %128, %151 : vector<2x16x16xf32>
    %cst_56 = arith.constant 0.000000e+00 : f32
    %153 = vector.broadcast %cst_56 : f32 to vector<2x16x16xf32>
    %154 = arith.select %136, %130, %153 : vector<2x16x16xi1>, vector<2x16x16xf32>
    %cst_57 = arith.constant 0.000000e+00 : f32
    %155 = vector.broadcast %cst_57 : f32 to vector<2x16x16xf32>
    %156 = arith.select %152, %134, %155 : vector<2x16x16xi1>, vector<2x16x16xf32>
    %157 = arith.addf %154, %156 : vector<2x16x16xf32>
    %cst_58 = arith.constant 0.000000e+00 : f32
    %158 = vector.broadcast %cst_58 : f32 to vector<2x16x16xf32>
    %159 = arith.select %138, %130, %158 : vector<2x16x16xi1>, vector<2x16x16xf32>
    %cst_59 = arith.constant 0.000000e+00 : f32
    %160 = vector.broadcast %cst_59 : f32 to vector<2x16x16xf32>
    %161 = arith.select %136, %134, %160 : vector<2x16x16xi1>, vector<2x16x16xf32>
    %162 = arith.addf %159, %161 : vector<2x16x16xf32>
    %cst_60 = arith.constant 0.000000e+00 : f32
    %163 = vector.broadcast %cst_60 : f32 to vector<2x16x16xf32>
    %164 = arith.select %140, %130, %163 : vector<2x16x16xi1>, vector<2x16x16xf32>
    %cst_61 = arith.constant 0.000000e+00 : f32
    %165 = vector.broadcast %cst_61 : f32 to vector<2x16x16xf32>
    %166 = arith.select %138, %134, %165 : vector<2x16x16xi1>, vector<2x16x16xf32>
    %167 = arith.addf %164, %166 : vector<2x16x16xf32>
    %cst_62 = arith.constant 0.000000e+00 : f32
    %168 = vector.broadcast %cst_62 : f32 to vector<2x16x16xf32>
    %169 = arith.select %142, %130, %168 : vector<2x16x16xi1>, vector<2x16x16xf32>
    %cst_63 = arith.constant 0.000000e+00 : f32
    %170 = vector.broadcast %cst_63 : f32 to vector<2x16x16xf32>
    %171 = arith.select %140, %134, %170 : vector<2x16x16xi1>, vector<2x16x16xf32>
    %172 = arith.addf %169, %171 : vector<2x16x16xf32>
    %cst_64 = arith.constant 0.000000e+00 : f32
    %173 = vector.broadcast %cst_64 : f32 to vector<2x16x16xf32>
    %174 = arith.select %144, %130, %173 : vector<2x16x16xi1>, vector<2x16x16xf32>
    %cst_65 = arith.constant 0.000000e+00 : f32
    %175 = vector.broadcast %cst_65 : f32 to vector<2x16x16xf32>
    %176 = arith.select %142, %134, %175 : vector<2x16x16xi1>, vector<2x16x16xf32>
    %177 = arith.addf %174, %176 : vector<2x16x16xf32>
    %cst_66 = arith.constant 0.000000e+00 : f32
    %178 = vector.broadcast %cst_66 : f32 to vector<2x16x16xf32>
    %179 = arith.select %146, %130, %178 : vector<2x16x16xi1>, vector<2x16x16xf32>
    %cst_67 = arith.constant 0.000000e+00 : f32
    %180 = vector.broadcast %cst_67 : f32 to vector<2x16x16xf32>
    %181 = arith.select %144, %134, %180 : vector<2x16x16xi1>, vector<2x16x16xf32>
    %182 = arith.addf %179, %181 : vector<2x16x16xf32>
    %cst_68 = arith.constant 0.000000e+00 : f32
    %183 = vector.broadcast %cst_68 : f32 to vector<2x16x16xf32>
    %184 = arith.select %148, %130, %183 : vector<2x16x16xi1>, vector<2x16x16xf32>
    %cst_69 = arith.constant 0.000000e+00 : f32
    %185 = vector.broadcast %cst_69 : f32 to vector<2x16x16xf32>
    %186 = arith.select %146, %134, %185 : vector<2x16x16xi1>, vector<2x16x16xf32>
    %187 = arith.addf %184, %186 : vector<2x16x16xf32>
    %cst_70 = arith.constant 0.000000e+00 : f32
    %188 = vector.broadcast %cst_70 : f32 to vector<2x16x16xf32>
    %189 = arith.select %150, %130, %188 : vector<2x16x16xi1>, vector<2x16x16xf32>
    %cst_71 = arith.constant 0.000000e+00 : f32
    %190 = vector.broadcast %cst_71 : f32 to vector<2x16x16xf32>
    %191 = arith.select %148, %134, %190 : vector<2x16x16xi1>, vector<2x16x16xf32>
    %192 = arith.addf %189, %191 : vector<2x16x16xf32>
    %cst_72 = arith.constant 0.000000e+00 : f32
    %193 = vector.broadcast %cst_72 : f32 to vector<2x16x16xf32>
    %194 = arith.select %152, %130, %193 : vector<2x16x16xi1>, vector<2x16x16xf32>
    %cst_73 = arith.constant 0.000000e+00 : f32
    %195 = vector.broadcast %cst_73 : f32 to vector<2x16x16xf32>
    %196 = arith.select %150, %134, %195 : vector<2x16x16xi1>, vector<2x16x16xf32>
    %197 = arith.addf %194, %196 : vector<2x16x16xf32>
    %198 = tpu.concatenate %157, %162, %167, %172, %177, %182, %187, %192, %197 in 1 : vector<2x16x16xf32>, vector<2x16x16xf32>, vector<2x16x16xf32>, vector<2x16x16xf32>, vector<2x16x16xf32>, vector<2x16x16xf32>, vector<2x16x16xf32>, vector<2x16x16xf32>, vector<2x16x16xf32> -> vector<2x144x16xf32>
    %c0_74 = arith.constant 0 : index
    %c0_75 = arith.constant 0 : index
    %199 = vector.load %arg2[%c0_74, %c0_75] : memref<18x144xf32, #tpu.memory_space<vmem>>, vector<18x144xf32>
    %c0_76 = arith.constant 0 : index
    %c0_77 = arith.constant 0 : index
    %200 = vector.load %arg3[%c0_76, %c0_77] : memref<16x2xf32, #tpu.memory_space<vmem>>, vector<16x2xf32>
    %201 = vector.extract_strided_slice %198 {offsets = [0, 0, 0], sizes = [1, 144, 16], strides = [1, 1, 1]} : vector<2x144x16xf32> to vector<1x144x16xf32>
    %202 = vector.shape_cast %201 : vector<1x144x16xf32> to vector<144x16xf32>
    %cst_78 = arith.constant dense<0.000000e+00> : vector<18x16xf32>
    %203 = tpu.matmul %199, %202, %cst_78 {dimension_numbers = #tpu.dot_dimension_numbers<[1], [0], [0], [1], [0, 0, 1, 1], [], []>, precision = #tpu.contract_precision<fp32>} : vector<18x144xf32>, vector<144x16xf32>, vector<18x16xf32> -> vector<18x16xf32>
    %cst_79 = arith.constant dense<0.000000e+00> : vector<18x2xf32>
    %204 = tpu.matmul %203, %200, %cst_79 {dimension_numbers = #tpu.dot_dimension_numbers<[1], [0], [0], [1], [0, 0, 1, 1], [], []>, precision = #tpu.contract_precision<fp32>} : vector<18x16xf32>, vector<16x2xf32>, vector<18x2xf32> -> vector<18x2xf32>
    %205 = vector.extract_strided_slice %198 {offsets = [1, 0, 0], sizes = [1, 144, 16], strides = [1, 1, 1]} : vector<2x144x16xf32> to vector<1x144x16xf32>
    %206 = vector.shape_cast %205 : vector<1x144x16xf32> to vector<144x16xf32>
    %cst_80 = arith.constant dense<0.000000e+00> : vector<18x16xf32>
    %207 = tpu.matmul %199, %206, %cst_80 {dimension_numbers = #tpu.dot_dimension_numbers<[1], [0], [0], [1], [0, 0, 1, 1], [], []>, precision = #tpu.contract_precision<fp32>} : vector<18x144xf32>, vector<144x16xf32>, vector<18x16xf32> -> vector<18x16xf32>
    %cst_81 = arith.constant dense<0.000000e+00> : vector<18x2xf32>
    %208 = tpu.matmul %207, %200, %cst_81 {dimension_numbers = #tpu.dot_dimension_numbers<[1], [0], [0], [1], [0, 0, 1, 1], [], []>, precision = #tpu.contract_precision<fp32>} : vector<18x16xf32>, vector<16x2xf32>, vector<18x2xf32> -> vector<18x2xf32>
    %209 = vector.shape_cast %204 : vector<18x2xf32> to vector<1x18x2xf32>
    %210 = vector.shape_cast %208 : vector<18x2xf32> to vector<1x18x2xf32>
    %211 = tpu.concatenate %209, %210 in 0 : vector<1x18x2xf32>, vector<1x18x2xf32> -> vector<2x18x2xf32>
    %c0_82 = arith.constant 0 : index
    %c0_83 = arith.constant 0 : index
    %c0_84 = arith.constant 0 : index
    %212 = vector.load %arg4[%c0_82, %c0_83, %c0_84] : memref<2x18x2xf32, #tpu.memory_space<vmem>>, vector<2x18x2xf32>
    tpu.vector_store %arg4[%c0_82, %c0_83, %c0_84], %211 {strides = array<i32>} : memref<2x18x2xf32, #tpu.memory_space<vmem>>, vector<2x18x2xf32>,
    return
  }
  func.func @transform_0(%arg0: i32) -> (i32, i32, i32, i32) {
    %c0_i32 = arith.constant 0 : i32
    %c0_i32_0 = arith.constant 0 : i32
    %c0_i32_1 = arith.constant 0 : i32
    %c0_i32_2 = arith.constant 0 : i32
    return %arg0, %c0_i32, %c0_i32_0, %c0_i32_1 : i32, i32, i32, i32
  }
  func.func @transform_1(%arg0: i32) -> (i32, i32) {
    %c0_i32 = arith.constant 0 : i32
    %c0_i32_0 = arith.constant 0 : i32
    %c0_i32_1 = arith.constant 0 : i32
    return %c0_i32, %c0_i32_0 : i32, i32
  }
  func.func @transform_2(%arg0: i32) -> (i32, i32) {
    %c0_i32 = arith.constant 0 : i32
    %c0_i32_0 = arith.constant 0 : i32
    %c0_i32_1 = arith.constant 0 : i32
    return %c0_i32, %c0_i32_0 : i32, i32
  }
  func.func @transform_3(%arg0: i32) -> (i32, i32, i32) {
    %c0_i32 = arith.constant 0 : i32
    %c0_i32_0 = arith.constant 0 : i32
    %c0_i32_1 = arith.constant 0 : i32
    return %arg0, %c0_i32, %c0_i32_0 : i32, i32, i32
  }
}

</mosaic_0001>

<bundles_post_ra>
// kernel: tpu_custom_call.1
= control target key start
LH: loop header
LB: loop body
LE: loop exit
PB: predicated region body
PF: predicated region fallthrough
CT: control target
= control target key end

     0   :  { %8 = vsyncpa [#allocation4], 0  ;;  %s8859_s0 = inlined_call_operand.hbm [shape: f32[2,4,16,16], index: 0, kind: input, shape index: {}]   ;;  %s8860_s1 = inlined_call_operand.hbm [shape: f32[18,144], index: 1, kind: input, shape index: {}]   ;;  %s8861_s2 = inlined_call_operand.vmem [shape: f32[16,2], index: 2, kind: input, shape index: {}]   ;;  %s8862_s3 = inlined_call_operand.vmem [shape: f32[2,18,2], index: 3, kind: output, shape index: {}]  }
   0x1   :  { %9 = vsyncpa [#allocation6], 0  ;;  %s5272_s12 = smov [#allocation3]  }
   0x2   :  { %s15_s13 = sshll.u32 %s5272_s12, 4  ;;  %s16_s13 = int_to_ptr.vmem [resolvable:$true] %s15_s13 }
   0x3   :  { %s5236_s14 = scalar_lea.vmem %s16_s13, 2048  ;;  %p5241_p1 = scmp.lt.s32.totalorder %s16_s13, %s16_s13 }
   0x4   :  { %p5237_p0 = scmp.ne.s32.totalorder %s16_s13, %s5236_s14  ;;  %p5242_p2 = scmp.lt.s32.totalorder %s5236_s14, %s5236_s14 }
   0x6   :  { %p5243_p3 = por %p5242_p2, %p5241_p1 }
   0x8   :  { %p5244_p4 = pnand %p5243_p3, %p5237_p0 }
   0xa   :  { %5247 = shalt.err (!%p5244_p4)
}
   0xb   :  { %s5273_s15 = smov 128   ;;  %s5274_s16 = smov 8  }
   0xc   :  { %21 = dma.hbm_to_vmem [thread:$0]  %s8859_s0, 2048, %s16_s13, [#allocation4], %s5273_s15, %s5273_s15, %s5274_s16  }
   0xd   :  { %s5275_s19 = smov [#allocation5]  }
   0xe   :  { %s27_s20 = sshll.u32 %s5275_s19, 4  ;;  %s28_s20 = int_to_ptr.vmem [resolvable:$true] %s27_s20 }
   0xf   :  { %s5256_s21 = scalar_lea.vmem %s28_s20, 768  ;;  %p5261_p6 = scmp.lt.s32.totalorder %s28_s20, %s28_s20 }
  0x10   :  { %p5257_p5 = scmp.ne.s32.totalorder %s28_s20, %s5256_s21  ;;  %p5262_p7 = scmp.lt.s32.totalorder %s5256_s21, %s5256_s21 }
  0x12   :  { %p5263_p8 = por %p5262_p7, %p5261_p6 }
  0x14   :  { %p5264_p9 = pnand %p5263_p8, %p5257_p5 }
  0x16   :  { %5267 = shalt.err (!%p5264_p9)
}
  0x17   :  { %s5276_s22 = smov 256   ;;  %s5277_s23 = smov 16  }
  0x18   :  { %33 = dma.hbm_to_vmem [thread:$0]  %s8860_s1, 768, %s28_s20, [#allocation6], %s5276_s22, %s5276_s22, %s5277_s23  }
  0x19   :  { %5268 = dma.done.wait [#allocation4], 2048  }
  0x1a   :  { %5269 = vsyncadd [#allocation4], 4294965248 }
  0x1b   :  { %5270 = dma.done.wait [#allocation6], 768  }
  0x1c   :  { %5271 = vsyncadd [#allocation6], 4294966528  ;;  %vm82_vm0 = vcmask 131072   ;;  %vm75_vm1 = vcmask 138240   ;;  %v8863_v0 = vmov 0.0   ;;  %v42_v1 = vld [vmem:[#allocation3] sm:$0xff] }
  0x1d   :  { %83 = vst.msk [vmem:[#allocation2 + $0x38] sm:$0x1] %vm82_vm0, %v8863_v0  ;;  %74 = vst [vmem:[#allocation2] sm:$0xff] %v8863_v0  ;;  %2027 = vmatprep.subr.mxu0 %v8863_v0  ;;  %2155 = vmatprep.subr.mxu1 %v8863_v0  ;;  %v44_v2 = vld [vmem:[#allocation3 + $0x10] sm:$0xff]  ;;  %v46_v3 = vld [vmem:[#allocation3 + $0x20] sm:$0xff]  ;;  %s5279_s0 = smov 127  }
  0x1e   :  { %81 = vst [vmem:[#allocation2 + $0x30] sm:$0x1] %v8863_v0  ;;  %90 = vst [vmem:[#allocation2 + $0x70] sm:$0x1] %v8863_v0  ;;  %v58_v5 = vadd.f32 %v44_v2, %v42_v1  ;;  %v43_v6 = vld [vmem:[#allocation3 + $0x8] sm:$0xff]  ;;  %v48_v8 = vld [vmem:[#allocation3 + $0x30] sm:$0xff] }
  0x1f   :  { %91 = vst.msk [vmem:[#allocation2 + $0x78] sm:$0x1] %vm82_vm0, %v8863_v0  ;;  %v45_v9 = vld [vmem:[#allocation3 + $0x18] sm:$0xff]  ;;  %v47_v10 = vld [vmem:[#allocation3 + $0x28] sm:$0xff]  ;;  %vm8867_vm2 = vcmask 130048   ;;  %s5280_s1 = smov 126  }
  0x20   :  { %78 = vst.msk [vmem:[#allocation2 + $0x18] sm:$0xff] %vm75_vm1, %v8863_v0  ;;  %76 = vst.msk [vmem:[#allocation2 + $0x8] sm:$0xff] %vm75_vm1, %v8863_v0  ;;  %v62_v11 = vadd.f32 %v58_v5, %v46_v3  ;;  %v59_v12 = vadd.f32 %v45_v9, %v43_v6  ;;  %v49_v13 = vld [vmem:[#allocation3 + $0x38] sm:$0xff]  ;;  %vm8866_vm3 = vcmask 1045504   ;;  %vm8865_vm4 = vcmask 1046528   ;;  %s5281_s26 = smov 1  }
  0x21   :  { %80 = vst.msk [vmem:[#allocation2 + $0x28] sm:$0xff] %vm75_vm1, %v8863_v0  ;;  %85 = vst.msk [vmem:[#allocation2 + $0x48] sm:$0xff] %vm75_vm1, %v8863_v0 }
  0x22   :  { %87 = vst.msk [vmem:[#allocation2 + $0x58] sm:$0xff] %vm75_vm1, %v8863_v0  ;;  %89 = vst.msk [vmem:[#allocation2 + $0x68] sm:$0xff] %vm75_vm1, %v8863_v0  ;;  %v66_v14 = vadd.f32 %v62_v11, %v48_v8  ;;  %v63_v15 = vadd.f32 %v59_v12, %v47_v10 }
  0x24   :  { %v5322_v4 = vld [vmem:[#allocation2 + $0x38] sm:$0x1]  ;;  %v70_v16 = vmul.f32 0.25, %v66_v14  ;;  %v67_v17 = vadd.f32 %v63_v15, %v49_v13 }
  0x25   :  { %v325_v7 = vmul.f32 2.0, %v5322_v4  ;;  %v103_v28 = vld [vmem:[#allocation2 + $0x30] sm:$0x1] }
  0x26   :  { %93 = vst.msk [vmem:[#allocation2 + $0x18] sm:$0xff] %vm8867_vm2, %v70_v16  ;;  %v71_v18 = vmul.f32 0.25, %v67_v17 }
  0x27   :  { %329 = vrot.lane.b32.xlu1 %v325_v7, %s5279_s0  ;;  %v5332_v23 = vld [vmem:[#allocation2 + $0x8] sm:$0xff] }
  0x28   :  { %94 = vst.msk [vmem:[#allocation2 + $0x28] sm:$0xff] %vm8867_vm2, %v71_v18  ;;  %v271_v24 = vmul.f32 2.0, %v5332_v23 }
  0x2d   :  { %v100_v19 = vld [vmem:[#allocation2 + $0x18] sm:$0xff] }
  0x2e   :  { %121 = vrot.lane.b32.xlu1 %v100_v19, %s5280_s1  ;;  %v272_v20 = vmul.f32 2.0, %v100_v19 }
  0x2f   :  { %v102_v21 = vld [vmem:[#allocation2 + $0x28] sm:$0xff] }
  0x30   :  { %285 = vrot.lane.b32.xlu0 %v272_v20, %s5279_s0  ;;  %v273_v22 = vmul.f32 2.0, %v102_v21 }
  0x32   :  { %204 = vrot.lane.b32.xlu1 %v5322_v4, %s5280_s1 }
  0x34   :  { %287 = vrot.lane.b32.xlu0 %v273_v22, %s5279_s0 }
  0x36   :  { %119 = vrot.lane.b32.xlu1 %v5332_v23, %s5280_s1 }
  0x38   :  { %123 = vrot.lane.b32.xlu0 %v102_v21, %s5280_s1 }
  0x3c   :  { %283 = vrot.lane.b32.xlu0 %v271_v24, %s5279_s0 }
  0x99   :  { %v330_v25 = vpop.permute.xlu1 %329 }
  0x9a   :  { %v335_v31 = vadd.f32 %v330_v25, %v103_v28  ;;  %v336_v32 = vadd.f32 %v330_v25, %v5322_v4 }
  0xa0   :  { %v122_v26 = vpop.permute.xlu1 %121 }
  0xa1   :  { %v5353_v54 = vsub.f32 %v100_v19, %v122_v26  ;;  %v5374_v7 = vsub.f32 0.0, %v122_v26 }
  0xa2   :  { %v286_v27 = vpop.permute.xlu0 %285 }
  0xa3   :  { %v304_v29 = vadd.f32 %v286_v27, %v100_v19  ;;  %v5345_v40 = vadd.f32 %v286_v27, %v122_v26  ;;  %v150_v3 = vmul.f32 2.0, %v5353_v54  ;;  %v149_v13 = vmul.f32 2.0, %v5374_v7 }
  0xa4   :  { %v205_v33 = vpop.permute.xlu1 %204 }
  0xa5   :  { %v5341_v34 = vadd.f32 %v304_v29, %v122_v26  ;;  %v339_v37 = vadd.f32 %v335_v31, %v205_v33  ;;  %v340_v41 = vadd.f32 %v336_v32, %v205_v33  ;;  %v210_v48 = vsub.f32 %v103_v28, %v205_v33 }
  0xa6   :  { %v288_v30 = vpop.permute.xlu0 %287  ;;  %v355_v50 = vrot.slane %v5345_v40, 2  ;;  %v211_v63 = vsub.f32 %v5322_v4, %v205_v33  ;;  %v167_v11 = vrot.slane %v150_v3, 1  ;;  %v166_v20 = vrot.slane %v149_v13, 1 }
  0xa7   :  { %v306_v35 = vadd.f32 %v288_v30, %v102_v21  ;;  %v356_v45 = vrot.slane %v5341_v34, 2  ;;  %v361_v49 = vrot.slane %v339_v37, 2  ;;  %v363_v51 = vrot.slane %v340_v41, 2 }
  0xa8   :  { %v233_v60 = vrot.slane %v210_v48, 2  ;;  %v235_v4 = vrot.slane %v211_v63, 2  ;;  %v227_v32 = vrot.slane %v5374_v7, 2  ;;  %v120_v33 = vpop.permute.xlu1 %119 }
  0xaa   :  { %v124_v36 = vpop.permute.xlu0 %123 }
  0xab   :  { %v5343_v38 = vsub.f32 0.0, %v124_v36  ;;  %v317_v39 = vadd.f32 %v288_v30, %v124_v36  ;;  %v318_v42 = vadd.f32 %v306_v35, %v124_v36  ;;  %v142_v43 = vsub.f32 %v102_v21, %v124_v36 }
  0xac   :  { %v228_v21 = vrot.slane %v5353_v54, 2 }
  0xad   :  { %v151_v44 = vmul.f32 2.0, %v5343_v38  ;;  %v357_v46 = vrot.slane %v317_v39, 2  ;;  %v359_v47 = vrot.slane %v318_v42, 2  ;;  %v152_v55 = vmul.f32 2.0, %v142_v43 }
  0xae   :  { %v229_v61 = vrot.slane %v5343_v38, 2  ;;  %v231_v9 = vrot.slane %v142_v43, 2 }
  0xaf   :  { %v168_v52 = vrot.slane %v151_v44, 1  ;;  %v360_v53 = vsel %vm8866_vm3, %v356_v45, %v359_v47  ;;  %v362_v56 = vsel %vm8866_vm3, %v357_v46, %v361_v49  ;;  %v358_v57 = vsel %vm8866_vm3, %v355_v50, %v357_v46 }
  0xb0   :  { %v364_v58 = vsel %vm8866_vm3, %v359_v47, %v363_v51  ;;  %v5361_v59 = vsub.f32 %v5341_v34, %v360_v53  ;;  %v5364_v62 = vsub.f32 %v317_v39, %v362_v56  ;;  %v170_v5 = vrot.slane %v152_v55, 1  ;;  %v284_v56 = vpop.permute.xlu0 %283 }
  0xb1   :  { %v194_v1 = vadd.f32 %v168_v52, %v5343_v38  ;;  %v5368_v2 = vsub.f32 %v318_v42, %v364_v58  ;;  %v5372_v6 = vsub.f32 %v5345_v40, %v358_v57  ;;  %v234_v8 = vsel %vm8866_vm3, %v229_v61, %v233_v60 }
  0xb2   :  { %5128 = vrcp.f32 %v5361_v59  ;;  %v195_v12 = vadd.f32 %v170_v5, %v142_v43  ;;  %v171_v14 = vsel %vm8865_vm4, %v167_v11, %v170_v5  ;;  %v236_v15 = vsel %vm8866_vm3, %v231_v9, %v235_v4 }
  0xb3   :  { %5130 = vrcp.f32 %v5364_v62  ;;  %v5379_v10 = vadd.f32 %v234_v8, %v194_v1  ;;  %v193_v18 = vadd.f32 %v171_v14, %v5353_v54  ;;  %v415_v19 = vmul.f32 %v5364_v62, %v5364_v62 }
  0xb4   :  { %5132 = vrcp.f32 %v5368_v2  ;;  %v5388_v17 = vadd.f32 %v236_v15, %v195_v12  ;;  %v169_v24 = vsel %vm8865_vm4, %v166_v20, %v168_v52  ;;  %v232_v25 = vsel %vm8866_vm3, %v228_v21, %v231_v9 }
  0xb5   :  { %5134 = vrcp.f32 %v5372_v6  ;;  %v403_v16 = vmul.f32 %v5379_v10, %v5379_v10  ;;  %v5400_v27 = vadd.f32 %v232_v25, %v193_v18  ;;  %v416_v29 = vmul.f32 %v5368_v2, %v5368_v2 }
  0xb6   :  { %v404_v26 = vmul.f32 %v5388_v17, %v5388_v17  ;;  %v192_v30 = vadd.f32 %v169_v24, %v5374_v7  ;;  %v230_v41 = vsel %vm8866_vm3, %v227_v32, %v229_v61  ;;  %v138_v43 = vsub.f32 %v5332_v23, %v120_v33 }
  0xb7   :  { %v5394_v22 = vadd.f32 %v415_v19, %v403_v16  ;;  %v137_v46 = vsub.f32 0.0, %v120_v33  ;;  %v402_v49 = vmul.f32 %v5400_v27, %v5400_v27  ;;  %v414_v54 = vmul.f32 %v5361_v59, %v5361_v59 }
  0xb8   :  { %v5410_v37 = vadd.f32 %v416_v29, %v404_v26  ;;  %v5423_v47 = vadd.f32 %v230_v41, %v192_v30  ;;  %v191_v53 = vadd.f32 %v167_v11, %v138_v43  ;;  %v302_v5 = vadd.f32 %v284_v56, %v5332_v23 }
  0xb9   :  { %5136 = vrsqrt.f32 %v5394_v22  ;;  %v190_v55 = vadd.f32 %v166_v20, %v137_v46  ;;  %v5443_v60 = vadd.f32 %v414_v54, %v402_v49  ;;  %v413_v7 = vmul.f32 %v5372_v6, %v5372_v6 }
  0xba   :  { %5138 = vrsqrt.f32 %v5410_v37  ;;  %v5450_v1 = vadd.f32 %v228_v21, %v191_v53  ;;  %vm465_vm5 = vcmp.eq.f32.partialorder %v5394_v22, inf  ;;  %v468_v8 = vand.u32 2147483648, %v5394_v22 }
  0xbb   :  { %v5452_v3 = vadd.f32 %v227_v32, %v190_v55  ;;  %vm954_vm6 = vcmp.lt.f32.partialorder %v5400_v27, 0.0  ;;  %vm955_vm7 = vcmp.lt.f32.partialorder %v5379_v10, 0.0  ;;  %vm467_vm8 = vcmp.eq.f32.partialorder %v5394_v22, 0.0 }
  0xbc   :  { %vm956_vm9 = vcmp.lt.f32.partialorder %v5388_v17, 0.0  ;;  %v401_v23 = vmul.f32 %v5423_v47, %v5423_v47  ;;  %v313_v11 = vadd.f32 %v284_v56, %v120_v33  ;;  %vm942_vm10 = vcmp.gt.f32.partialorder %v5400_v27, 0.0 }
  0xbd   :  { %vm943_vm11 = vcmp.gt.f32.partialorder %v5379_v10, 0.0  ;;  %v314_v12 = vadd.f32 %v302_v5, %v120_v33  ;;  %vm472_vm12 = vcmp.eq.f32.partialorder %v5410_v37, inf  ;;  %v966_v14 = vsel %vm954_vm6, -1.5707964, %v8863_v0 }
  0xbe   :  { %v967_v15 = vsel %vm955_vm7, -1.5707964, %v8863_v0  ;;  %v5476_v16 = vsub.f32 %v313_v11, %v355_v50  ;;  %vm944_vm13 = vcmp.gt.f32.partialorder %v5388_v17, 0.0  ;;  %v968_v18 = vsel %vm956_vm9, -1.5707964, %v8863_v0 }
  0xbf   :  { %v5129_v28 = vpop.eup %5128  ;;  %vm951_vm14 = vcmp.lt.f32.partialorder %v5452_v3, 0.0  ;;  %v5483_v19 = vsub.f32 %v314_v12, %v356_v45  ;;  %v5485_v21 = vadd.f32 %v413_v7, %v401_v23  ;;  %vm952_vm15 = vcmp.lt.f32.partialorder %v5450_v1, 0.0 }
  0xc0   :  { %v5131_v31 = vpop.eup %5130  ;;  %v5408_v35 = vmul.f32 %v5129_v28, %v5400_v27  ;;  %vm953_vm0 = vcmp.lt.f32.partialorder %v5423_v47, 0.0  ;;  %v475_v40 = vand.u32 2147483648, %v5410_v37  ;;  %v5493_v50 = vsel %vm942_vm10, 1.5707964, %v966_v14 }
  0xc1   :  { %v5133_v36 = vpop.eup %5132  ;;  %v5413_v38 = vmul.f32 %v5131_v31, %v5379_v10  ;;  %v5497_v34 = vsel %vm943_vm11, 1.5707964, %v967_v15  ;;  %v5503_v25 = vsel %vm944_vm13, 1.5707964, %v968_v18  ;;  %v5507_v26 = vmul.f32 %v5452_v3, %v5452_v3 }
  0xc2   :  { %v5135_v39 = vpop.eup %5134  ;;  %v5417_v42 = vmul.f32 %v5133_v36, %v5388_v17  ;;  %v5421_v44 = vand.u32 2147483647, %v5408_v35  ;;  %v5511_v28 = vmul.f32 %v5450_v1, %v5450_v1  ;;  %v5517_v31 = vsel %vm951_vm14, -1.5707964, %v8863_v0 }
  0xc3   :  { %v5426_v48 = vand.u32 2147483647, %v5413_v38  ;;  %v5435_v52 = vmul.f32 %v5135_v39, %v5423_v47  ;;  %v5520_v32 = vsel %vm952_vm15, -1.5707964, %v8863_v0  ;;  %v5523_v33 = vsel %vm953_vm0, -1.5707964, %v8863_v0 }
  0xc4   :  { %v5432_v51 = vand.u32 2147483647, %v5417_v42  ;;  %5140 = vrcp.f32 %v5421_v44  ;;  %v618_v57 = vadd.f32 1.0, %v5421_v44  ;;  %vm474_vm1 = vcmp.eq.f32.partialorder %v5410_v37, 0.0 }
  0xc5   :  { %5142 = vrcp.f32 %v5426_v48  ;;  %v619_v58 = vadd.f32 1.0, %v5426_v48  ;;  %v5448_v63 = vand.u32 2147483647, %v5435_v52  ;;  %vm570_vm6 = vcmp.gt.f32.partialorder %v5421_v44, 0.41421357 }
  0xc6   :  { %5144 = vrcp.f32 %v5432_v51  ;;  %v620_v61 = vadd.f32 1.0, %v5432_v51  ;;  %v5137_v4 = vpop.eup %5136  ;;  %v4844_v39 = vadd.f32 -1.0, %v5421_v44  ;;  %vm559_vm7 = vcmp.gt.f32.partialorder %v5426_v48, 2.4142137 }
  0xc7   :  { %5146 = vrcp.f32 %v618_v57  ;;  %v617_v9 = vadd.f32 1.0, %v5448_v63  ;;  %v464_v13 = vmul.f32 %v5137_v4, %v5394_v22  ;;  %v5139_v20 = vpop.eup %5138  ;;  %vm571_vm9 = vcmp.gt.f32.partialorder %v5426_v48, 0.41421357 }
  0xc8   :  { %5148 = vrcp.f32 %v619_v58  ;;  %v471_v30 = vmul.f32 %v5139_v20, %v5410_v37  ;;  %v4845_v46 = vadd.f32 -1.0, %v5426_v48  ;;  %vm560_vm10 = vcmp.gt.f32.partialorder %v5432_v51, 2.4142137 }
  0xc9   :  { %5150 = vrcp.f32 %v620_v61  ;;  %v466_v24 = vsel %vm465_vm5, %v5394_v22, %v464_v13  ;;  %vm558_vm5 = vcmp.gt.f32.partialorder %v5421_v44, 2.4142137  ;;  %vm572_vm11 = vcmp.gt.f32.partialorder %v5432_v51, 0.41421357 }
  0xca   :  { %5152 = vrsqrt.f32 %v5443_v60  ;;  %v5532_v43 = vsel %vm467_vm8, %v468_v8, %v466_v24  ;;  %v4846_v53 = vadd.f32 -1.0, %v5432_v51  ;;  %v473_v22 = vsel %vm472_vm12, %v5410_v37, %v471_v30 }
  0xcb   :  { %5154 = vrcp.f32 %v5448_v63  ;;  %v678_v58 = vsel %vm570_vm6, 0.7853982, %v8863_v0  ;;  %v679_v4 = vsel %vm571_vm9, 0.7853982, %v8863_v0  ;;  %vm939_vm8 = vcmp.gt.f32.partialorder %v5452_v3, 0.0 }
  0xcc   :  { %5156 = vrcp.f32 %v617_v9  ;;  %v4843_v13 = vadd.f32 -1.0, %v5448_v63  ;;  %v680_v20 = vsel %vm572_vm11, 0.7853982, %v8863_v0  ;;  %vm569_vm12 = vcmp.gt.f32.partialorder %v5448_v63, 0.41421357 }
  0xcd   :  { %5158 = vrcp.f32 %v5476_v16  ;;  %vm557_vm13 = vcmp.gt.f32.partialorder %v5448_v63, 2.4142137  ;;  %v5602_v37 = vsel %vm559_vm7, 1.5707964, %v679_v4  ;;  %vm940_vm14 = vcmp.gt.f32.partialorder %v5450_v1, 0.0 }
  0xce   :  { %5160 = vrcp.f32 %v5483_v19  ;;  %vm458_vm15 = vcmp.eq.f32.partialorder %v5443_v60, inf  ;;  %vm941_vm0 = vcmp.gt.f32.partialorder %v5423_v47, 0.0  ;;  %vm453_vm4 = vcmp.eq.f32.partialorder %v5485_v21, 0.0 }
  0xcf   :  { %5162 = vrsqrt.f32 %v5485_v21  ;;  %vm871_vm3 = vcmp.gt.f32.partialorder %v5364_v62, 0.0  ;;  %vm884_vm2 = vcmp.lt.f32.partialorder %v5368_v2, 0.0 }
  0xd1   :  { %v5141_v45 = vpop.eup %5140 }
  0xd2   :  { %v5143_v29 = vpop.eup %5142  ;;  %v586_v56 = vmul.f32 -1.0, %v5141_v45 }
  0xd3   :  { %v5145_v36 = vpop.eup %5144  ;;  %v588_v5 = vmul.f32 -1.0, %v5143_v29 }
  0xd4   :  { %v5147_v41 = vpop.eup %5146  ;;  %v590_v23 = vmul.f32 -1.0, %v5145_v36 }
  0xd5   :  { %v5149_v49 = vpop.eup %5148  ;;  %v634_v54 = vmul.f32 %v5147_v41, %v4844_v39 }
  0xd6   :  { %v5151_v55 = vpop.eup %5150  ;;  %v636_v57 = vmul.f32 %v5149_v49, %v4845_v46  ;;  %v411_v46 = vmul.f32 %v5476_v16, %v5476_v16 }
  0xd7   :  { %v5153_v61 = vpop.eup %5152  ;;  %v638_v7 = vmul.f32 %v5151_v55, %v4846_v53  ;;  %v654_v8 = vsel %vm570_vm6, %v634_v54, %v5421_v44  ;;  %v5586_v53 = vsel %vm474_vm1, %v475_v40, %v473_v22  ;;  %v5606_v40 = vsel %vm560_vm10, 1.5707964, %v680_v20 }
  0xd8   :  { %v5155_v9 = vpop.eup %5154  ;;  %v655_v11 = vsel %vm571_vm9, %v636_v57, %v5426_v48  ;;  %v5558_v12 = vsel %vm558_vm5, %v586_v56, %v654_v8  ;;  %v5594_v57 = vsel %vm558_vm5, 1.5707964, %v678_v58  ;;  %vm460_vm1 = vcmp.eq.f32.partialorder %v5443_v60, 0.0 }
  0xd9   :  { %v5157_v14 = vpop.eup %5156  ;;  %v656_v15 = vsel %vm572_vm11, %v638_v7, %v5432_v51  ;;  %v5566_v18 = vsel %vm559_vm7, %v588_v5, %v655_v11  ;;  %v702_v45 = vmul.f32 %v5558_v12, %v5558_v12  ;;  %v584_v41 = vmul.f32 -1.0, %v5155_v9 }
  0xda   :  { %v5575_v24 = vsel %vm560_vm10, %v590_v23, %v656_v15  ;;  %v703_v29 = vmul.f32 %v5566_v18, %v5566_v18  ;;  %v632_v30 = vmul.f32 %v5157_v14, %v4843_v13  ;;  %v5159_v49 = vpop.eup %5158  ;;  %v5614_v11 = vadd.f32 %v411_v46, %v5507_v26 }
  0xdb   :  { %v704_v36 = vmul.f32 %v5575_v24, %v5575_v24  ;;  %v714_v39 = vmul.f32 0.080537446, %v702_v45  ;;  %v5161_v56 = vpop.eup %5160  ;;  %v5618_v51 = vmul.f32 %v5159_v49, %v5452_v3  ;;  %v5630_v46 = vsel %vm939_vm8, 1.5707964, %v5517_v31 }
  0xdc   :  { %v715_v54 = vmul.f32 0.080537446, %v703_v29  ;;  %v653_v55 = vsel %vm569_vm12, %v632_v30, %v5448_v63  ;;  %v5163_v13 = vpop.eup %5162  ;;  %v5621_v14 = vmul.f32 %v5161_v56, %v5450_v1  ;;  %v1161_v30 = vsub.f32 1.0, %v5586_v53 }
  0xdd   :  { %v716_v5 = vmul.f32 0.080537446, %v704_v36  ;;  %v4856_v7 = vadd.f32 -0.13877685, %v714_v39  ;;  %v5598_v8 = vsel %vm557_vm13, %v584_v41, %v653_v55  ;;  %v677_v39 = vsel %vm569_vm12, 0.7853982, %v8863_v0 }
  0xde   :  { %v4857_v22 = vadd.f32 -0.13877685, %v715_v54  ;;  %v5610_v44 = vmul.f32 %v5598_v8, %v5598_v8  ;;  %v457_v49 = vmul.f32 %v5153_v61, %v5443_v60  ;;  %5164 = vrsqrt.f32 %v5614_v11 }
  0xdf   :  { %v4858_v58 = vadd.f32 -0.13877685, %v716_v5  ;;  %v738_v9 = vmul.f32 %v4856_v7, %v702_v45  ;;  %v5639_v7 = vand.u32 2147483647, %v5618_v51  ;;  %v5642_v31 = vand.u32 2147483647, %v5621_v14 }
  0xe0   :  { %v739_v48 = vmul.f32 %v4857_v22, %v703_v29  ;;  %v713_v4 = vmul.f32 0.080537446, %v5610_v44  ;;  %vm451_vm5 = vcmp.eq.f32.partialorder %v5485_v21, inf  ;;  %vm834_vm6 = vcmp.lt.f32.partialorder %v5408_v35, 0.0 }
  0xe1   :  { %v740_v15 = vmul.f32 %v4858_v58, %v704_v36  ;;  %v750_v20 = vadd.f32 0.19977711, %v738_v9  ;;  %v461_v58 = vand.u32 2147483648, %v5443_v60  ;;  %vm835_vm7 = vcmp.lt.f32.partialorder %v5413_v38, 0.0 }
  0xe2   :  { %v751_v26 = vadd.f32 0.19977711, %v739_v48  ;;  %v4855_v41 = vadd.f32 -0.13877685, %v713_v4  ;;  %v412_v4 = vmul.f32 %v5483_v19, %v5483_v19  ;;  %5166 = vrcp.f32 %v5639_v7 }
  0xe3   :  { %v752_v54 = vadd.f32 0.19977711, %v740_v15  ;;  %v762_v55 = vmul.f32 %v750_v20, %v702_v45  ;;  %v459_v15 = vsel %vm458_vm15, %v5443_v60, %v457_v49  ;;  %vm836_vm9 = vcmp.lt.f32.partialorder %v5417_v42, 0.0 }
  0xe4   :  { %v763_v56 = vmul.f32 %v751_v26, %v703_v29  ;;  %v737_v5 = vmul.f32 %v4855_v41, %v5610_v44  ;;  %v450_v41 = vmul.f32 %v5163_v13, %v5485_v21  ;;  %v5665_v49 = vadd.f32 %v412_v4, %v5511_v28 }
  0xe5   :  { %v764_v61 = vmul.f32 %v752_v54, %v704_v36  ;;  %v4868_v22 = vadd.f32 -0.3333295, %v762_v55  ;;  %v615_v55 = vadd.f32 1.0, %v5639_v7  ;;  %vm894_vm10 = vcmp.ge.f32.partialorder %v5400_v27, 0.0 }
  0xe6   :  { %v4869_v9 = vadd.f32 -0.3333295, %v763_v56  ;;  %v749_v48 = vadd.f32 0.19977711, %v737_v5  ;;  %v616_v56 = vadd.f32 1.0, %v5642_v31  ;;  %v452_v60 = vsel %vm451_vm5, %v5485_v21, %v450_v41 }
  0xe7   :  { %v4870_v20 = vadd.f32 -0.3333295, %v764_v61  ;;  %v786_v26 = vmul.f32 %v4868_v22, %v702_v45  ;;  %v5660_v45 = vsel %vm460_vm1, %v461_v58, %v459_v15  ;;  %5168 = vrcp.f32 %v615_v55 }
  0xe8   :  { %v787_v0 = vmul.f32 %v4869_v9, %v703_v29  ;;  %v761_v54 = vmul.f32 %v749_v48, %v5610_v44  ;;  %5170 = vrcp.f32 %v616_v56  ;;  %vm882_vm11 = vcmp.lt.f32.partialorder %v5361_v59, 0.0 }
  0xe9   :  { %v788_v5 = vmul.f32 %v4870_v20, %v704_v36  ;;  %v798_v23 = vmul.f32 %v786_v26, %v5558_v12  ;;  %vm895_vm8 = vcmp.ge.f32.partialorder %v5379_v10, 0.0  ;;  %5172 = vrcp.f32 %v5642_v31 }
  0xea   :  { %v799_v29 = vmul.f32 %v787_v0, %v5566_v18  ;;  %v4867_v13 = vadd.f32 -0.3333295, %v761_v54  ;;  %v454_v22 = vand.u32 2147483648, %v5485_v21  ;;  %vm870_vm12 = vcmp.gt.f32.partialorder %v5361_v59, 0.0 }
  0xeb   :  { %v800_v36 = vmul.f32 %v788_v5, %v5575_v24  ;;  %v810_v61 = vadd.f32 %v798_v23, %v5558_v12  ;;  %vm883_vm15 = vcmp.lt.f32.partialorder %v5364_v62, 0.0  ;;  %vm896_vm1 = vcmp.ge.f32.partialorder %v5388_v17, 0.0  ;;  %v5165_v9 = vpop.eup %5164 }
  0xec   :  { %v811_v0 = vadd.f32 %v799_v29, %v5566_v18  ;;  %v785_v28 = vmul.f32 %v4867_v13, %v5610_v44  ;;  %v689_v18 = vsel %vm557_vm13, 1.5707964, %v677_v39  ;;  %vm833_vm5 = vcmp.lt.f32.partialorder %v5435_v52, 0.0 }
  0xed   :  { %v812_v12 = vadd.f32 %v800_v36, %v5575_v24  ;;  %v822_v23 = vadd.f32 %v810_v61, %v5594_v57  ;;  %v5695_v57 = vsel %vm940_vm14, 1.5707964, %v5520_v32  ;;  %v5697_v58 = vsel %vm453_vm4, %v454_v22, %v452_v60 }
  0xee   :  { %v823_v44 = vadd.f32 %v811_v0, %v5602_v37  ;;  %v797_v24 = vmul.f32 %v785_v28, %v5598_v8  ;;  %vm872_vm13 = vcmp.gt.f32.partialorder %v5368_v2, 0.0  ;;  %v977_v21 = vsel %vm941_vm0, 1.5707964, %v5523_v33 }
  0xef   :  { %v824_v63 = vadd.f32 %v812_v12, %v5606_v40  ;;  %v846_v39 = vsub.f32 0.0, %v822_v23  ;;  %v1159_v37 = vsub.f32 1.0, %v5660_v45  ;;  %v440_v32 = vand.u32 2147483648, %v5614_v11  ;;  %v5167_v28 = vpop.eup %5166 }
  0xf0   :  { %v847_v48 = vsub.f32 0.0, %v823_v44  ;;  %v809_v4 = vadd.f32 %v797_v24, %v5598_v8  ;;  %5174 = vrsqrt.f32 %v5665_v49  ;;  %vm893_vm4 = vcmp.ge.f32.partialorder %v5423_v47, 0.0 }
  0xf1   :  { %v848_v15 = vsub.f32 0.0, %v824_v63  ;;  %v858_v40 = vsel %vm834_vm6, %v846_v39, %v822_v23  ;;  %v447_v20 = vand.u32 2147483648, %v5665_v49  ;;  %v1158_v33 = vsub.f32 1.0, %v5697_v58 }
  0xf2   :  { %v859_v26 = vsel %vm835_vm7, %v847_v48, %v823_v44  ;;  %vm881_vm14 = vcmp.lt.f32.partialorder %v5372_v6, 0.0  ;;  %v906_v8 = vadd.f32 3.1415927, %v858_v40  ;;  %v4880_v41 = vadd.f32 -3.1415927, %v858_v40 }
  0xf3   :  { %v821_v54 = vadd.f32 %v809_v4, %v689_v18  ;;  %v860_v55 = vsel %vm836_vm9, %v848_v15, %v824_v63  ;;  %v907_v56 = vadd.f32 3.1415927, %v859_v26  ;;  %v4881_v35 = vadd.f32 -3.1415927, %v859_v26 }
  0xf4   :  { %v5719_v5 = vmul.f32 %v5165_v9, %v5614_v11  ;;  %vm869_vm0 = vcmp.gt.f32.partialorder %v5372_v6, 0.0  ;;  %v908_v29 = vadd.f32 3.1415927, %v860_v55  ;;  %v4882_v13 = vadd.f32 -3.1415927, %v860_v55 }
  0xf5   :  { %v930_v38 = vsel %vm894_vm10, %v906_v8, %v4880_v41  ;;  %v845_v36 = vsub.f32 0.0, %v821_v54  ;;  %v931_v61 = vsel %vm895_vm8, %v907_v56, %v4881_v35  ;;  %v4841_v60 = vadd.f32 -1.0, %v5639_v7 }
  0xf6   :  { %v990_v42 = vsel %vm882_vm11, %v930_v38, %v5493_v50  ;;  %v4842_v0 = vadd.f32 -1.0, %v5642_v31  ;;  %v932_v22 = vsel %vm896_vm1, %v908_v29, %v4882_v13  ;;  %v991_v27 = vsel %vm883_vm15, %v931_v61, %v5497_v34  ;;  %v5169_v50 = vpop.eup %5168 }
  0xf7   :  { %v1002_v10 = vsel %vm870_vm12, %v858_v40, %v990_v42  ;;  %v857_v12 = vsel %vm833_vm5, %v845_v36, %v821_v54  ;;  %vm555_vm6 = vcmp.gt.f32.partialorder %v5639_v7, 2.4142137  ;;  %v992_v23 = vsel %vm884_vm2, %v932_v22, %v5503_v25  ;;  %v5171_v24 = vpop.eup %5170 }
  0xf8   :  { %v1003_v17 = vsel %vm871_vm3, %v859_v26, %v991_v27  ;;  %v1015_v18 = vmul.f32 0.31830987, %v1002_v10  ;;  %v905_v44 = vadd.f32 3.1415927, %v857_v12  ;;  %v1004_v59 = vsel %vm872_vm13, %v860_v55, %v992_v23  ;;  %v5173_v39 = vpop.eup %5172 }
  0xf9   :  { %v1016_v34 = vmul.f32 0.31830987, %v1003_v17  ;;  %v4879_v63 = vadd.f32 -3.1415927, %v857_v12  ;;  %vm556_vm7 = vcmp.gt.f32.partialorder %v5642_v31, 2.4142137  ;;  %v628_v52 = vmul.f32 %v5169_v50, %v4841_v60 }
  0xfa   :  { %v1017_v9 = vmul.f32 0.31830987, %v1004_v59  ;;  %v1027_v48 = vmul.f32 9.0, %v1015_v18  ;;  %vm567_vm9 = vcmp.gt.f32.partialorder %v5639_v7, 0.41421357  ;;  %v630_v25 = vmul.f32 %v5171_v24, %v4842_v0 }
  0xfb   :  { %v1028_v4 = vmul.f32 9.0, %v1016_v34  ;;  %v929_v62 = vsel %vm893_vm4, %v905_v44, %v4879_v63  ;;  %vm568_vm2 = vcmp.gt.f32.partialorder %v5642_v31, 0.41421357  ;;  %v580_v15 = vmul.f32 -1.0, %v5167_v28 }
  0xfc   :  { %v1029_v2 = vmul.f32 9.0, %v1017_v9  ;;  %v1039_v40 = vfloor.f32 %v1027_v48  ;;  %v1051_v26 = vceil.f32 %v1027_v48  ;;  %v989_v8 = vsel %vm881_vm14, %v929_v62, %v977_v21 }
  0xfd   :  { %v1040_v41 = vfloor.f32 %v1028_v4  ;;  %v1052_v54 = vceil.f32 %v1028_v4  ;;  %v582_v55 = vmul.f32 -1.0, %v5173_v39  ;;  %v651_v56 = vsel %vm567_vm9, %v628_v52, %v5639_v7  ;;  %v5758_v35 = vpop.eup %5174 }
  0xfe   :  { %v1041_v47 = vfloor.f32 %v1029_v2  ;;  %v1053_v29 = vceil.f32 %v1029_v2  ;;  %v1001_v13 = vsel %vm869_vm0, %v857_v12, %v989_v8  ;;  %v652_v38 = vsel %vm568_vm2, %v630_v25, %v5642_v31 }
  0xff   :  { %vm5765_vm3 = vcmp.eq.f32.partialorder %v1039_v40, %v1051_v26  ;;  %vm1076_vm10 = vcmp.lt.f32.partialorder %v1040_v41, 0.0  ;;  %v1087_v36 = vadd.f32 9.0, %v1039_v40  ;;  %v1088_v61 = vadd.f32 9.0, %v1040_v41 }
 0x100   :  { %vm1065_vm11 = vcmp.eq.f32.partialorder %v1041_v47, %v1053_v29  ;;  %vm1077_vm8 = vcmp.lt.f32.partialorder %v1041_v47, 0.0  ;;  %v1089_v42 = vadd.f32 9.0, %v1041_v47  ;;  %v5771_v60 = vsel %vm555_vm6, %v580_v15, %v651_v56 }
 0x101   :  { %vm5773_vm12 = vcmp.eq.f32.partialorder %v1040_v41, %v1052_v54  ;;  %v1100_v0 = vsel %vm1076_vm10, %v1088_v61, %v1040_v41  ;;  %v5778_v28 = vsel %vm1065_vm11, 1.0, %v5586_v53  ;;  %v5782_v22 = vsel %vm1065_vm11, 0.0, %v1161_v30 }
 0x102   :  { %v1101_v27 = vsel %vm1077_vm8, %v1089_v42, %v1041_v47  ;;  %vm1112_vm15 = vcmp.ge.f32.partialorder %v1100_v0, 9.0  ;;  %v4893_v10 = vadd.f32 -9.0, %v1100_v0  ;;  %v5786_v12 = vsel %vm556_vm7, %v582_v55, %v652_v38 }
 0x103   :  { %vm1113_vm1 = vcmp.ge.f32.partialorder %v1101_v27, 9.0  ;;  %v4894_v50 = vadd.f32 -9.0, %v1101_v27  ;;  %v699_v23 = vmul.f32 %v5771_v60, %v5771_v60  ;;  %v700_v17 = vmul.f32 %v5786_v12, %v5786_v12 }
 0x104   :  { %vm1075_vm5 = vcmp.lt.f32.partialorder %v1039_v40, 0.0  ;;  %v5795_v53 = vsel %vm5765_vm3, 1.0, %v5660_v45  ;;  %v5801_v30 = vsel %vm5765_vm3, 0.0, %v1159_v37  ;;  %vm8873_vm13 = vcmask 1040384  }
 0x105   :  { %v1014_v18 = vmul.f32 0.31830987, %v1001_v13  ;;  %v711_v44 = vmul.f32 0.080537446, %v699_v23  ;;  %v712_v24 = vmul.f32 0.080537446, %v700_v17  ;;  %v1099_v59 = vsel %vm1075_vm5, %v1087_v36, %v1039_v40 }
 0x106   :  { %v5803_v34 = vsel %vm1113_vm1, %v4894_v50, %v1101_v27  ;;  %vm1111_vm4 = vcmp.ge.f32.partialorder %v1099_v59, 9.0  ;;  %v4892_v63 = vadd.f32 -9.0, %v1099_v59  ;;  %vm437_vm10 = vcmp.eq.f32.partialorder %v5614_v11, inf }
 0x107   :  { %vm8870_vm14 = vcmp.eq.f32.partialorder %v5803_v34, 6.0  ;;  %vm8868_vm0 = vcmp.eq.f32.partialorder %v5803_v34, 7.0  ;;  %v4853_v45 = vadd.f32 -0.13877685, %v711_v44  ;;  %v4854_v52 = vadd.f32 -0.13877685, %v712_v24 }
 0x108   :  { %v1545_v37 = vsel %vm8868_vm0, %v5778_v28, 0.0  ;;  %v1557_v39 = vsel %vm8870_vm14, %v5782_v22, 0.0  ;;  %v5814_v9 = vsel %vm1111_vm4, %v4892_v63, %v1099_v59  ;;  %v1026_v25 = vmul.f32 9.0, %v1014_v18 }
 0x109   :  { %v1569_v48 = vadd.f32 %v1557_v39, %v1545_v37  ;;  %v5817_v4 = vsel %vm1112_vm15, %v4893_v10, %v1100_v0  ;;  %v735_v62 = vmul.f32 %v4853_v45, %v699_v23  ;;  %v736_v15 = vmul.f32 %v4854_v52, %v700_v17 }
 0x10a   :  { %vm1255_vm3 = vcmp.eq.f32.partialorder %v5814_v9, 6.0  ;;  %vm8869_vm11 = vcmp.eq.f32.partialorder %v5814_v9, 7.0  ;;  %v1038_v8 = vfloor.f32 %v1026_v25  ;;  %vm439_vm8 = vcmp.eq.f32.partialorder %v5614_v11, 0.0 }
 0x10b   :  { %v1543_v2 = vsel %vm8869_vm11, %v5795_v53, 0.0  ;;  %v1555_v40 = vsel %vm1255_vm3, %v5801_v30, 0.0  ;;  %v1857_v26 = vrot.slane %v1569_v48, 7  ;;  %vm444_vm15 = vcmp.eq.f32.partialorder %v5665_v49, inf }
 0x10c   :  { %v747_v41 = vadd.f32 0.19977711, %v735_v62  ;;  %v748_v54 = vadd.f32 0.19977711, %v736_v15  ;;  %v5829_v55 = vadd.f32 %v1555_v40, %v1543_v2  ;;  %v1050_v56 = vceil.f32 %v1026_v25 }
 0x10d   :  { %v5834_v47 = vsel %vm5773_vm12, 1.0, %v5532_v43  ;;  %vm1074_vm1 = vcmp.lt.f32.partialorder %v1038_v8, 0.0  ;;  %v1086_v29 = vadd.f32 9.0, %v1038_v8  ;;  %vm8871_vm5 = vcmp.eq.f32.partialorder %v5817_v4, 7.0 }
 0x10e   :  { %v759_v13 = vmul.f32 %v747_v41, %v699_v23  ;;  %v760_v38 = vmul.f32 %v748_v54, %v700_v17  ;;  %v1853_v21 = vrot.slane %v5829_v55, 7  ;;  %vm1256_vm4 = vcmp.eq.f32.partialorder %v5817_v4, 6.0 }
 0x10f   :  { %v8987_v36 = vsub.f32 1.0, %v5532_v43  ;;  %vm5845_vm0 = vcmp.eq.f32.partialorder %v1038_v8, %v1050_v56  ;;  %v1098_v0 = vsel %vm1074_vm1, %v1086_v29, %v1038_v8  ;;  %v1544_v27 = vsel %vm8871_vm5, %v5834_v47, 0.0 }
 0x110   :  { %vm446_vm11 = vcmp.eq.f32.partialorder %v5665_v49, 0.0  ;;  %v4865_v10 = vadd.f32 -0.3333295, %v759_v13  ;;  %v4866_v50 = vadd.f32 -0.3333295, %v760_v38  ;;  %v1858_v43 = vsel %vm8873_vm13, %v1853_v21, %v1857_v26 }
 0x111   :  { %v5843_v61 = vsel %vm5773_vm12, 0.0, %v8987_v36  ;;  %vm1110_vm14 = vcmp.ge.f32.partialorder %v1098_v0, 9.0  ;;  %v438_v6 = vsel %vm437_vm10, %v5614_v11, %v5719_v5  ;;  %v443_v18 = vmul.f32 %v5758_v35, %v5665_v49  ;;  %1971 = vrot.lane.b32.xlu1 %v1858_v43, %s5281_s26 }
 0x112   :  { %v4891_v44 = vadd.f32 -9.0, %v1098_v0  ;;  %v1556_v24 = vsel %vm1256_vm4, %v5843_v61, 0.0  ;;  %v8990_v59 = vmov 0.0   ;;  %v783_v45 = vmul.f32 %v4865_v10, %v699_v23 }
 0x113   :  { %v675_v63 = vsel %vm567_vm9, 0.7853982, %v8990_v59  ;;  %v784_v52 = vmul.f32 %v4866_v50, %v700_v17  ;;  %v1568_v37 = vadd.f32 %v1556_v24, %v1544_v27  ;;  %v676_v5 = vsel %vm568_vm2, 0.7853982, %v8990_v59 }
 0x114   :  { %vm831_vm12 = vcmp.lt.f32.partialorder %v5618_v51, 0.0  ;;  %v5873_v35 = vsel %vm1110_vm14, %v4891_v44, %v1098_v0  ;;  %v5878_v39 = vsel %vm5845_vm0, 1.0, %v5697_v58  ;;  %v5884_v23 = vsel %vm5845_vm0, 0.0, %v1158_v33 }
 0x115   :  { %v795_v17 = vmul.f32 %v783_v45, %v5771_v60  ;;  %v796_v48 = vmul.f32 %v784_v52, %v5786_v12  ;;  %vm1254_vm9 = vcmp.eq.f32.partialorder %v5873_v35, 6.0  ;;  %vm8872_vm2 = vcmp.eq.f32.partialorder %v5873_v35, 7.0 }
 0x116   :  { %v5894_v25 = vsel %vm439_vm8, %v440_v32, %v438_v6  ;;  %v445_v58 = vsel %vm444_vm15, %v5665_v49, %v443_v18  ;;  %v1542_v33 = vsel %vm8872_vm2, %v5878_v39, 0.0  ;;  %v1554_v62 = vsel %vm1254_vm9, %v5884_v23, 0.0 }
 0x117   :  { %vm891_vm14 = vcmp.ge.f32.partialorder %v5452_v3, 0.0  ;;  %v807_v15 = vadd.f32 %v795_v17, %v5771_v60  ;;  %v808_v11 = vadd.f32 %v796_v48, %v5786_v12  ;;  %v5908_v32 = vadd.f32 %v1554_v62, %v1542_v33 }
 0x118   :  { %v1855_v2 = vrot.slane %v1568_v37, 7  ;;  %vm892_vm0 = vcmp.ge.f32.partialorder %v5450_v1, 0.0  ;;  %v687_v40 = vsel %vm555_vm6, 1.5707964, %v675_v63  ;;  %v688_v26 = vsel %vm556_vm7, 1.5707964, %v676_v5 }
 0x119   :  { %vm832_vm10 = vcmp.lt.f32.partialorder %v5621_v14, 0.0  ;;  %vm879_vm8 = vcmp.lt.f32.partialorder %v5476_v16, 0.0  ;;  %vm1243_vm15 = vcmp.eq.f32.partialorder %v5814_v9, 5.0  ;;  %v819_v60 = vadd.f32 %v807_v15, %v687_v40 }
 0x11a   :  { %v820_v8 = vadd.f32 %v808_v11, %v688_v26  ;;  %vm867_vm1 = vcmp.gt.f32.partialorder %v5476_v16, 0.0  ;;  %vm880_vm5 = vcmp.lt.f32.partialorder %v5483_v19, 0.0  ;;  %v1850_v12 = vrot.slane %v5908_v32, 7 }
 0x11b   :  { %vm1245_vm2 = vcmp.eq.f32.partialorder %v5803_v34, 5.0  ;;  %v5926_v7 = vsel %vm446_vm11, %v447_v20, %v445_v58  ;;  %vm868_vm6 = vcmp.gt.f32.partialorder %v5483_v19, 0.0  ;;  %v1156_v31 = vsub.f32 1.0, %v5894_v25 }
 0x11c   :  { %v1507_v41 = vsel %vm1255_vm3, %v5795_v53, 0.0  ;;  %vm8991_vm7 = vcmp.eq.f32.partialorder %v5803_v34, 6.0  ;;  %v843_v56 = vsub.f32 0.0, %v819_v60  ;;  %v844_v29 = vsub.f32 0.0, %v820_v8 }
 0x11d   :  { %v1509_v54 = vsel %vm8991_vm7, %v5778_v28, 0.0  ;;  %v1856_v49 = vsel %vm8873_vm13, %v1850_v12, %v1855_v2  ;;  %v1519_v20 = vsel %vm1243_vm15, %v5801_v30, 0.0  ;;  %v1521_v13 = vsel %vm1245_vm2, %v5782_v22, 0.0 }
 0x11e   :  { %1969 = vrot.lane.b32.xlu0 %v1856_v49, %s5281_s26  ;;  %vm1242_vm3 = vcmp.eq.f32.partialorder %v5873_v35, 5.0  ;;  %vm1244_vm11 = vcmp.eq.f32.partialorder %v5817_v4, 5.0  ;;  %v1506_v38 = vsel %vm1254_vm9, %v5878_v39, 0.0  ;;  %v855_v36 = vsel %vm831_vm12, %v843_v56, %v819_v60 }
 0x11f   :  { %v856_v42 = vsel %vm832_vm10, %v844_v29, %v820_v8  ;;  %vm1231_vm7 = vcmp.eq.f32.partialorder %v5814_v9, 4.0  ;;  %vm1233_vm13 = vcmp.eq.f32.partialorder %v5803_v34, 4.0  ;;  %v903_v0 = vadd.f32 3.1415927, %v855_v36 }
 0x120   :  { %v904_v27 = vadd.f32 3.1415927, %v856_v42  ;;  %v4877_v10 = vadd.f32 -3.1415927, %v855_v36  ;;  %v5957_v50 = vadd.f32 %v1519_v20, %v1507_v41  ;;  %v4878_v43 = vadd.f32 -3.1415927, %v856_v42 }
 0x121   :  { %v1508_v6 = vsel %vm1256_vm4, %v5834_v47, 0.0  ;;  %v1518_v51 = vsel %vm1242_vm3, %v5884_v23, 0.0  ;;  %v1520_v14 = vsel %vm1244_vm11, %v5843_v61, 0.0  ;;  %v5970_v44 = vadd.f32 %v1521_v13, %v1509_v54 }
 0x122   :  { %v927_v18 = vsel %vm891_vm14, %v903_v0, %v4877_v10  ;;  %v1471_v24 = vsel %vm1243_vm15, %v5795_v53, 0.0  ;;  %v1473_v59 = vsel %vm1245_vm2, %v5778_v28, 0.0  ;;  %v928_v63 = vsel %vm892_vm0, %v904_v27, %v4878_v43 }
 0x123   :  { %v987_v45 = vsel %vm879_vm8, %v927_v18, %v5630_v46  ;;  %v1483_v3 = vsel %vm1231_vm7, %v5801_v30, 0.0  ;;  %v1485_v52 = vsel %vm1233_vm13, %v5782_v22, 0.0  ;;  %v988_v37 = vsel %vm880_vm5, %v928_v63, %v5695_v57 }
 0x124   :  { %v999_v1 = vsel %vm867_vm1, %v855_v36, %v987_v45  ;;  %v5994_v5 = vadd.f32 %v1518_v51, %v1506_v38  ;;  %v5996_v17 = vadd.f32 %v1520_v14, %v1508_v6  ;;  %v1000_v46 = vsel %vm868_vm6, %v856_v42, %v988_v37 }
 0x125   :  { %v1012_v48 = vmul.f32 0.31830987, %v999_v1  ;;  %vm1230_vm4 = vcmp.eq.f32.partialorder %v5873_v35, 4.0  ;;  %vm1232_vm12 = vcmp.eq.f32.partialorder %v5817_v4, 4.0  ;;  %v1013_v58 = vmul.f32 0.31830987, %v1000_v46 }
 0x126   :  { %v1157_v33 = vsub.f32 1.0, %v5926_v7  ;;  %v6003_v62 = vadd.f32 %v1483_v3, %v1471_v24  ;;  %v6005_v57 = vadd.f32 %v1485_v52, %v1473_v59  ;;  %v1821_v15 = vrot.slane %v5957_v50, 7 }
 0x127   :  { %v1024_v16 = vmul.f32 9.0, %v1012_v48  ;;  %v1825_v11 = vrot.slane %v5970_v44, 7  ;;  %v1470_v19 = vsel %vm1242_vm3, %v5878_v39, 0.0  ;;  %v1025_v2 = vmul.f32 9.0, %v1013_v58 }
 0x128   :  { %v1472_v40 = vsel %vm1244_vm11, %v5834_v47, 0.0  ;;  %v1482_v26 = vsel %vm1230_vm4, %v5884_v23, 0.0  ;;  %v1484_v60 = vsel %vm1232_vm12, %v5843_v61, 0.0  ;;  %v1818_v54 = vrot.slane %v5994_v5, 7 }
 0x129   :  { %v1036_v8 = vfloor.f32 %v1024_v16  ;;  %v1048_v41 = vceil.f32 %v1024_v16  ;;  %v1823_v56 = vrot.slane %v5996_v17, 7  ;;  %v1037_v29 = vfloor.f32 %v1025_v2 }
 0x12a   :  { %v1049_v49 = vceil.f32 %v1025_v2  ;;  %v1789_v20 = vrot.slane %v6003_v62, 7  ;;  %v1793_v13 = vrot.slane %v6005_v57, 7  ;;  %v6025_v36 = vadd.f32 %v1482_v26, %v1470_v19 }
 0x12b   :  { %vm1072_vm5 = vcmp.lt.f32.partialorder %v1036_v8, 0.0  ;;  %v1084_v38 = vadd.f32 9.0, %v1036_v8  ;;  %v6027_v42 = vadd.f32 %v1484_v60, %v1472_v40  ;;  %vm6029_vm9 = vcmp.eq.f32.partialorder %v1036_v8, %v1048_v41 }
 0x12c   :  { %vm1073_vm2 = vcmp.lt.f32.partialorder %v1037_v29, 0.0  ;;  %v1085_v27 = vadd.f32 9.0, %v1037_v29  ;;  %vm1219_vm14 = vcmp.eq.f32.partialorder %v5814_v9, 3.0  ;;  %vm1061_vm0 = vcmp.eq.f32.partialorder %v1037_v29, %v1049_v49 }
 0x12d   :  { %v1096_v10 = vsel %vm1072_vm5, %v1084_v38, %v1036_v8  ;;  %vm1221_vm10 = vcmp.eq.f32.partialorder %v5803_v34, 3.0  ;;  %v1435_v43 = vsel %vm1231_vm7, %v5795_v53, 0.0  ;;  %v1437_v14 = vsel %vm1233_vm13, %v5778_v28, 0.0 }
 0x12e   :  { %v1097_v6 = vsel %vm1073_vm2, %v1085_v27, %v1037_v29  ;;  %vm1108_vm8 = vcmp.ge.f32.partialorder %v1096_v10, 9.0  ;;  %v4889_v51 = vadd.f32 -9.0, %v1096_v10  ;;  %v6044_v24 = vsel %vm6029_vm9, 1.0, %v5894_v25 }
 0x12f   :  { %vm1109_vm15 = vcmp.ge.f32.partialorder %v1097_v6, 9.0  ;;  %v4890_v18 = vadd.f32 -9.0, %v1097_v6  ;;  %v1447_v59 = vsel %vm1219_vm14, %v5801_v30, 0.0  ;;  %v6050_v63 = vsel %vm1061_vm0, 1.0, %v5926_v7 }
 0x130   :  { %v6056_v45 = vsel %vm6029_vm9, 0.0, %v1156_v31  ;;  %v6058_v3 = vsel %vm1061_vm0, 0.0, %v1157_v33  ;;  %v6060_v52 = vsel %vm1108_vm8, %v4889_v51, %v1096_v10  ;;  %v1449_v26 = vsel %vm1221_vm10, %v5782_v22, 0.0 }
 0x131   :  { %v6062_v37 = vsel %vm1109_vm15, %v4890_v18, %v1097_v6  ;;  %vm1252_vm13 = vcmp.eq.f32.partialorder %v6060_v52, 6.0  ;;  %vm1264_vm1 = vcmp.eq.f32.partialorder %v6060_v52, 7.0  ;;  %vm1240_vm6 = vcmp.eq.f32.partialorder %v6060_v52, 5.0 }
 0x132   :  { %vm1253_vm3 = vcmp.eq.f32.partialorder %v6062_v37, 6.0  ;;  %vm1265_vm11 = vcmp.eq.f32.partialorder %v6062_v37, 7.0  ;;  %v1540_v25 = vsel %vm1264_vm1, %v6044_v24, 0.0  ;;  %v1552_v7 = vsel %vm1252_vm13, %v6056_v45, 0.0 }
 0x133   :  { %v1541_v31 = vsel %vm1265_vm11, %v6050_v63, 0.0  ;;  %v1553_v1 = vsel %vm1253_vm3, %v6058_v3, 0.0  ;;  %v1564_v46 = vadd.f32 %v1552_v7, %v1540_v25  ;;  %vm1241_vm7 = vcmp.eq.f32.partialorder %v6062_v37, 5.0 }
 0x134   :  { %v1565_v48 = vadd.f32 %v1553_v1, %v1541_v31  ;;  %v1505_v58 = vsel %vm1253_vm3, %v6050_v63, 0.0  ;;  %v1517_v33 = vsel %vm1241_vm7, %v6058_v3, 0.0  ;;  %v1504_v16 = vsel %vm1252_vm13, %v6044_v24, 0.0 }
 0x135   :  { %v1849_v19 = vrot.slane %v1564_v46, 7  ;;  %v1529_v2 = vadd.f32 %v1517_v33, %v1505_v58  ;;  %v1516_v40 = vsel %vm1240_vm6, %v6056_v45, 0.0  ;;  %vm1229_vm5 = vcmp.eq.f32.partialorder %v6062_v37, 4.0 }
 0x136   :  { %v1852_v60 = vrot.slane %v1565_v48, 7  ;;  %v1528_v8 = vadd.f32 %v1516_v40, %v1504_v16  ;;  %v6090_v41 = vadd.f32 %v1447_v59, %v1435_v43  ;;  %vm8994_vm9 = vcmask 1040384  }
 0x137   :  { %v1851_v29 = vsel %vm8994_vm9, %v1849_v19, %v1850_v12  ;;  %vm1228_vm2 = vcmp.eq.f32.partialorder %v6060_v52, 4.0  ;;  %vm1218_vm0 = vcmp.eq.f32.partialorder %v5873_v35, 3.0  ;;  %vm1220_vm8 = vcmp.eq.f32.partialorder %v5817_v4, 3.0  ;;  %vm8995_vm15 = vmmov %vm8994_vm9 }
 0x138   :  { %v1854_v49 = vsel %vm8995_vm15, %v1852_v60, %v1853_v21  ;;  %1965 = vrot.lane.b32.xlu0 %v1851_v29, %s5281_s26  ;;  %v1469_v38 = vsel %vm1241_vm7, %v6050_v63, 0.0  ;;  %v1461_v0 = vadd.f32 %v1449_v26, %v1437_v14  ;;  %v1434_v32 = vsel %vm1230_vm4, %v5878_v39, 0.0  ;;  %vm8996_vm4 = vmmov %vm8994_vm9 }
 0x139   :  { %1967 = vrot.lane.b32.xlu1 %v1854_v49, %s5281_s26  ;;  %v1820_v12 = vrot.slane %v1529_v2, 7  ;;  %v1481_v55 = vsel %vm1229_vm5, %v6058_v3, 0.0  ;;  %v1468_v21 = vsel %vm1240_vm6, %v6044_v24, 0.0  ;;  %v1480_v27 = vsel %vm1228_vm2, %v6056_v45, 0.0  ;;  %vm8997_vm13 = vmmov %vm8996_vm4 }
 0x13a   :  { %v1817_v10 = vrot.slane %v1528_v8, 7  ;;  %v1436_v43 = vsel %vm1232_vm12, %v5834_v47, 0.0  ;;  %v1446_v6 = vsel %vm1218_vm0, %v5884_v23, 0.0  ;;  %v1448_v51 = vsel %vm1220_vm8, %v5843_v61, 0.0  ;;  %vm8998_vm12 = vmmov %vm8996_vm4 }
 0x13b   :  { %v1826_v14 = vsel %vm8996_vm4, %v1821_v15, %v1825_v11  ;;  %v1824_v18 = vsel %vm8997_vm13, %v1818_v54, %v1823_v56  ;;  %v1794_v59 = vsel %vm8998_vm12, %v1789_v20, %v1793_v13  ;;  %v1493_v25 = vadd.f32 %v1481_v55, %v1469_v38  ;;  %vm8999_vm7 = vmmov %vm8996_vm4 }
 0x13c   :  { %1961 = vrot.lane.b32.xlu0 %v1824_v18, %s5281_s26  ;;  %v1492_v44 = vadd.f32 %v1480_v27, %v1468_v21  ;;  %vm1217_vm6 = vcmp.eq.f32.partialorder %v6062_v37, 3.0  ;;  %vm1216_vm3 = vcmp.eq.f32.partialorder %v6060_v52, 3.0  ;;  %v1786_v17 = vrot.slane %v6025_v36, 7  ;;  %vm9000_vm9 = vmmov %vm8996_vm4 }
 0x13d   :  { %1963 = vrot.lane.b32.xlu1 %v1826_v14, %s5281_s26  ;;  %v1791_v11 = vrot.slane %v6027_v42, 7  ;;  %v6148_v56 = vadd.f32 %v1446_v6, %v1434_v32  ;;  %v1460_v57 = vadd.f32 %v1448_v51, %v1436_v43  ;;  %v1822_v13 = vsel %vm8999_vm7, %v1820_v12, %v1821_v15  ;;  %vm9001_vm13 = vmmov %vm8999_vm7 }
 0x13e   :  { %v1819_v7 = vsel %vm9000_vm9, %v1817_v10, %v1818_v54  ;;  %v1757_v31 = vrot.slane %v6090_v41, 7  ;;  %v1761_v1 = vrot.slane %v1461_v0, 7  ;;  %v1433_v36 = vsel %vm1229_vm5, %v6050_v63, 0.0  ;;  %vm9002_vm12 = vmmov %vm8999_vm7 }
 0x13f   :  { %v1445_v42 = vsel %vm1217_vm6, %v6058_v3, 0.0  ;;  %v1432_v50 = vsel %vm1228_vm2, %v6044_v24, 0.0  ;;  %v1444_v5 = vsel %vm1216_vm3, %v6056_v45, 0.0  ;;  %v1788_v15 = vrot.slane %v1493_v25, 7 }
 0x140   :  { %1957 = vrot.lane.b32.xlu0 %v1819_v7, %s5281_s26  ;;  %v1785_v54 = vrot.slane %v1492_v44, 7  ;;  %vm1207_vm15 = vcmp.eq.f32.partialorder %v5814_v9, 2.0  ;;  %vm1209_vm5 = vcmp.eq.f32.partialorder %v5803_v34, 2.0  ;;  %v1754_v46 = vrot.slane %v6148_v56, 7 }
 0x141   :  { %1959 = vrot.lane.b32.xlu1 %v1822_v13, %s5281_s26  ;;  %v1759_v48 = vrot.slane %v1460_v57, 7  ;;  %vm1206_vm4 = vcmp.eq.f32.partialorder %v5873_v35, 2.0  ;;  %vm1208_vm2 = vcmp.eq.f32.partialorder %v5817_v4, 2.0  ;;  %v1792_v58 = vsel %vm9001_vm13, %v1786_v17, %v1791_v11 }
 0x142   :  { %v1762_v33 = vsel %vm9002_vm12, %v1757_v31, %v1761_v1  ;;  %v1457_v16 = vadd.f32 %v1445_v42, %v1433_v36  ;;  %v1456_v19 = vadd.f32 %v1444_v5, %v1432_v50  ;;  %v1399_v2 = vsel %vm1219_vm14, %v5795_v53, 0.0  ;;  %vm9003_vm14 = vmmov %vm8999_vm7 }
 0x143   :  { %v1401_v40 = vsel %vm1221_vm10, %v5778_v28, 0.0  ;;  %v1411_v26 = vsel %vm1207_vm15, %v5801_v30, 0.0  ;;  %v1413_v60 = vsel %vm1209_vm5, %v5782_v22, 0.0  ;;  %v1398_v8 = vsel %vm1218_vm0, %v5878_v39, 0.0  ;;  %vm9004_vm10 = vmmov %vm8999_vm7 }
 0x144   :  { %1953 = vrot.lane.b32.xlu0 %v1792_v58, %s5281_s26  ;;  %v1400_v29 = vsel %vm1220_vm8, %v5834_v47, 0.0  ;;  %v1410_v49 = vsel %vm1206_vm4, %v5884_v23, 0.0  ;;  %v1412_v38 = vsel %vm1208_vm2, %v5843_v61, 0.0  ;;  %v1790_v0 = vsel %vm9003_vm14, %v1788_v15, %v1789_v20  ;;  %vm9005_vm0 = vmmov %vm8999_vm7 }
 0x145   :  { %1955 = vrot.lane.b32.xlu1 %v1794_v59, %s5281_s26  ;;  %v1787_v32 = vsel %vm9004_vm10, %v1785_v54, %v1786_v17  ;;  %v1760_v12 = vsel %vm9005_vm0, %v1754_v46, %v1759_v48  ;;  %vm1205_vm8 = vcmp.eq.f32.partialorder %v6062_v37, 2.0  ;;  %v1756_v55 = vrot.slane %v1457_v16, 7  ;;  %vm9008_vm12 = vmmov %vm9005_vm0 }
 0x146   :  { %v6212_v21 = vadd.f32 %v1411_v26, %v1399_v2  ;;  %v1425_v27 = vadd.f32 %v1413_v60, %v1401_v40  ;;  %vm1204_vm7 = vcmp.eq.f32.partialorder %v6060_v52, 2.0  ;;  %v6215_v10 = vadd.f32 %v1410_v49, %v1398_v8 }
 0x147   :  { %v1424_v43 = vadd.f32 %v1412_v38, %v1400_v29  ;;  %vm1195_vm9 = vcmp.eq.f32.partialorder %v5814_v9, 1.0  ;;  %vm1197_vm13 = vcmp.eq.f32.partialorder %v5803_v34, 1.0  ;;  %v1753_v62 = vrot.slane %v1456_v19, 7 }
 0x148   :  { %1949 = vrot.lane.b32.xlu0 %v1787_v32, %s5281_s26  ;;  %v1397_v20 = vsel %vm1217_vm6, %v6050_v63, 0.0  ;;  %v1409_v6 = vsel %vm1205_vm8, %v6058_v3, 0.0  ;;  %v1396_v51 = vsel %vm1216_vm3, %v6044_v24, 0.0  ;;  %v1408_v14 = vsel %vm1204_vm7, %v6056_v45, 0.0 }
 0x149   :  { %1951 = vrot.lane.b32.xlu1 %v1790_v0, %s5281_s26  ;;  %v1363_v18 = vsel %vm1207_vm15, %v5795_v53, 0.0  ;;  %v1375_v59 = vsel %vm1195_vm9, %v5801_v30, 0.0  ;;  %vm1194_vm6 = vcmp.eq.f32.partialorder %v5873_v35, 1.0  ;;  %v1725_v25 = vrot.slane %v6212_v21, 7  ;;  %vm9006_vm15 = vmmov %vm9005_vm0 }
 0x14a   :  { %v1729_v44 = vrot.slane %v1425_v27, 7  ;;  %v1365_v17 = vsel %vm1209_vm5, %v5778_v28, 0.0  ;;  %v1377_v11 = vsel %vm1197_vm13, %v5782_v22, 0.0  ;;  %v1722_v56 = vrot.slane %v6215_v10, 7  ;;  %vm9007_vm5 = vmmov %vm9005_vm0 }
 0x14b   :  { %v1727_v57 = vrot.slane %v1424_v43, 7  ;;  %v1421_v13 = vadd.f32 %v1409_v6, %v1397_v20  ;;  %vm1196_vm3 = vcmp.eq.f32.partialorder %v5817_v4, 1.0  ;;  %v1420_v7 = vadd.f32 %v1408_v14, %v1396_v51 }
 0x14c   :  { %1945 = vrot.lane.b32.xlu0 %v1760_v12, %s5281_s26  ;;  %v6250_v1 = vadd.f32 %v1375_v59, %v1363_v18  ;;  %v1362_v36 = vsel %vm1206_vm4, %v5878_v39, 0.0  ;;  %v1374_v42 = vsel %vm1194_vm6, %v5884_v23, 0.0  ;;  %v1758_v50 = vsel %vm9006_vm15, %v1756_v55, %v1757_v31  ;;  %vm9009_vm4 = vmmov %vm9005_vm0 }
 0x14d   :  { %1947 = vrot.lane.b32.xlu1 %v1762_v33, %s5281_s26  ;;  %v1389_v5 = vadd.f32 %v1377_v11, %v1365_v17  ;;  %v1755_v15 = vsel %vm9007_vm5, %v1753_v62, %v1754_v46  ;;  %v1730_v54 = vsel %vm9008_vm12, %v1725_v25, %v1729_v44  ;;  %v1364_v48 = vsel %vm1208_vm2, %v5834_v47, 0.0 }
 0x14e   :  { %v1376_v58 = vsel %vm1196_vm3, %v5843_v61, 0.0  ;;  %v1728_v16 = vsel %vm9009_vm4, %v1722_v56, %v1727_v57  ;;  %v6271_v33 = vadd.f32 %v1374_v42, %v1362_v36  ;;  %vm1193_vm14 = vcmp.eq.f32.partialorder %v6062_v37, 1.0 }
 0x14f   :  { %vm1192_vm10 = vcmp.eq.f32.partialorder %v6060_v52, 1.0  ;;  %v1724_v41 = vrot.slane %v1421_v13, 7  ;;  %v1721_v31 = vrot.slane %v1420_v7, 7  ;;  %v1693_v46 = vrot.slane %v6250_v1, 7 }
 0x150   :  { %1941 = vrot.lane.b32.xlu0 %v1755_v15, %s5281_s26  ;;  %vm1183_vm2 = vcmp.eq.f32.partialorder %v5814_v9, 0.0  ;;  %v1697_v19 = vrot.slane %v1389_v5, 7  ;;  %v1388_v2 = vadd.f32 %v1376_v58, %v1364_v48  ;;  %vm1185_vm0 = vcmp.eq.f32.partialorder %v5803_v34, 0.0 }
 0x151   :  { %1943 = vrot.lane.b32.xlu1 %v1758_v50, %s5281_s26  ;;  %vm1182_vm15 = vcmp.eq.f32.partialorder %v5873_v35, 0.0  ;;  %v1361_v40 = vsel %vm1205_vm8, %v6050_v63, 0.0  ;;  %v1373_v26 = vsel %vm1193_vm14, %v6058_v3, 0.0  ;;  %v1360_v60 = vsel %vm1204_vm7, %v6044_v24, 0.0 }
 0x152   :  { %v1372_v8 = vsel %vm1192_vm10, %v6056_v45, 0.0  ;;  %v1690_v29 = vrot.slane %v6271_v33, 7  ;;  %v1327_v49 = vsel %vm1195_vm9, %v5795_v53, 0.0  ;;  %v1329_v38 = vsel %vm1197_vm13, %v5778_v28, 0.0  ;;  %vm9010_vm9 = vmmov %vm9009_vm4 }
 0x153   :  { %v1339_v0 = vsel %vm1183_vm2, %v5801_v30, 0.0  ;;  %v1341_v32 = vsel %vm1185_vm0, %v5782_v22, 0.0  ;;  %vm1184_vm8 = vcmp.eq.f32.partialorder %v5817_v4, 0.0  ;;  %v1326_v12 = vsel %vm1194_vm6, %v5878_v39, 0.0  ;;  %vm9011_vm13 = vmmov %vm9009_vm4 }
 0x154   :  { %1937 = vrot.lane.b32.xlu0 %v1728_v16, %s5281_s26  ;;  %v1338_v55 = vsel %vm1182_vm15, %v5884_v23, 0.0  ;;  %v1695_v21 = vrot.slane %v1388_v2, 7  ;;  %v1385_v27 = vadd.f32 %v1373_v26, %v1361_v40  ;;  %v1384_v10 = vadd.f32 %v1372_v8, %v1360_v60  ;;  %vm9012_vm6 = vmmov %vm9009_vm4  ;;  %v51_v40 = vld [vmem:[#allocation3 + $0x48] sm:$0xff] }
 0x155   :  { %1939 = vrot.lane.b32.xlu1 %v1730_v54, %s5281_s26  ;;  %vm1181_vm7 = vcmp.eq.f32.partialorder %v6062_v37, 0.0  ;;  %v1726_v43 = vsel %vm9010_vm9, %v1724_v41, %v1725_v25  ;;  %v1723_v62 = vsel %vm9011_vm13, %v1721_v31, %v1722_v56  ;;  %v1351_v20 = vadd.f32 %v1339_v0, %v1327_v49  ;;  %v50_v0 = vld [vmem:[#allocation3 + $0x40] sm:$0xff] }
 0x156   :  { %vm1180_vm5 = vcmp.eq.f32.partialorder %v6060_v52, 0.0  ;;  %v1353_v6 = vadd.f32 %v1341_v32, %v1329_v38  ;;  %v1328_v51 = vsel %vm1196_vm3, %v5834_v47, 0.0  ;;  %v1340_v14 = vsel %vm1184_vm8, %v5843_v61, 0.0  ;;  %vm9013_vm3 = vmmov %vm9009_vm4  ;;  %v53_v38 = vld [vmem:[#allocation3 + $0x58] sm:$0xff]  ;;  %v52_v32 = vld [vmem:[#allocation3 + $0x50] sm:$0xff] }
 0x157   :  { %v1350_v18 = vadd.f32 %v1338_v55, %v1326_v12  ;;  %v1325_v59 = vsel %vm1193_vm14, %v6050_v63, 0.0  ;;  %v1337_v25 = vsel %vm1181_vm7, %v6058_v3, 0.0  ;;  %v1324_v44 = vsel %vm1192_vm10, %v6044_v24, 0.0 }
 0x158   :  { %1933 = vrot.lane.b32.xlu0 %v1723_v62, %s5281_s26  ;;  %v1336_v17 = vsel %vm1180_vm5, %v6056_v45, 0.0  ;;  %v1698_v11 = vsel %vm9012_vm6, %v1693_v46, %v1697_v19  ;;  %v1696_v56 = vsel %vm9013_vm3, %v1690_v29, %v1695_v21  ;;  %v1692_v57 = vrot.slane %v1385_v27, 7 }
 0x159   :  { %1935 = vrot.lane.b32.xlu1 %v1726_v43, %s5281_s26  ;;  %v1689_v13 = vrot.slane %v1384_v10, 7  ;;  %v1352_v7 = vadd.f32 %v1340_v14, %v1328_v51  ;;  %vm1279_vm12 = vcmp.eq.f32.partialorder %v5814_v9, 8.0  ;;  %vm1281_vm4 = vcmp.eq.f32.partialorder %v5803_v34, 8.0 }
 0x15a   :  { %vm1278_vm14 = vcmp.eq.f32.partialorder %v5873_v35, 8.0  ;;  %v1661_v36 = vrot.slane %v1351_v20, 7  ;;  %v1349_v42 = vadd.f32 %v1337_v25, %v1325_v59  ;;  %v1348_v50 = vadd.f32 %v1336_v17, %v1324_v44  ;;  %v55_v17 = vld [vmem:[#allocation3 + $0x68] sm:$0xff] }
 0x15b   :  { %vm1280_vm10 = vcmp.eq.f32.partialorder %v5817_v4, 8.0  ;;  %v1665_v5 = vrot.slane %v1353_v6, 7  ;;  %v1658_v15 = vrot.slane %v1350_v18, 7  ;;  %v1291_v54 = vsel %vm1183_vm2, %v5795_v53, 0.0 }
 0x15c   :  { %1929 = vrot.lane.b32.xlu0 %v1696_v56, %s5281_s26  ;;  %v1293_v48 = vsel %vm1185_vm0, %v5778_v28, 0.0  ;;  %v1303_v58 = vsel %vm1279_vm12, %v5801_v30, 0.0  ;;  %v1305_v16 = vsel %vm1281_vm4, %v5782_v22, 0.0  ;;  %v1290_v33 = vsel %vm1182_vm15, %v5878_v39, 0.0  ;;  %vm9014_vm0 = vmmov %vm9013_vm3 }
 0x15d   :  { %1931 = vrot.lane.b32.xlu1 %v1698_v11, %s5281_s26  ;;  %v1302_v41 = vsel %vm1278_vm14, %v5884_v23, 0.0  ;;  %v1663_v31 = vrot.slane %v1352_v7, 7  ;;  %v1292_v19 = vsel %vm1184_vm8, %v5834_v47, 0.0  ;;  %v1304_v2 = vsel %vm1280_vm10, %v5843_v61, 0.0  ;;  %vm9015_vm15 = vmmov %vm9014_vm0  ;;  %v54_v11 = vld [vmem:[#allocation3 + $0x60] sm:$0xff] }
 0x15e   :  { %vm1277_vm2 = vcmp.eq.f32.partialorder %v6062_v37, 8.0  ;;  %v1694_v26 = vsel %vm9014_vm0, %v1692_v57, %v1693_v46  ;;  %v1691_v60 = vsel %vm9015_vm15, %v1689_v13, %v1690_v29  ;;  %v1660_v8 = vrot.slane %v1349_v42, 7  ;;  %vm9016_vm9 = vmmov %vm9014_vm0 }
 0x15f   :  { %v1657_v49 = vrot.slane %v1348_v50, 7  ;;  %v6379_v12 = vadd.f32 %v1303_v58, %v1291_v54  ;;  %v1317_v55 = vadd.f32 %v1305_v16, %v1293_v48  ;;  %v1314_v21 = vadd.f32 %v1302_v41, %v1290_v33  ;;  %vm9017_vm13 = vmmov %vm9014_vm0 }
 0x160   :  { %1925 = vrot.lane.b32.xlu0 %v1691_v60, %s5281_s26  ;;  %vm1276_vm8 = vcmp.eq.f32.partialorder %v6060_v52, 8.0  ;;  %v1316_v1 = vadd.f32 %v1304_v2, %v1292_v19  ;;  %v1289_v46 = vsel %vm1181_vm7, %v6050_v63, 0.0  ;;  %v1301_v29 = vsel %vm1277_vm2, %v6058_v3, 0.0  ;;  %vm9018_vm6 = vmmov %vm9014_vm0  ;;  %v1902_v60 = vld [vmem:[#allocation5 + $0x8] sm:$0xff] }
 0x161   :  { %1927 = vrot.lane.b32.xlu1 %v1694_v26, %s5281_s26  ;;  %v1666_v27 = vsel %vm9016_vm9, %v1661_v36, %v1665_v5  ;;  %v1664_v10 = vsel %vm9017_vm13, %v1658_v15, %v1663_v31  ;;  %v61_v43 = vadd.f32 %v53_v38, %v51_v40  ;;  %v60_v62 = vadd.f32 %v52_v32, %v50_v0  ;;  %vm9019_vm3 = vmmov %vm9014_vm0 }
 0x162   :  { %v1662_v20 = vsel %vm9018_vm6, %v1660_v8, %v1661_v36  ;;  %v1659_v6 = vsel %vm9019_vm3, %v1657_v49, %v1658_v15  ;;  %v1288_v51 = vsel %vm1180_vm5, %v6044_v24, 0.0  ;;  %v1300_v14 = vsel %vm1276_vm8, %v6056_v45, 0.0  ;;  %v57_v15 = vld [vmem:[#allocation3 + $0x78] sm:$0xff]  ;;  %vm9032_vm9 = vmmov %vm9014_vm0 }
 0x163   :  { %v1629_v18 = vrot.slane %v6379_v12, 7  ;;  %v1633_v59 = vrot.slane %v1317_v55, 7  ;;  %v1626_v25 = vrot.slane %v1314_v21, 7  ;;  %v1313_v44 = vadd.f32 %v1301_v29, %v1289_v46  ;;  %vm9035_vm13 = vmmov %vm9014_vm0 }
 0x164   :  { %1921 = vrot.lane.b32.xlu0 %v1664_v10, %s5281_s26  ;;  %v1631_v56 = vrot.slane %v1316_v1, 7  ;;  %v1579_v57 = vsel %vm1279_vm12, %v5795_v53, 0.0  ;;  %v1577_v13 = vsel %vm1277_vm2, %v6050_v63, 0.0  ;;  %v1589_v7 = vsel %vm1265_vm11, %v6058_v3, 0.0  ;;  %v56_v53 = vld [vmem:[#allocation3 + $0x70] sm:$0xff]  ;;  %vm9024_vm12 = vmmov %vm9014_vm0 }
 0x165   :  { %1923 = vrot.lane.b32.xlu1 %v1666_v27, %s5281_s26  ;;  %v1312_v36 = vadd.f32 %v1300_v14, %v1288_v51  ;;  %v1581_v42 = vsel %vm1281_vm4, %v5778_v28, 0.0  ;;  %v1601_v50 = vadd.f32 %v1589_v7, %v1577_v13  ;;  %v1576_v5 = vsel %vm1276_vm8, %v6044_v24, 0.0  ;;  %vm9025_vm4 = vmmov %vm9014_vm0  ;;  %v6487_v14 = vld [vmem:[#allocation2 + $0x48] sm:$0xff] }
 0x166   :  { %v1578_v63 = vsel %vm1278_vm14, %v5878_v39, 0.0  ;;  %v1588_v3 = vsel %vm1264_vm1, %v6056_v45, 0.0  ;;  %v65_v37 = vadd.f32 %v61_v43, %v55_v17  ;;  %v64_v54 = vadd.f32 %v60_v62, %v54_v11  ;;  %vm9028_vm2 = vmmov %vm9014_vm0 }
 0x167   :  { %v1580_v28 = vsel %vm1280_vm10, %v5834_v47, 0.0  ;;  %vm9020_vm11 = vcmp.eq.f32.partialorder %v5873_v35, 7.0  ;;  %vm9021_vm7 = vcmp.eq.f32.partialorder %v5817_v4, 7.0  ;;  %v1600_v48 = vadd.f32 %v1588_v3, %v1576_v5  ;;  %vm9031_vm8 = vmmov %vm9014_vm0 }
 0x168   :  { %1917 = vrot.lane.b32.xlu0 %v1659_v6, %s5281_s26  ;;  %v1590_v24 = vsel %vm9020_vm11, %v5884_v23, 0.0  ;;  %v1592_v39 = vsel %vm9021_vm7, %v5843_v61, 0.0  ;;  %vm9022_vm1 = vcmp.eq.f32.partialorder %v5814_v9, 7.0  ;;  %vm9023_vm5 = vcmp.eq.f32.partialorder %v5803_v34, 7.0  ;;  %vm9036_vm6 = vmmov %vm9014_vm0 }
 0x169   :  { %1919 = vrot.lane.b32.xlu1 %v1662_v20, %s5281_s26  ;;  %v1591_v45 = vsel %vm9022_vm1, %v5801_v30, 0.0  ;;  %v1593_v52 = vsel %vm9023_vm5, %v5782_v22, 0.0  ;;  %v69_v47 = vadd.f32 %v65_v37, %v57_v15  ;;  %v68_v58 = vadd.f32 %v64_v54, %v56_v53  ;;  %v6476_v20 = vld [vmem:[#allocation2 + $0x78] sm:$0x1] }
 0x16a   :  { %v1632_v35 = vsel %vm9024_vm12, %v1626_v25, %v1631_v56  ;;  %v1625_v23 = vrot.slane %v1312_v36, 7  ;;  %v1602_v16 = vadd.f32 %v1590_v24, %v1578_v63  ;;  %v1604_v33 = vadd.f32 %v1592_v39, %v1580_v28  ;;  %v6504_v56 = vld [vmem:[#allocation2] sm:$0xff] }
 0x16b   :  { %v73_v4 = vmul.f32 0.25, %v69_v47  ;;  %v72_v61 = vmul.f32 0.25, %v68_v58  ;;  %v1634_v41 = vsel %vm9025_vm4, %v1629_v18, %v1633_v59  ;;  %v1628_v31 = vrot.slane %v1313_v44, 7 }
 0x16c   :  { %1913 = vrot.lane.b32.xlu0 %v1632_v35, %s5281_s26  ;;  %v1603_v9 = vadd.f32 %v1591_v45, %v1579_v57  ;;  %v1605_v30 = vadd.f32 %v1593_v52, %v1581_v42  ;;  %vm9026_vm14 = vcmask 130048   ;;  %v1627_v22 = vsel %vm9028_vm2, %v1625_v23, %v1626_v25 }
 0x16d   :  { %1915 = vrot.lane.b32.xlu1 %v1634_v41, %s5281_s26  ;;  %96 = vst.msk [vmem:[#allocation2 + $0x68] sm:$0xff] %vm9026_vm14, %v73_v4  ;;  %vm9027_vm10 = vmmov %vm9026_vm14  ;;  %v1882_v34 = vrot.slane %v1602_v16, 7  ;;  %v1887_v19 = vrot.slane %v1604_v33, 7  ;;  %v1630_v2 = vsel %vm9014_vm0, %v1628_v31, %v1629_v18  ;;  %v1881_v0 = vrot.slane %v1600_v48, 7 }
 0x16e   :  { %95 = vst.msk [vmem:[#allocation2 + $0x58] sm:$0xff] %vm9027_vm10, %v72_v61  ;;  %v1885_v40 = vrot.slane %v1603_v9, 7  ;;  %v1889_v26 = vrot.slane %v1605_v30, 7  ;;  %vm9029_vm15 = vmmov %vm9027_vm10  ;;  %v1884_v12 = vrot.slane %v1601_v50, 7  ;;  %v326_v51 = vmul.f32 2.0, %v6476_v20 }
 0x16f   :  { %v2019_v8 = vsel %vm9029_vm15, %v1902_v60, 0  ;;  %v1888_v38 = vsel %vm9031_vm8, %v1882_v34, %v1887_v19  ;;  %v1883_v29 = vsel %vm9035_vm13, %v1881_v0, %v1882_v34  ;;  %v274_v18 = vmul.f32 2.0, %v6487_v14  ;;  %vm9056_vm11 = vmmov %vm9027_vm10 }
 0x170   :  { %1909 = vrot.lane.b32.xlu0 %v1627_v22, %s5281_s26  ;;  %v6451_v49 = vand.u32 4294901760, %v2019_v8  ;;  %v1890_v32 = vsel %vm9032_vm9, %v1885_v40, %v1889_v26  ;;  %v1886_v27 = vsel %vm9036_vm6, %v1884_v12, %v1885_v40  ;;  %vm8962_vm3 = vcmask 7168   ;;  %vm9068_vm7 = vmmov %vm9027_vm10 }
 0x171   :  { %1911 = vrot.lane.b32.xlu1 %v1630_v2, %s5281_s26  ;;  %vm9070_vm1 = vcmask 1045504   ;;  %vm9092_vm2 = vcmask 1046528  }
 0x172   :  { %9030 = vst [vmem:[#allocation9_spill] sm:$0xff] %v6451_v49  ;;  %v6457_v55 = vsub.f32 %v2019_v8, %v6451_v49  ;;  %2310 = vmatprep.mubr.f32.mxu1 %v6451_v49  ;;  %v1903_v49 = vld [vmem:[#allocation5 + $0x10] sm:$0xff]  ;;  %vm9072_vm5 = vmmov %vm9070_vm1 }
 0x173   :  { %vm9073_vm12 = vmmov %vm9070_vm1 }
 0x174   :  { %1977 = vrot.lane.b32.xlu0 %v1888_v38, %s5281_s26  ;;  %9033 = vst [vmem:[#allocation10_spill] sm:$0xff] %v6457_v55  ;;  %v6463_v1 = vld [vmem:[#allocation2 + $0x68] sm:$0xff]  ;;  %v6466_v46 = vand.u32 4294901760, %v6457_v55  ;;  %vm9077_vm4 = vmmov %vm9070_vm1 }
 0x175   :  { %1979 = vrot.lane.b32.xlu1 %v1890_v32, %s5281_s26  ;;  %v6461_v21 = vld [vmem:[#allocation2 + $0x58] sm:$0xff]  ;;  %v276_v62 = vmul.f32 2.0, %v6463_v1  ;;  %vm9078_vm14 = vmmov %vm9070_vm1 }
 0x176   :  { %9034 = vst [vmem:[#allocation11_spill] sm:$0xff] %v6466_v46  ;;  %v275_v10 = vmul.f32 2.0, %v6461_v21  ;;  %v2112_v43 = vsub.f32 %v6457_v55, %v6466_v46  ;;  %v6784_v46 = vand.u32 4294901760, %v1903_v49  ;;  %vm9082_vm10 = vmmov %vm9070_vm1 }
 0x177   :  { %vm9095_vm0 = vmmov %vm9092_vm2 }
 0x178   :  { %1973 = vrot.lane.b32.xlu0 %v1883_v29, %s5281_s26  ;;  %v6478_v6 = vand.u32 4294901760, %v2112_v43  ;;  %9067 = vst [vmem:[#allocation41_spill] sm:$0xff] %v6784_v46  ;;  %vm9097_vm15 = vmmov %vm9070_vm1 }
 0x179   :  { %1975 = vrot.lane.b32.xlu1 %v1886_v27, %s5281_s26  ;;  %vm9104_vm8 = vmmov %vm9070_vm1 }
 0x17a   :  { %9037 = vst [vmem:[#allocation12_spill] sm:$0xff] %v6478_v6  ;;  %2114 = vmatprep.mubr.f32.mxu0 %v6478_v6 }
 0x17c   :  { %291 = vrot.lane.b32.xlu0 %v275_v10, %s5279_s0 }
 0x17d   :  { %293 = vrot.lane.b32.xlu1 %v276_v62, %s5279_s0 }
 0x180   :  { %331 = vrot.lane.b32.xlu0 %v326_v51, %s5279_s0 }
 0x181   :  { %127 = vrot.lane.b32.xlu1 %v6461_v21, %s5280_s1 }
 0x183   :  { %v1972_v59 = vpop.permute.xlu1 %1971 }
 0x184   :  { %129 = vrot.lane.b32.xlu0 %v6463_v1, %s5280_s1 }
 0x185   :  { %206 = vrot.lane.b32.xlu1 %v6476_v20, %s5280_s1 }
 0x188   :  { %289 = vrot.lane.b32.xlu0 %v274_v18, %s5279_s0 }
 0x189   :  { %125 = vrot.lane.b32.xlu1 %v6487_v14, %s5280_s1 }
 0x190   :  { %v1970_v25 = vpop.permute.xlu0 %1969 }
 0x191   :  { %v1997_v44 = vsel %vm8962_vm3, %v1970_v25, %v1972_v59 }
 0x192   :  { %v6498_v17 = vand.u32 4294901760, %v1997_v44 }
 0x194   :  { %9038 = vst [vmem:[#allocation13_spill] sm:$0xff] %v6498_v17  ;;  %v6501_v11 = vsub.f32 %v1997_v44, %v6498_v17  ;;  %2029 = vmatpush1.msra.mxu0 %v6498_v17 }
 0x195   :  { %2030 = vmatprep.subr.mxu0 %v6504_v56 }
 0x196   :  { %v8889_v57 = vand.u32 4294901760, %v6501_v11 }
 0x198   :  { %v2159_v13 = vsub.f32 %v6501_v11, %v8889_v57 }
 0x19a   :  { %v2160_v7 = vand.u32 4294901760, %v2159_v13 }
 0x19c   :  { %2161 = vmatpush1.msra.mxu1 %v2160_v7 }
 0x19d   :  { %2162 = vmatprep.subr.mxu1 %v6504_v56 }
 0x1aa   :  { %v1966_v36 = vpop.permute.xlu0 %1965 }
 0x1ab   :  { %v1968_v42 = vpop.permute.xlu1 %1967 }
 0x1ac   :  { %v1996_v50 = vsel %vm8962_vm3, %v1966_v36, %v1968_v42 }
 0x1ad   :  { %v6513_v5 = vand.u32 4294901760, %v1996_v50 }
 0x1ae   :  { %v1962_v15 = vpop.permute.xlu0 %1961 }
 0x1af   :  { %9039 = vst [vmem:[#allocation14_spill] sm:$0xff] %v6513_v5  ;;  %v6516_v53 = vsub.f32 %v1996_v50, %v6513_v5  ;;  %v1964_v63 = vpop.permute.xlu1 %1963  ;;  %2032 = vmatpush1.msra.mxu0 %v6513_v5 }
 0x1b0   :  { %v1995_v3 = vsel %vm8962_vm3, %v1962_v15, %v1964_v63  ;;  %2033 = vmatprep.subr.mxu0 %v6504_v56 }
 0x1b1   :  { %9040 = vst [vmem:[#allocation15_spill] sm:$0xff] %v6516_v53  ;;  %v6521_v37 = vand.u32 4294901760, %v1995_v3  ;;  %v8887_v54 = vand.u32 4294901760, %v6516_v53 }
 0x1b2   :  { %v1958_v28 = vpop.permute.xlu0 %1957 }
 0x1b3   :  { %v6525_v24 = vsub.f32 %v1995_v3, %v6521_v37  ;;  %v1960_v39 = vpop.permute.xlu1 %1959  ;;  %2035 = vmatpush1.msra.mxu0 %v6521_v37  ;;  %v2166_v48 = vsub.f32 %v6516_v53, %v8887_v54 }
 0x1b4   :  { %v1994_v45 = vsel %vm8962_vm3, %v1958_v28, %v1960_v39  ;;  %2036 = vmatprep.subr.mxu0 %v6504_v56 }
 0x1b5   :  { %9041 = vst [vmem:[#allocation16_spill] sm:$0xff] %v6525_v24  ;;  %v6533_v52 = vand.u32 4294901760, %v1994_v45  ;;  %v2167_v47 = vand.u32 4294901760, %v2166_v48  ;;  %v8886_v58 = vand.u32 4294901760, %v6525_v24 }
 0x1b6   :  { %v1954_v35 = vpop.permute.xlu0 %1953 }
 0x1b7   :  { %9042 = vst [vmem:[#allocation17_spill] sm:$0xff] %v6533_v52  ;;  %v6537_v23 = vsub.f32 %v1994_v45, %v6533_v52  ;;  %v1956_v16 = vpop.permute.xlu1 %1955  ;;  %2038 = vmatpush1.msra.mxu0 %v6533_v52  ;;  %2168 = vmatpush1.msra.mxu1 %v2167_v47  ;;  %v2173_v33 = vsub.f32 %v6525_v24, %v8886_v58 }
 0x1b8   :  { %v1993_v4 = vsel %vm8962_vm3, %v1954_v35, %v1956_v16  ;;  %2039 = vmatprep.subr.mxu0 %v6504_v56  ;;  %2169 = vmatprep.subr.mxu1 %v6504_v56 }
 0x1b9   :  { %9043 = vst [vmem:[#allocation18_spill] sm:$0xff] %v6537_v23  ;;  %v6546_v61 = vand.u32 4294901760, %v1993_v4  ;;  %v2174_v41 = vand.u32 4294901760, %v2173_v33  ;;  %v8885_v31 = vand.u32 4294901760, %v6537_v23 }
 0x1ba   :  { %v1950_v9 = vpop.permute.xlu0 %1949 }
 0x1bb   :  { %9044 = vst [vmem:[#allocation19_spill] sm:$0xff] %v6546_v61  ;;  %v6550_v30 = vsub.f32 %v1993_v4, %v6546_v61  ;;  %v1952_v22 = vpop.permute.xlu1 %1951  ;;  %2041 = vmatpush1.msra.mxu0 %v6546_v61  ;;  %2175 = vmatpush1.msra.mxu1 %v2174_v41  ;;  %v2180_v34 = vsub.f32 %v6537_v23, %v8885_v31 }
 0x1bc   :  { %v1992_v19 = vsel %vm8962_vm3, %v1950_v9, %v1952_v22  ;;  %2042 = vmatprep.subr.mxu0 %v6504_v56  ;;  %2176 = vmatprep.subr.mxu1 %v6504_v56 }
 0x1bd   :  { %9045 = vst [vmem:[#allocation20_spill] sm:$0xff] %v6550_v30  ;;  %v6559_v2 = vand.u32 4294901760, %v1992_v19  ;;  %v2181_v40 = vand.u32 4294901760, %v2180_v34  ;;  %v8884_v26 = vand.u32 4294901760, %v6550_v30 }
 0x1be   :  { %v1946_v60 = vpop.permute.xlu0 %1945 }
 0x1bf   :  { %9046 = vst [vmem:[#allocation21_spill] sm:$0xff] %v6559_v2  ;;  %v6563_v8 = vsub.f32 %v1992_v19, %v6559_v2  ;;  %v1948_v38 = vpop.permute.xlu1 %1947  ;;  %2044 = vmatpush1.msra.mxu0 %v6559_v2  ;;  %2182 = vmatpush1.msra.mxu1 %v2181_v40  ;;  %v2187_v0 = vsub.f32 %v6550_v30, %v8884_v26 }
 0x1c0   :  { %v1991_v32 = vsel %vm8962_vm3, %v1946_v60, %v1948_v38  ;;  %2045 = vmatprep.subr.mxu0 %v6504_v56  ;;  %2183 = vmatprep.subr.mxu1 %v6504_v56 }
 0x1c1   :  { %9047 = vst [vmem:[#allocation22_spill] sm:$0xff] %v6563_v8  ;;  %v6572_v12 = vand.u32 4294901760, %v1991_v32  ;;  %v2188_v29 = vand.u32 4294901760, %v2187_v0  ;;  %v8883_v27 = vand.u32 4294901760, %v6563_v8 }
 0x1c2   :  { %v1942_v10 = vpop.permute.xlu0 %1941 }
 0x1c3   :  { %9048 = vst [vmem:[#allocation23_spill] sm:$0xff] %v6572_v12  ;;  %v6576_v43 = vsub.f32 %v1991_v32, %v6572_v12  ;;  %v1944_v62 = vpop.permute.xlu1 %1943  ;;  %2047 = vmatpush1.msra.mxu0 %v6572_v12  ;;  %2189 = vmatpush1.msra.mxu1 %v2188_v29  ;;  %v2194_v51 = vsub.f32 %v6563_v8, %v8883_v27 }
 0x1c4   :  { %v1990_v18 = vsel %vm8962_vm3, %v1942_v10, %v1944_v62  ;;  %2048 = vmatprep.subr.mxu0 %v6504_v56  ;;  %2190 = vmatprep.subr.mxu1 %v6504_v56 }
 0x1c5   :  { %v6585_v59 = vand.u32 4294901760, %v1990_v18  ;;  %v2195_v25 = vand.u32 4294901760, %v2194_v51  ;;  %v8881_v44 = vand.u32 4294901760, %v6576_v43 }
 0x1c6   :  { %v1938_v13 = vpop.permute.xlu0 %1937 }
 0x1c7   :  { %9049 = vst [vmem:[#allocation24_spill] sm:$0xff] %v6585_v59  ;;  %v6589_v7 = vsub.f32 %v1990_v18, %v6585_v59  ;;  %v1940_v36 = vpop.permute.xlu1 %1939  ;;  %2050 = vmatpush1.msra.mxu0 %v6585_v59  ;;  %2196 = vmatpush1.msra.mxu1 %v2195_v25  ;;  %v2201_v42 = vsub.f32 %v6576_v43, %v8881_v44 }
 0x1c8   :  { %v1989_v50 = vsel %vm8962_vm3, %v1938_v13, %v1940_v36  ;;  %2051 = vmatprep.subr.mxu0 %v6504_v56  ;;  %2197 = vmatprep.subr.mxu1 %v6504_v56 }
 0x1c9   :  { %9050 = vst [vmem:[#allocation25_spill] sm:$0xff] %v6589_v7  ;;  %v6598_v15 = vand.u32 4294901760, %v1989_v50  ;;  %v2202_v63 = vand.u32 4294901760, %v2201_v42  ;;  %v8880_v3 = vand.u32 4294901760, %v6589_v7 }
 0x1ca   :  { %v1934_v28 = vpop.permute.xlu0 %1933 }
 0x1cb   :  { %v6602_v39 = vsub.f32 %v1989_v50, %v6598_v15  ;;  %v1936_v48 = vpop.permute.xlu1 %1935  ;;  %2053 = vmatpush1.msra.mxu0 %v6598_v15  ;;  %2203 = vmatpush1.msra.mxu1 %v2202_v63  ;;  %v2208_v45 = vsub.f32 %v6589_v7, %v8880_v3  ;;  %v1904_v63 = vld [vmem:[#allocation5 + $0x18] sm:$0xff] }
 0x1cc   :  { %v1988_v47 = vsel %vm8962_vm3, %v1934_v28, %v1936_v48  ;;  %2054 = vmatprep.subr.mxu0 %v6504_v56  ;;  %2204 = vmatprep.subr.mxu1 %v6504_v56 }
 0x1cd   :  { %9051 = vst [vmem:[#allocation26_spill] sm:$0xff] %v6602_v39  ;;  %v6611_v35 = vand.u32 4294901760, %v1988_v47  ;;  %v2209_v16 = vand.u32 4294901760, %v2208_v45  ;;  %v8879_v33 = vand.u32 4294901760, %v6602_v39 }
 0x1ce   :  { %v1930_v4 = vpop.permute.xlu0 %1929 }
 0x1cf   :  { %v6615_v41 = vsub.f32 %v1988_v47, %v6611_v35  ;;  %v1932_v9 = vpop.permute.xlu1 %1931  ;;  %2056 = vmatpush1.msra.mxu0 %v6611_v35  ;;  %2210 = vmatpush1.msra.mxu1 %v2209_v16  ;;  %v2215_v22 = vsub.f32 %v6602_v39, %v8879_v33  ;;  %v1901_v47 = vld [vmem:[#allocation5] sm:$0xff] }
 0x1d0   :  { %v1987_v34 = vsel %vm8962_vm3, %v1930_v4, %v1932_v9  ;;  %2057 = vmatprep.subr.mxu0 %v6504_v56  ;;  %2211 = vmatprep.subr.mxu1 %v6504_v56 }
 0x1d1   :  { %9052 = vst [vmem:[#allocation27_spill] sm:$0xff] %v6615_v41  ;;  %v6624_v19 = vand.u32 4294901760, %v1987_v34  ;;  %v2216_v40 = vand.u32 4294901760, %v2215_v22  ;;  %v8878_v60 = vand.u32 4294901760, %v6615_v41 }
 0x1d2   :  { %v1926_v38 = vpop.permute.xlu0 %1925 }
 0x1d3   :  { %v6628_v0 = vsub.f32 %v1987_v34, %v6624_v19  ;;  %v1928_v32 = vpop.permute.xlu1 %1927  ;;  %2059 = vmatpush1.msra.mxu0 %v6624_v19  ;;  %2217 = vmatpush1.msra.mxu1 %v2216_v40  ;;  %v2222_v29 = vsub.f32 %v6615_v41, %v8878_v60  ;;  %v2022_v34 = vsel %vm9056_vm11, %v1904_v63, 0 }
 0x1d4   :  { %v1986_v10 = vsel %vm8962_vm3, %v1926_v38, %v1928_v32  ;;  %2060 = vmatprep.subr.mxu0 %v6504_v56  ;;  %2218 = vmatprep.subr.mxu1 %v6504_v56  ;;  %v6664_v38 = vand.u32 4294901760, %v1901_v47 }
 0x1d5   :  { %9053 = vst [vmem:[#allocation28_spill] sm:$0xff] %v6628_v0  ;;  %v6637_v62 = vand.u32 4294901760, %v1986_v10  ;;  %v2223_v51 = vand.u32 4294901760, %v2222_v29  ;;  %v8876_v18 = vand.u32 4294901760, %v6628_v0 }
 0x1d6   :  { %v1922_v25 = vpop.permute.xlu0 %1921  ;;  %9057 = vst [vmem:[#allocation31_spill] sm:$0xff] %v6664_v38 }
 0x1d7   :  { %v6641_v13 = vsub.f32 %v1986_v10, %v6637_v62  ;;  %v1924_v36 = vpop.permute.xlu1 %1923  ;;  %2062 = vmatpush1.msra.mxu0 %v6637_v62  ;;  %2224 = vmatpush1.msra.mxu1 %v2223_v51  ;;  %v2229_v42 = vsub.f32 %v6628_v0, %v8876_v18 }
 0x1d8   :  { %v1985_v50 = vsel %vm8962_vm3, %v1922_v25, %v1924_v36  ;;  %2063 = vmatprep.subr.mxu0 %v6504_v56  ;;  %2225 = vmatprep.subr.mxu1 %v6504_v56  ;;  %v6669_v25 = vand.u32 4294901760, %v2022_v34 }
 0x1d9   :  { %9054 = vst [vmem:[#allocation29_spill] sm:$0xff] %v6641_v13  ;;  %v6650_v28 = vand.u32 4294901760, %v1985_v50  ;;  %v2230_v48 = vand.u32 4294901760, %v2229_v42  ;;  %v8875_v45 = vand.u32 4294901760, %v6641_v13 }
 0x1da   :  { %v1918_v16 = vpop.permute.xlu0 %1917 }
 0x1db   :  { %v6654_v4 = vsub.f32 %v1985_v50, %v6650_v28  ;;  %v1920_v9 = vpop.permute.xlu1 %1919  ;;  %2065 = vmatpush1.msra.mxu0 %v6650_v28  ;;  %2231 = vmatpush1.msra.mxu1 %v2230_v48  ;;  %v2236_v22 = vsub.f32 %v6641_v13, %v8875_v45  ;;  %v6682_v48 = vsub.f32 %v1901_v47, %v6664_v38 }
 0x1dc   :  { %v1984_v40 = vsel %vm8962_vm3, %v1918_v16, %v1920_v9  ;;  %2066 = vmatprep.subr.mxu0 %v6504_v56  ;;  %2232 = vmatprep.subr.mxu1 %v6504_v56 }
 0x1dd   :  { %9055 = vst [vmem:[#allocation30_spill] sm:$0xff] %v6654_v4  ;;  %v6666_v32 = vand.u32 4294901760, %v1984_v40  ;;  %v2237_v29 = vand.u32 4294901760, %v2236_v22  ;;  %v8874_v10 = vand.u32 4294901760, %v6654_v4  ;;  %9058 = vst [vmem:[#allocation32_spill] sm:$0xff] %v6682_v48 }
 0x1de   :  { %v1914_v51 = vpop.permute.xlu0 %1913 }
 0x1df   :  { %v6672_v36 = vsub.f32 %v1984_v40, %v6666_v32  ;;  %v1916_v42 = vpop.permute.xlu1 %1915  ;;  %2068 = vmatpush1.msra.mxu0 %v6666_v32  ;;  %2238 = vmatpush1.msra.mxu1 %v2237_v29  ;;  %v2243_v50 = vsub.f32 %v6654_v4, %v8874_v10  ;;  %v6688_v29 = vsub.f32 %v2022_v34, %v6669_v25  ;;  %v6701_v34 = vand.u32 4294901760, %v6682_v48 }
 0x1e0   :  { %v1983_v63 = vsel %vm8962_vm3, %v1914_v51, %v1916_v42  ;;  %2069 = vmatprep.subr.mxu0 %v6504_v56  ;;  %2239 = vmatprep.subr.mxu1 %v6504_v56 }
 0x1e1   :  { %v6684_v16 = vand.u32 4294901760, %v1983_v63  ;;  %v2244_v9 = vand.u32 4294901760, %v2243_v50  ;;  %v8877_v22 = vand.u32 4294901760, %v6672_v36  ;;  %9059 = vst [vmem:[#allocation33_spill] sm:$0xff] %v6688_v29  ;;  %9060 = vst [vmem:[#allocation34_spill] sm:$0xff] %v6701_v34 }
 0x1e2   :  { %v1910_v40 = vpop.permute.xlu0 %1909 }
 0x1e3   :  { %v6691_v10 = vsub.f32 %v1983_v63, %v6684_v16  ;;  %v1912_v51 = vpop.permute.xlu1 %1911  ;;  %2071 = vmatpush1.msra.mxu0 %v6684_v16  ;;  %2245 = vmatpush1.msra.mxu1 %v2244_v9  ;;  %v2250_v47 = vsub.f32 %v6672_v36, %v8877_v22  ;;  %v6707_v9 = vand.u32 4294901760, %v6688_v29 }
 0x1e4   :  { %v1982_v42 = vsel %vm8962_vm3, %v1910_v40, %v1912_v51  ;;  %2072 = vmatprep.subr.mxu0 %v6504_v56  ;;  %2246 = vmatprep.subr.mxu1 %v6504_v56 }
 0x1e5   :  { %v6703_v50 = vand.u32 4294901760, %v1982_v42  ;;  %v2251_v63 = vand.u32 4294901760, %v2250_v47  ;;  %v8882_v45 = vand.u32 4294901760, %v6691_v10  ;;  %9062 = vst [vmem:[#allocation36_spill] sm:$0xff] %v6707_v9  ;;  %v2118_v47 = vsub.f32 %v6682_v48, %v6701_v34 }
 0x1e6   :  { %v1978_v18 = vpop.permute.xlu0 %1977 }
 0x1e7   :  { %9061 = vst [vmem:[#allocation35_spill] sm:$0xff] %v6703_v50  ;;  %v6710_v22 = vsub.f32 %v1982_v42, %v6703_v50  ;;  %v1980_v40 = vpop.permute.xlu1 %1979  ;;  %2074 = vmatpush1.msra.mxu0 %v6703_v50  ;;  %2252 = vmatpush1.msra.mxu1 %v2251_v63  ;;  %v2257_v51 = vsub.f32 %v6691_v10, %v8882_v45 }
 0x1e8   :  { %v1999_v60 = vsel %vm8962_vm3, %v1978_v18, %v1980_v40  ;;  %2103 = vmatprep.subr.mxu0 %v6504_v56  ;;  %2253 = vmatprep.subr.mxu1 %v6504_v56  ;;  %v2127_v63 = vsub.f32 %v6688_v29, %v6707_v9 }
 0x1e9   :  { %v6721_v33 = vand.u32 4294901760, %v1999_v60  ;;  %v2258_v42 = vand.u32 4294901760, %v2257_v51  ;;  %v8888_v3 = vand.u32 4294901760, %v6710_v22  ;;  %v6736_v51 = vand.u32 4294901760, %v2118_v47  ;;  %v111_v47 = vld [vmem:[#allocation2 + $0x70] sm:$0x1] }
 0x1ea   :  { %v1974_v44 = vpop.permute.xlu0 %1973  ;;  %v6741_v54 = vand.u32 4294901760, %v2127_v63 }
 0x1eb   :  { %9063 = vst [vmem:[#allocation37_spill] sm:$0xff] %v6721_v33  ;;  %v6727_v45 = vsub.f32 %v1999_v60, %v6721_v33  ;;  %v1976_v18 = vpop.permute.xlu1 %1975  ;;  %2105 = vmatpush2.msra.mxu0 %v6721_v33  ;;  %2259 = vmatpush1.msra.mxu1 %v2258_v42  ;;  %v2264_v40 = vsub.f32 %v6710_v22, %v8888_v3  ;;  %9064 = vst [vmem:[#allocation38_spill] sm:$0xff] %v6736_v51 }
 0x1ec   :  { %v1998_v27 = vsel %vm8962_vm3, %v1974_v44, %v1976_v18  ;;  %2106 = vmatprep.subr.mxu0 %v6504_v56  ;;  %2260 = vmatprep.subr.mxu1 %v6504_v56  ;;  %9066 = vst [vmem:[#allocation40_spill] sm:$0xff] %v6741_v54 }
 0x1ed   :  { %v6738_v26 = vand.u32 4294901760, %v1998_v27  ;;  %v2265_v60 = vand.u32 4294901760, %v2264_v40  ;;  %v8890_v31 = vand.u32 4294901760, %v6727_v45 }
 0x1ee   :  { %v292_v58 = vpop.permute.xlu0 %291 }
 0x1ef   :  { %9065 = vst [vmem:[#allocation39_spill] sm:$0xff] %v6738_v26  ;;  %v6744_v42 = vsub.f32 %v1998_v27, %v6738_v26  ;;  %v294_v3 = vpop.permute.xlu1 %293  ;;  %2108 = vmatpush2.msra.mxu0 %v6738_v26  ;;  %2266 = vmatpush1.msra.mxu1 %v2265_v60  ;;  %v2299_v44 = vsub.f32 %v6727_v45, %v8890_v31 }
 0x1f0   :  { %2331 = vmatprep.subr.mxu0 %v6504_v56  ;;  %2120 = vmatmul.mubr.f32.vlgmr.msra.gmra.mxu0 %v6736_v51  ;;  %v309_v63 = vadd.f32 %v6504_v56, %v292_v58  ;;  %v310_v18 = vadd.f32 %v292_v58, %v6461_v21  ;;  %v311_v57 = vadd.f32 %v6504_v56, %v294_v3 }
 0x1f1   :  { %2334 = vmatpush1.msra.mxu0 %v6501_v11  ;;  %2295 = vmatprep.subr.mxu1 %v6504_v56  ;;  %v8900_v27 = vand.u32 4294901760, %v6744_v42  ;;  %v2300_v40 = vand.u32 4294901760, %v2299_v44 }
 0x1f2   :  { %2335 = vmatprep.subr.mxu0 %v6504_v56  ;;  %v332_v60 = vpop.permute.xlu0 %331  ;;  %2129 = vmatprep.mubr.f32.mxu0 %v6741_v54  ;;  %v312_v54 = vadd.f32 %v294_v3, %v6463_v1 }
 0x1f3   :  { %v6760_v31 = vpop.permute.xlu1 %127  ;;  %2338 = vmatpush1.msra.mxu0 %v6516_v53  ;;  %v2306_v51 = vsub.f32 %v6744_v42, %v8900_v27  ;;  %2301 = vmatpush2.msra.mxu1 %v2300_v40  ;;  %v337_v6 = vadd.f32 %v332_v60, %v111_v47  ;;  %v338_v58 = vadd.f32 %v332_v60, %v6476_v20 }
 0x1f4   :  { %2339 = vmatprep.subr.mxu0 %v6504_v56  ;;  %2302 = vmatprep.subr.mxu1 %v6504_v56  ;;  %v6771_v9 = vadd.f32 %v309_v63, %v6760_v31  ;;  %v6774_v34 = vadd.f32 %v310_v18, %v6760_v31  ;;  %v1906_v63 = vld [vmem:[#allocation5 + $0x28] sm:$0x3] }
 0x1f5   :  { %v2307_v44 = vand.u32 4294901760, %v2306_v51  ;;  %2342 = vmatpush1.msra.mxu0 %v6525_v24 }
 0x1f6   :  { %v130_v40 = vpop.permute.xlu0 %129  ;;  %2343 = vmatprep.subr.mxu0 %v6504_v56 }
 0x1f7   :  { %v207_v60 = vpop.permute.xlu1 %206  ;;  %2308 = vmatpush2.msra.mxu1 %v2307_v44  ;;  %v6779_v27 = vsub.f32 %v6504_v56, %v130_v40  ;;  %v6782_v51 = vsub.f32 %v6463_v1, %v130_v40  ;;  %v323_v3 = vadd.f32 %v311_v57, %v130_v40  ;;  %2346 = vmatpush1.msra.mxu0 %v6537_v23 }
 0x1f8   :  { %v212_v26 = vsub.f32 %v111_v47, %v207_v60  ;;  %v213_v18 = vsub.f32 %v6476_v20, %v207_v60  ;;  %v341_v33 = vadd.f32 %v337_v6, %v207_v60  ;;  %v342_v24 = vadd.f32 %v338_v58, %v207_v60  ;;  %2312 = vmatmul.mubr.f32.vlgmr.msra.gmra.mxu1 %v6664_v38 }
 0x1f9   :  { %v6789_v53 = vmul.f32 2.0, %v6779_v27  ;;  %v6792_v44 = vmul.f32 2.0, %v6782_v51  ;;  %2347 = vmatprep.subr.mxu0 %v6504_v56  ;;  %2459 = vmatprep.subr.mxu1 %v6504_v56  ;;  %v2025_v58 = vsel %vm9068_vm7, %v1906_v63, 0  ;;  %v324_v63 = vadd.f32 %v312_v54, %v130_v40 }
 0x1fa   :  { %v243_v47 = vrot.slane %v212_v26, 2  ;;  %v245_v20 = vrot.slane %v213_v18, 2  ;;  %v371_v6 = vrot.slane %v341_v33, 2  ;;  %2350 = vmatpush1.msra.mxu0 %v6550_v30  ;;  %v373_v23 = vrot.slane %v342_v24, 2  ;;  %2461 = vmatpush1.msra.mxu1 %v6498_v17 }
 0x1fb   :  { %v8913_v1 = vrot.slane %v6789_v53, 1  ;;  %v8914_v57 = vrot.slane %v6792_v44, 1  ;;  %2351 = vmatprep.subr.mxu0 %v6504_v56  ;;  %v9069_v26 = vrot.slane %v6779_v27, 2  ;;  %v9071_v18 = vrot.slane %v6782_v51, 2  ;;  %2462 = vmatprep.subr.mxu1 %v6504_v56 }
 0x1fc   :  { %v367_v30 = vrot.slane %v323_v3, 2  ;;  %2354 = vmatpush1.msra.mxu0 %v6563_v8  ;;  %2464 = vmatpush1.msra.mxu1 %v6513_v5  ;;  %v6826_v40 = vsub.f32 %v1903_v49, %v6784_v46  ;;  %v9076_v5 = vrot.slane %v6771_v9, 2  ;;  %v6844_v49 = vsub.f32 %v6461_v21, %v6760_v31 }
 0x1fd   :  { %v244_v33 = vsel %vm9070_vm1, %v9069_v26, %v243_v47  ;;  %v246_v38 = vsel %vm9072_vm5, %v9071_v18, %v245_v20  ;;  %v200_v60 = vadd.f32 %v8913_v1, %v6779_v27  ;;  %v201_v47 = vadd.f32 %v8914_v57, %v6782_v51  ;;  %v1905_v26 = vld [vmem:[#allocation5 + $0x20] sm:$0x3]  ;;  %2355 = vmatprep.subr.mxu0 %v6504_v56 }
 0x1fe   :  { %v369_v20 = vrot.slane %v324_v63, 2  ;;  %v372_v54 = vsel %vm9073_vm12, %v367_v30, %v371_v6  ;;  %2465 = vmatprep.subr.mxu1 %v6504_v56  ;;  %9074 = vst [vmem:[#allocation42_spill] sm:$0xff] %v6826_v40  ;;  %v6828_v18 = vand.u32 4294901760, %v2025_v58  ;;  %v6832_v1 = vsub.f32 %v6504_v56, %v6760_v31  ;;  %2358 = vmatpush1.msra.mxu0 %v6576_v43 }
 0x1ff   :  { %v6834_v57 = vadd.f32 %v244_v33, %v200_v60  ;;  %v6836_v24 = vadd.f32 %v246_v38, %v201_v47  ;;  %v368_v6 = vsel %vm9077_vm4, %v9076_v5, %v367_v30  ;;  %v6847_v17 = vsub.f32 %v323_v3, %v372_v54  ;;  %2467 = vmatpush1.msra.mxu1 %v6521_v37 }
 0x200   :  { %9075 = vst [vmem:[#allocation43_spill] sm:$0xff] %v6828_v18  ;;  %v374_v8 = vsel %vm9078_vm14, %v369_v20, %v373_v23  ;;  %2359 = vmatprep.subr.mxu0 %v6504_v56  ;;  %v6851_v38 = vand.u32 4294901760, %v1905_v26  ;;  %v9081_v60 = vrot.slane %v6774_v34, 2  ;;  %2468 = vmatprep.subr.mxu1 %v6504_v56  ;;  %v6864_v31 = vsub.f32 %v6771_v9, %v368_v6 }
 0x201   :  { %9079 = vst [vmem:[#allocation44_spill] sm:$0xff] %v6847_v17  ;;  %v6856_v30 = vsub.f32 %v324_v63, %v374_v8  ;;  %v409_v21 = vmul.f32 %v6834_v57, %v6834_v57  ;;  %v410_v23 = vmul.f32 %v6836_v24, %v6836_v24  ;;  %v421_v3 = vmul.f32 %v6847_v17, %v6847_v17 }
 0x202   :  { %9080 = vst [vmem:[#allocation45_spill] sm:$0xff] %v6851_v38  ;;  %v370_v5 = vsel %vm9082_vm10, %v9081_v60, %v369_v20  ;;  %9084 = vst [vmem:[#allocation47_spill] sm:$0xff] %v6864_v31  ;;  %2362 = vmatpush1.msra.mxu0 %v6589_v7  ;;  %2470 = vmatpush1.msra.mxu1 %v6533_v52  ;;  %v153_v33 = vmul.f32 2.0, %v6832_v1  ;;  %v6876_v63 = vand.u32 4294901760, %v6826_v40  ;;  %5176 = vrcp.f32 %v6847_v17  ;;  %v126_v17 = vpop.permute.xlu1 %125 }
 0x203   :  { %9083 = vst [vmem:[#allocation46_spill] sm:$0xff] %v6856_v30  ;;  %v422_v8 = vmul.f32 %v6856_v30, %v6856_v30  ;;  %2363 = vmatprep.subr.mxu0 %v6504_v56  ;;  %2471 = vmatprep.subr.mxu1 %v6504_v56  ;;  %v6879_v47 = vsub.f32 %v2025_v58, %v6828_v18  ;;  %5178 = vrcp.f32 %v6856_v30  ;;  %v154_v58 = vmul.f32 2.0, %v6844_v49 }
 0x204   :  { %9085 = vst [vmem:[#allocation48_spill] sm:$0xff] %v6876_v63  ;;  %v6882_v20 = vsub.f32 %v6774_v34, %v370_v5  ;;  %v6884_v54 = vadd.f32 %v421_v3, %v409_v21  ;;  %2366 = vmatpush1.msra.mxu0 %v6602_v39  ;;  %2473 = vmatpush1.msra.mxu1 %v6546_v61  ;;  %5180 = vrcp.f32 %v6864_v31  ;;  %v290_v5 = vpop.permute.xlu0 %289  ;;  %v238_v61 = vrot.slane %v6844_v49, 2 }
 0x205   :  { %9086 = vst [vmem:[#allocation49_spill] sm:$0xff] %v6879_v47  ;;  %v6890_v6 = vsub.f32 %v1905_v26, %v6851_v38  ;;  %v6892_v60 = vadd.f32 %v422_v8, %v410_v23  ;;  %2367 = vmatprep.subr.mxu0 %v6504_v56  ;;  %2474 = vmatprep.subr.mxu1 %v6504_v56  ;;  %v172_v26 = vrot.slane %v153_v33, 1  ;;  %v6905_v21 = vand.u32 4294901760, %v6879_v47 }
 0x206   :  { %9087 = vst [vmem:[#allocation50_spill] sm:$0xff] %v6882_v20  ;;  %2370 = vmatpush1.msra.mxu0 %v6615_v41  ;;  %2476 = vmatpush1.msra.mxu1 %v6559_v2  ;;  %5182 = vrsqrt.f32 %v6884_v54  ;;  %v2133_v23 = vsub.f32 %v6826_v40, %v6876_v63  ;;  %v307_v8 = vadd.f32 %v6504_v56, %v290_v5  ;;  %v173_v30 = vrot.slane %v154_v58, 1 }
 0x207   :  { %9088 = vst [vmem:[#allocation51_spill] sm:$0xff] %v6890_v6  ;;  %2371 = vmatprep.subr.mxu0 %v6504_v56  ;;  %2477 = vmatprep.subr.mxu1 %v6504_v56  ;;  %9089 = vst [vmem:[#allocation52_spill] sm:$0xff] %v6905_v21  ;;  %5184 = vrcp.f32 %v6882_v20  ;;  %v6913_v3 = vand.u32 4294901760, %v6890_v6  ;;  %v308_v33 = vadd.f32 %v290_v5, %v6487_v14  ;;  %v237_v2 = vrot.slane %v6832_v1, 2 }
 0x208   :  { %2374 = vmatpush1.msra.mxu0 %v6628_v0  ;;  %2479 = vmatpush1.msra.mxu1 %v6572_v12  ;;  %5186 = vrsqrt.f32 %v6892_v60  ;;  %v143_v12 = vsub.f32 %v6504_v56, %v126_v17  ;;  %v144_v0 = vsub.f32 %v6487_v14, %v126_v17  ;;  %v9091_v41 = vrot.slane %v6789_v53, 1 }
 0x209   :  { %9090 = vst [vmem:[#allocation53_spill] sm:$0xff] %v6913_v3  ;;  %2375 = vmatprep.subr.mxu0 %v6504_v56  ;;  %2480 = vmatprep.subr.mxu1 %v6504_v56  ;;  %v2142_v58 = vsub.f32 %v6879_v47, %v6905_v21  ;;  %v9094_v53 = vrot.slane %v6792_v44, 1  ;;  %v319_v39 = vadd.f32 %v307_v8, %v126_v17  ;;  %v9098_v44 = vrot.slane %v6771_v9, 2 }
 0x20a   :  { %2378 = vmatpush1.msra.mxu0 %v6641_v13  ;;  %2482 = vmatpush1.msra.mxu1 %v6585_v59  ;;  %v175_v5 = vsel %vm9092_vm2, %v172_v26, %v9091_v41  ;;  %v196_v14 = vadd.f32 %v172_v26, %v143_v12  ;;  %v6934_v13 = vand.u32 4294901760, %v2133_v23  ;;  %v2148_v59 = vsub.f32 %v6890_v6, %v6913_v3 }
 0x20b   :  { %2379 = vmatprep.subr.mxu0 %v6504_v56  ;;  %2483 = vmatprep.subr.mxu1 %v6504_v56  ;;  %v177_v41 = vsel %vm9095_vm0, %v173_v30, %v9094_v53  ;;  %v320_v52 = vadd.f32 %v308_v33, %v126_v17  ;;  %v197_v7 = vadd.f32 %v173_v30, %v144_v0  ;;  %v9096_v23 = vrot.slane %v6779_v27, 2 }
 0x20c   :  { %2382 = vmatpush1.msra.mxu0 %v6654_v4  ;;  %9093 = vst [vmem:[#allocation54_spill] sm:$0xff] %v6934_v13  ;;  %2485 = vmatpush1.msra.mxu1 %v6598_v15  ;;  %v198_v12 = vadd.f32 %v175_v5, %v6832_v1  ;;  %v6944_v26 = vadd.f32 %v237_v2, %v196_v14  ;;  %v9100_v17 = vrot.slane %v6774_v34, 2  ;;  %v6960_v0 = vand.u32 4294901760, %v2142_v58 }
 0x20d   :  { %2383 = vmatprep.subr.mxu0 %v6504_v56  ;;  %2486 = vmatprep.subr.mxu1 %v6504_v56  ;;  %v240_v4 = vsel %vm9097_vm15, %v237_v2, %v9096_v23  ;;  %v6952_v53 = vsub.f32 %v319_v39, %v9098_v44  ;;  %v9103_v1 = vrot.slane %v6782_v51, 2  ;;  %v199_v2 = vadd.f32 %v177_v41, %v6844_v49 }
 0x20e   :  { %v6956_v8 = vsub.f32 %v320_v52, %v9100_v17  ;;  %2386 = vmatpush1.msra.mxu0 %v6672_v36  ;;  %2488 = vmatpush1.msra.mxu1 %v6611_v35  ;;  %9102 = vst [vmem:[#allocation57_spill] sm:$0xff] %v6960_v0  ;;  %v405_v39 = vmul.f32 %v6944_v26, %v6944_v26  ;;  %v6969_v34 = vand.u32 4294901760, %v2148_v59  ;;  %vm507_vm9 = vcmp.eq.f32.partialorder %v6884_v54, inf }
 0x20f   :  { %9099 = vst [vmem:[#allocation55_spill] sm:$0xff] %v6952_v53  ;;  %v242_v27 = vsel %vm9104_vm8, %v238_v61, %v9103_v1  ;;  %2135 = vmatmul.mubr.f32.gmra.mxu0 %v6934_v13  ;;  %v5177_v52 = vpop.eup %5176  ;;  %v6973_v9 = vmul.f32 %v6864_v31, %v6864_v31  ;;  %v6977_v30 = vmul.f32 %v6882_v20, %v6882_v20  ;;  %5188 = vrcp.f32 %v6952_v53 }
 0x210   :  { %9101 = vst [vmem:[#allocation56_spill] sm:$0xff] %v6956_v8  ;;  %9105 = vst [vmem:[#allocation58_spill] sm:$0xff] %v6969_v34  ;;  %v417_v51 = vmul.f32 %v6952_v53, %v6952_v53  ;;  %2387 = vmatprep.subr.mxu0 %v6504_v56  ;;  %2489 = vmatprep.subr.mxu1 %v6504_v56  ;;  %v5179_v59 = vpop.eup %5178  ;;  %v6985_v49 = vmul.f32 %v5177_v52, %v6834_v57  ;;  %5190 = vrcp.f32 %v6956_v8 }
 0x211   :  { %v6987_v33 = vadd.f32 %v238_v61, %v197_v7  ;;  %v6989_v5 = vadd.f32 %v240_v4, %v198_v12  ;;  %2390 = vmatpush1.msra.mxu0 %v6691_v10  ;;  %2491 = vmatpush1.msra.mxu1 %v6624_v19  ;;  %v5181_v58 = vpop.eup %5180  ;;  %v6996_v14 = vmul.f32 %v5179_v59, %v6836_v24  ;;  %vm961_vm13 = vcmp.lt.f32.partialorder %v6834_v57, 0.0 }
 0x212   :  { %v6999_v41 = vadd.f32 %v417_v51, %v405_v39  ;;  %2391 = vmatprep.subr.mxu0 %v6504_v56  ;;  %vm962_vm6 = vcmp.lt.f32.partialorder %v6836_v24, 0.0  ;;  %v7003_v7 = vadd.f32 %v242_v27, %v199_v2  ;;  %v418_v12 = vmul.f32 %v6956_v8, %v6956_v8  ;;  %2492 = vmatprep.subr.mxu1 %v6504_v56 }
 0x213   :  { %v5183_v61 = vpop.eup %5182  ;;  %v406_v4 = vmul.f32 %v6987_v33, %v6987_v33  ;;  %2144 = vmatprep.mubr.f32.mxu0 %v6960_v0  ;;  %vm509_vm11 = vcmp.eq.f32.partialorder %v6884_v54, 0.0  ;;  %v510_v44 = vand.u32 2147483648, %v6884_v54  ;;  %v7014_v17 = vand.u32 2147483647, %v6985_v49  ;;  %2394 = vmatpush1.msra.mxu0 %v6710_v22 }
 0x214   :  { %v5185_v23 = vpop.eup %5184  ;;  %v7017_v1 = vand.u32 2147483647, %v6996_v14  ;;  %2494 = vmatpush1.msra.mxu1 %v6637_v62  ;;  %vm949_vm7 = vcmp.gt.f32.partialorder %v6834_v57, 0.0  ;;  %vm950_vm1 = vcmp.gt.f32.partialorder %v6836_v24, 0.0  ;;  %v973_v2 = vsel %vm961_vm13, -1.5707964, %v6504_v56  ;;  %2150 = vmatmul.mubr.f32.gmra.mxu0 %v6969_v34 }
 0x215   :  { %v5187_v27 = vpop.eup %5186  ;;  %v7027_v39 = vmul.f32 %v5181_v58, %v6989_v5  ;;  %2423 = vmatprep.subr.mxu0 %v6504_v56  ;;  %v506_v52 = vmul.f32 %v5183_v61, %v6884_v54  ;;  %v974_v51 = vsel %vm962_vm6, -1.5707964, %v6504_v56  ;;  %v407_v59 = vmul.f32 %v6989_v5, %v6989_v5  ;;  %2495 = vmatprep.subr.mxu1 %v6504_v56 }
 0x216   :  { %5192 = vrsqrt.f32 %v6999_v41  ;;  %2426 = vmatpush2.msra.mxu0 %v6727_v45  ;;  %v408_v58 = vmul.f32 %v7003_v7, %v7003_v7  ;;  %v7043_v34 = vadd.f32 %v418_v12, %v406_v4  ;;  %v7046_v61 = vmul.f32 %v5185_v23, %v7003_v7  ;;  %2497 = vmatpush1.msra.mxu1 %v6650_v28 }
 0x217   :  { %5194 = vrcp.f32 %v7014_v17  ;;  %2317 = vmatprep.mubr.f32.mxu1 %v6669_v25  ;;  %v513_v0 = vmul.f32 %v5187_v27, %v6892_v60  ;;  %v625_v13 = vadd.f32 1.0, %v7014_v17  ;;  %v626_v8 = vadd.f32 1.0, %v7017_v1  ;;  %2427 = vmatprep.subr.mxu0 %v6504_v56 }
 0x218   :  { %5196 = vrcp.f32 %v7017_v1  ;;  %2498 = vmatprep.subr.mxu1 %v6504_v56  ;;  %vm514_vm5 = vcmp.eq.f32.partialorder %v6892_v60, inf  ;;  %vm516_vm12 = vcmp.eq.f32.partialorder %v6892_v60, 0.0  ;;  %v517_v4 = vand.u32 2147483648, %v6892_v60  ;;  %2319 = vmatmul.mubr.f32.gmra.mxu1 %v6784_v46 }
 0x219   :  { %v7060_v12 = vand.u32 2147483647, %v7027_v39  ;;  %2430 = vmatpush2.msra.mxu0 %v6744_v42  ;;  %v508_v23 = vsel %vm507_vm9, %v6884_v54, %v506_v52  ;;  %5198 = vrcp.f32 %v625_v13  ;;  %v7069_v27 = vsel %vm949_vm7, 1.5707964, %v973_v2  ;;  %2433 = vmatprep.mubr.f32.mxu0 %v6457_v55  ;;  %v7166_v55 = vld [vmem:[#allocation2] sm:$0xff] }
 0x21a   :  { %v7073_v53 = vsel %vm950_vm1, 1.5707964, %v974_v51  ;;  %2500 = vmatpush1.msra.mxu1 %v6666_v32  ;;  %vm565_vm4 = vcmp.gt.f32.partialorder %v7014_v17, 2.4142137  ;;  %5200 = vrcp.f32 %v626_v8  ;;  %v7079_v20 = vadd.f32 %v6973_v9, %v407_v59  ;;  %2436 = vmatmul.mubr.f32.vlgmr.msra.gmra.mxu0 %v6682_v48 }
 0x21b   :  { %9106 = vst [vmem:[#allocation59_spill] sm:$0xff] %v7073_v53  ;;  %v7082_v13 = vadd.f32 %v6977_v30, %v408_v58  ;;  %2501 = vmatprep.subr.mxu1 %v6504_v56  ;;  %v515_v2 = vsel %vm514_vm5, %v6892_v60, %v513_v0  ;;  %vm577_vm14 = vcmp.gt.f32.partialorder %v7014_v17, 0.41421357  ;;  %5202 = vrsqrt.f32 %v7043_v34  ;;  %2575 = vmatprep.subr.mxu0 %v6504_v56 }
 0x21c   :  { %v7092_v8 = vand.u32 2147483647, %v7046_v61  ;;  %2503 = vmatpush1.msra.mxu1 %v6684_v16  ;;  %v5189_v9 = vpop.eup %5188  ;;  %v7098_v30 = vsel %vm509_vm11, %v510_v44, %v508_v23  ;;  %vm578_vm10 = vcmp.gt.f32.partialorder %v7017_v1, 0.41421357  ;;  %5204 = vrcp.f32 %v7060_v12  ;;  %2324 = vmatprep.mubr.f32.mxu1 %v6828_v18 }
 0x21d   :  { %9107 = vst [vmem:[#allocation60_spill] sm:$0xff] %v7098_v30  ;;  %v623_v0 = vadd.f32 1.0, %v7060_v12  ;;  %v9108_v52 = vand.u32 4294901760, %v6501_v11  ;;  %v5191_v51 = vpop.eup %5190  ;;  %v685_v59 = vsel %vm577_vm14, 0.7853982, %v6504_v56  ;;  %v7113_v44 = vmul.f32 %v5189_v9, %v6944_v26  ;;  %2504 = vmatprep.subr.mxu1 %v6504_v56  ;;  %2326 = vmatmul.mubr.f32.gmra.mxu1 %v6851_v38  ;;  %v9118_v38 = vld [vmem:[#allocation11_spill] sm:$0xff] }
 0x21e   :  { %v686_v54 = vsel %vm578_vm10, 0.7853982, %v6504_v56  ;;  %5206 = vrcp.f32 %v7092_v8  ;;  %v7120_v11 = vsel %vm516_vm12, %v517_v4, %v515_v2  ;;  %v7123_v58 = vmul.f32 %v5191_v51, %v6987_v33  ;;  %2442 = vmatprep.mubr.f32.mxu0 %v6688_v29  ;;  %2506 = vmatpush1.msra.mxu1 %v6703_v50  ;;  %v9112_v4 = vld [vmem:[#allocation15_spill] sm:$0xff] }
 0x21f   :  { %2579 = vmatpush1.msra.mxu0 %v9108_v52  ;;  %9109 = vst [vmem:[#allocation61_spill] sm:$0xff] %v7113_v44  ;;  %9110 = vst [vmem:[#allocation62_spill] sm:$0xff] %v7120_v11  ;;  %v624_v23 = vadd.f32 1.0, %v7092_v8  ;;  %5208 = vrcp.f32 %v623_v0  ;;  %vm566_vm2 = vcmp.gt.f32.partialorder %v7017_v1, 2.4142137  ;;  %v4851_v9 = vadd.f32 -1.0, %v7014_v17  ;;  %2535 = vmatprep.subr.mxu1 %v6504_v56 }
 0x220   :  { %2580 = vmatprep.subr.mxu0 %v6504_v56  ;;  %9111 = vst [vmem:[#allocation63_spill] sm:$0xff] %v7123_v58  ;;  %v4852_v52 = vadd.f32 -1.0, %v7017_v1  ;;  %v7132_v60 = vand.u32 2147483647, %v7113_v44  ;;  %v9113_v2 = vand.u32 4294901760, %v9112_v4  ;;  %2445 = vmatmul.mubr.f32.gmra.mxu0 %v6826_v40  ;;  %vm479_vm0 = vcmp.eq.f32.partialorder %v6999_v41, inf }
 0x221   :  { %v7139_v0 = vsel %vm565_vm4, 1.5707964, %v685_v59  ;;  %v7143_v51 = vsel %vm566_vm2, 1.5707964, %v686_v54  ;;  %v7146_v29 = vand.u32 2147483647, %v7123_v58  ;;  %5210 = vrcp.f32 %v624_v23  ;;  %2451 = vmatprep.mubr.f32.mxu0 %v6879_v47  ;;  %2544 = vmatprep.mubr.f32.mxu1 %v9118_v38 }
 0x222   :  { %2584 = vmatpush1.msra.mxu0 %v9113_v2  ;;  %5212 = vrcp.f32 %v7132_v60  ;;  %v9114_v59 = vld [vmem:[#allocation37_spill] sm:$0xff]  ;;  %vm481_vm15 = vcmp.eq.f32.partialorder %v6999_v41, 0.0  ;;  %vm486_vm8 = vcmp.eq.f32.partialorder %v7043_v34, inf  ;;  %vm575_vm9 = vcmp.gt.f32.partialorder %v7060_v12, 0.41421357  ;;  %v9115_v2 = vld [vmem:[#allocation16_spill] sm:$0xff] }
 0x223   :  { %2585 = vmatprep.subr.mxu0 %v6504_v56  ;;  %2537 = vmatpush2.msra.mxu1 %v9114_v59  ;;  %v5193_v54 = vpop.eup %5192  ;;  %v9116_v48 = vand.u32 4294901760, %v9115_v2  ;;  %vm576_vm13 = vcmp.gt.f32.partialorder %v7092_v8, 0.41421357  ;;  %5214 = vrcp.f32 %v7146_v29  ;;  %v621_v40 = vadd.f32 1.0, %v7132_v60  ;;  %v9117_v11 = vld [vmem:[#allocation39_spill] sm:$0xff]  ;;  %v9121_v59 = vld [vmem:[#allocation34_spill] sm:$0xff] }
 0x224   :  { %2538 = vmatprep.subr.mxu1 %v6504_v56  ;;  %v5195_v4 = vpop.eup %5194  ;;  %v683_v23 = vsel %vm575_vm9, 0.7853982, %v7166_v55  ;;  %vm488_vm6 = vcmp.eq.f32.partialorder %v7043_v34, 0.0  ;;  %vm563_vm11 = vcmp.gt.f32.partialorder %v7060_v12, 2.4142137  ;;  %v622_v2 = vadd.f32 1.0, %v7146_v29  ;;  %2454 = vmatmul.mubr.f32.gmra.mxu0 %v6890_v6 }
 0x225   :  { %2589 = vmatpush1.msra.mxu0 %v9116_v48  ;;  %v5197_v48 = vpop.eup %5196  ;;  %v684_v30 = vsel %vm576_vm13, 0.7853982, %v7166_v55  ;;  %2540 = vmatpush2.msra.mxu1 %v9117_v11  ;;  %v478_v31 = vmul.f32 %v5193_v54, %v6999_v41  ;;  %vm564_vm7 = vcmp.gt.f32.partialorder %v7092_v8, 2.4142137  ;;  %v4849_v47 = vadd.f32 -1.0, %v7060_v12  ;;  %v9119_v56 = vld [vmem:[#allocation18_spill] sm:$0xff] }
 0x226   :  { %2590 = vmatprep.subr.mxu0 %v7166_v55  ;;  %5216 = vrcp.f32 %v621_v40  ;;  %v9120_v18 = vand.u32 4294901760, %v9119_v56  ;;  %2548 = vmatmul.mubr.f32.vlgmr.msra.gmra.mxu1 %v9121_v59  ;;  %v5199_v46 = vpop.eup %5198  ;;  %v600_v58 = vmul.f32 -1.0, %v5195_v4  ;;  %v4850_v50 = vadd.f32 -1.0, %v7092_v8  ;;  %v9122_v4 = vld [vmem:[#allocation20_spill] sm:$0xff]  ;;  %v9128_v59 = vld [vmem:[#allocation14_spill] sm:$0xff] }
 0x227   :  { %5218 = vrcp.f32 %v622_v2  ;;  %v7191_v38 = vsel %vm563_vm11, 1.5707964, %v683_v23  ;;  %v5201_v54 = vpop.eup %5200  ;;  %v602_v40 = vmul.f32 -1.0, %v5197_v48  ;;  %v648_v11 = vmul.f32 %v5199_v46, %v4851_v9  ;;  %2715 = vmatprep.subr.mxu1 %v7166_v55  ;;  %v9124_v46 = vld [vmem:[#allocation13_spill] sm:$0xff] }
 0x228   :  { %2594 = vmatpush1.msra.mxu0 %v9120_v18  ;;  %v7197_v18 = vsel %vm564_vm7, 1.5707964, %v684_v30  ;;  %v9123_v56 = vand.u32 4294901760, %v9122_v4  ;;  %5220 = vrsqrt.f32 %v7082_v13  ;;  %v5203_v23 = vpop.eup %5202  ;;  %v650_v2 = vmul.f32 %v5201_v54, %v4852_v52  ;;  %2717 = vmatpush1.msra.mxu1 %v9124_v46  ;;  %v9125_v54 = vld [vmem:[#allocation36_spill] sm:$0xff] }
 0x229   :  { %2595 = vmatprep.subr.mxu0 %v7166_v55  ;;  %vm561_vm1 = vcmp.gt.f32.partialorder %v7132_v60, 2.4142137  ;;  %vm562_vm5 = vcmp.gt.f32.partialorder %v7146_v29, 2.4142137  ;;  %vm573_vm12 = vcmp.gt.f32.partialorder %v7132_v60, 0.41421357  ;;  %v5205_v30 = vpop.eup %5204  ;;  %v661_v9 = vsel %vm577_vm14, %v648_v11, %v7014_v17  ;;  %2718 = vmatprep.subr.mxu1 %v7166_v55 }
 0x22a   :  { %2599 = vmatpush1.msra.mxu0 %v9123_v56  ;;  %v480_v48 = vsel %vm479_vm0, %v6999_v41, %v478_v31  ;;  %v485_v52 = vmul.f32 %v5203_v23, %v7043_v34  ;;  %vm574_vm3 = vcmp.gt.f32.partialorder %v7146_v29, 0.41421357  ;;  %2555 = vmatprep.mubr.f32.mxu1 %v9125_v54  ;;  %v662_v56 = vsel %vm578_vm10, %v650_v2, %v7017_v1  ;;  %v9126_v23 = vld [vmem:[#allocation22_spill] sm:$0xff] }
 0x22b   :  { %2600 = vmatprep.subr.mxu0 %v7166_v55  ;;  %v5207_v4 = vpop.eup %5206  ;;  %v7223_v11 = vsel %vm565_vm4, %v600_v58, %v661_v9  ;;  %v4847_v46 = vadd.f32 -1.0, %v7132_v60  ;;  %v681_v31 = vsel %vm573_vm12, 0.7853982, %v7166_v55  ;;  %v9127_v6 = vand.u32 4294901760, %v9126_v23  ;;  %2720 = vmatpush1.msra.mxu1 %v9128_v59 }
 0x22c   :  { %v5209_v54 = vpop.eup %5208  ;;  %v7234_v53 = vsel %vm566_vm2, %v602_v40, %v662_v56  ;;  %v7238_v17 = vmul.f32 %v7223_v11, %v7223_v11  ;;  %v596_v58 = vmul.f32 -1.0, %v5205_v30  ;;  %v682_v2 = vsel %vm574_vm3, 0.7853982, %v7166_v55  ;;  %2559 = vmatmul.mubr.f32.gmra.mxu1 %v6876_v63  ;;  %2721 = vmatprep.subr.mxu1 %v7166_v55 }
 0x22d   :  { %2604 = vmatpush1.msra.mxu0 %v9127_v6  ;;  %v7247_v6 = vmul.f32 %v7234_v53, %v7234_v53  ;;  %v487_v1 = vsel %vm486_vm8, %v7043_v34, %v485_v52  ;;  %v4848_v59 = vadd.f32 -1.0, %v7146_v29  ;;  %v644_v40 = vmul.f32 %v5209_v54, %v4849_v47  ;;  %2723 = vmatpush1.msra.mxu1 %v6521_v37 }
 0x22e   :  { %2605 = vmatprep.subr.mxu0 %v7166_v55  ;;  %v9129_v30 = vand.u32 4294901760, %v6576_v43  ;;  %v5211_v9 = vpop.eup %5210  ;;  %v721_v56 = vmul.f32 0.080537446, %v7238_v17  ;;  %v9130_v23 = vand.u32 2147483648, %v6999_v41  ;;  %v598_v44 = vmul.f32 -1.0, %v5207_v4  ;;  %2724 = vmatprep.subr.mxu1 %v7166_v55 }
 0x22f   :  { %v7265_v52 = vsel %vm561_vm1, 1.5707964, %v681_v31  ;;  %v5213_v43 = vpop.eup %5212  ;;  %v722_v47 = vmul.f32 0.080537446, %v7247_v6  ;;  %v646_v54 = vmul.f32 %v5211_v9, %v4850_v50  ;;  %v7275_v41 = vsel %vm562_vm5, 1.5707964, %v682_v2  ;;  %2566 = vmatprep.mubr.f32.mxu1 %v6905_v21 }
 0x230   :  { %2609 = vmatpush1.msra.mxu0 %v9129_v30  ;;  %v7261_v63 = vsel %vm481_vm15, %v9130_v23, %v480_v48  ;;  %v659_v30 = vsel %vm575_vm9, %v644_v40, %v7060_v12  ;;  %v4863_v48 = vadd.f32 -0.13877685, %v721_v56  ;;  %v9131_v37 = vand.u32 2147483648, %v7043_v34  ;;  %v9133_v31 = vld [vmem:[#allocation25_spill] sm:$0xff]  ;;  %v5215_v9 = vpop.eup %5214  ;;  %2570 = vmatmul.mubr.f32.gmra.mxu1 %v6913_v3 }
 0x231   :  { %2610 = vmatprep.subr.mxu0 %v7166_v55  ;;  %v7287_v50 = vsel %vm563_vm11, %v596_v58, %v659_v30  ;;  %vm945_vm4 = vcmp.gt.f32.partialorder %v6944_v26, 0.0  ;;  %v9134_v2 = vand.u32 4294901760, %v9133_v31  ;;  %v9135_v40 = vld [vmem:[#allocation17_spill] sm:$0xff]  ;;  %v4864_v23 = vadd.f32 -0.13877685, %v722_v47  ;;  %v9136_v47 = vld [vmem:[#allocation26_spill] sm:$0xff] }
 0x232   :  { %v7283_v4 = vsel %vm488_vm6, %v9131_v37, %v487_v1  ;;  %2726 = vmatpush1.msra.mxu1 %v9135_v40  ;;  %v660_v56 = vsel %vm576_vm13, %v646_v54, %v7092_v8  ;;  %v7298_v34 = vmul.f32 %v7287_v50, %v7287_v50  ;;  %vm946_vm14 = vcmp.gt.f32.partialorder %v6987_v33, 0.0 }
 0x233   :  { %9132 = vst [vmem:[#allocation15_spill] sm:$0xff] %v7283_v4  ;;  %2614 = vmatpush1.msra.mxu0 %v9134_v2  ;;  %vm957_vm10 = vcmp.lt.f32.partialorder %v6944_v26, 0.0  ;;  %v745_v12 = vmul.f32 %v4863_v48, %v7238_v17  ;;  %v592_v58 = vmul.f32 -1.0, %v5213_v43  ;;  %v7307_v1 = vsel %vm564_vm7, %v598_v44, %v660_v56  ;;  %2727 = vmatprep.subr.mxu1 %v7166_v55  ;;  %v5217_v30 = vpop.eup %5216  ;;  %v9138_v44 = vld [vmem:[#allocation19_spill] sm:$0xff]  ;;  %v9141_v4 = vld [vmem:[#allocation21_spill] sm:$0xff] }
 0x234   :  { %2615 = vmatprep.subr.mxu0 %v7166_v55  ;;  %vm947_vm2 = vcmp.gt.f32.partialorder %v6989_v5, 0.0  ;;  %vm958_vm0 = vcmp.lt.f32.partialorder %v6987_v33, 0.0  ;;  %v9137_v54 = vand.u32 4294901760, %v9136_v47  ;;  %v746_v37 = vmul.f32 %v4864_v23, %v7247_v6  ;;  %2729 = vmatpush1.msra.mxu1 %v9138_v44  ;;  %v5219_v43 = vpop.eup %5218  ;;  %v9139_v23 = vld [vmem:[#allocation27_spill] sm:$0xff] }
 0x235   :  { %v7317_v48 = vmul.f32 %v7307_v1, %v7307_v1  ;;  %v719_v8 = vmul.f32 0.080537446, %v7298_v34  ;;  %vm959_vm15 = vcmp.lt.f32.partialorder %v6989_v5, 0.0  ;;  %v757_v31 = vadd.f32 0.19977711, %v745_v12  ;;  %2730 = vmatprep.subr.mxu1 %v7166_v55  ;;  %v7327_v47 = vpop.eup %5220 }
 0x236   :  { %2619 = vmatpush1.msra.mxu0 %v9137_v54  ;;  %v594_v2 = vmul.f32 -1.0, %v5215_v9  ;;  %v640_v40 = vmul.f32 %v5217_v30, %v4847_v46  ;;  %vm960_vm8 = vcmp.lt.f32.partialorder %v7003_v7, 0.0  ;;  %v9140_v56 = vand.u32 4294901760, %v9139_v23  ;;  %2732 = vmatpush1.msra.mxu1 %v9141_v4  ;;  %v9142_v30 = vld [vmem:[#allocation28_spill] sm:$0xff] }
 0x237   :  { %2620 = vmatprep.subr.mxu0 %v7166_v55  ;;  %v758_v54 = vadd.f32 0.19977711, %v746_v37  ;;  %v642_v3 = vmul.f32 %v5219_v43, %v4848_v59  ;;  %v720_v21 = vmul.f32 0.080537446, %v7317_v48  ;;  %v4861_v44 = vadd.f32 -0.13877685, %v719_v8  ;;  %2733 = vmatprep.subr.mxu1 %v7166_v55 }
 0x238   :  { %2624 = vmatpush1.msra.mxu0 %v9140_v56  ;;  %vm948_vm9 = vcmp.gt.f32.partialorder %v7003_v7, 0.0  ;;  %v769_v46 = vmul.f32 %v757_v31, %v7238_v17  ;;  %v657_v9 = vsel %vm573_vm12, %v640_v40, %v7132_v60  ;;  %v969_v12 = vsel %vm957_vm10, -1.5707964, %v7166_v55  ;;  %v9144_v40 = vld [vmem:[#allocation23_spill] sm:$0xff]  ;;  %v9145_v60 = vld [vmem:[#allocation29_spill] sm:$0xff] }
 0x239   :  { %2625 = vmatprep.subr.mxu0 %v7166_v55  ;;  %v970_v59 = vsel %vm958_vm0, -1.5707964, %v7166_v55  ;;  %v9143_v4 = vand.u32 4294901760, %v9142_v30  ;;  %v770_v37 = vmul.f32 %v758_v54, %v7247_v6  ;;  %v658_v8 = vsel %vm574_vm3, %v642_v3, %v7146_v29  ;;  %2735 = vmatpush1.msra.mxu1 %v9144_v40 }
 0x23a   :  { %v7352_v43 = vsel %vm561_vm1, %v592_v58, %v657_v9  ;;  %v4862_v31 = vadd.f32 -0.13877685, %v720_v21  ;;  %v4875_v23 = vadd.f32 -0.3333295, %v769_v46  ;;  %v7358_v56 = vsel %vm562_vm5, %v594_v2, %v658_v8  ;;  %2736 = vmatprep.subr.mxu1 %v7166_v55  ;;  %v9147_v46 = vld [vmem:[#allocation24_spill] sm:$0xff]  ;;  %v9148_v8 = vld [vmem:[#allocation30_spill] sm:$0xff] }
 0x23b   :  { %2629 = vmatpush1.msra.mxu0 %v9143_v4  ;;  %v7362_v54 = vmul.f32 %v7352_v43, %v7352_v43  ;;  %v743_v3 = vmul.f32 %v4861_v44, %v7298_v34  ;;  %v9146_v58 = vand.u32 4294901760, %v9145_v60  ;;  %v4876_v21 = vadd.f32 -0.3333295, %v770_v37  ;;  %2738 = vmatpush1.msra.mxu1 %v9147_v46 }
 0x23c   :  { %2630 = vmatprep.subr.mxu0 %v7166_v55  ;;  %v7370_v9 = vmul.f32 %v7358_v56, %v7358_v56  ;;  %v744_v29 = vmul.f32 %v4862_v31, %v7317_v48  ;;  %v971_v2 = vsel %vm959_vm15, -1.5707964, %v7166_v55  ;;  %v793_v44 = vmul.f32 %v4875_v23, %v7238_v17  ;;  %2739 = vmatprep.subr.mxu1 %v7166_v55 }
 0x23d   :  { %2634 = vmatpush1.msra.mxu0 %v9146_v58  ;;  %v717_v30 = vmul.f32 0.080537446, %v7362_v54  ;;  %v755_v4 = vadd.f32 0.19977711, %v743_v3  ;;  %v972_v37 = vsel %vm960_vm8, -1.5707964, %v7166_v55  ;;  %v794_v40 = vmul.f32 %v4876_v21, %v7247_v6  ;;  %2741 = vmatpush1.msra.mxu1 %v6598_v15 }
 0x23e   :  { %2635 = vmatprep.subr.mxu0 %v7166_v55  ;;  %v9149_v31 = vand.u32 4294901760, %v9148_v8  ;;  %vm841_vm3 = vcmp.lt.f32.partialorder %v6985_v49, 0.0  ;;  %v718_v60 = vmul.f32 0.080537446, %v7370_v9  ;;  %v756_v58 = vadd.f32 0.19977711, %v744_v29  ;;  %2742 = vmatprep.subr.mxu1 %v7166_v55 }
 0x23f   :  { %v7391_v17 = vsel %vm945_vm4, 1.5707964, %v969_v12  ;;  %v805_v23 = vmul.f32 %v793_v44, %v7223_v11  ;;  %vm842_vm13 = vcmp.lt.f32.partialorder %v6996_v14, 0.0  ;;  %v4859_v3 = vadd.f32 -0.13877685, %v717_v30  ;;  %2744 = vmatpush1.msra.mxu1 %v6611_v35  ;;  %v9152_v35 = vld [vmem:[#allocation44_spill] sm:$0xff] }
 0x240   :  { %2639 = vmatpush1.msra.mxu0 %v9149_v31  ;;  %v767_v6 = vmul.f32 %v755_v4, %v7298_v34  ;;  %v7400_v21 = vsel %vm946_vm14, 1.5707964, %v970_v59  ;;  %v9150_v12 = vand.u32 4294901760, %v6672_v36  ;;  %v806_v15 = vmul.f32 %v794_v40, %v7234_v53  ;;  %2745 = vmatprep.subr.mxu1 %v7166_v55 }
 0x241   :  { %2640 = vmatprep.subr.mxu0 %v7166_v55  ;;  %v4860_v29 = vadd.f32 -0.13877685, %v718_v60  ;;  %v768_v46 = vmul.f32 %v756_v58, %v7317_v48  ;;  %v7409_v44 = vsel %vm947_vm2, 1.5707964, %v971_v2  ;;  %v817_v59 = vadd.f32 %v805_v23, %v7223_v11  ;;  %2747 = vmatpush1.msra.mxu1 %v6624_v19 }
 0x242   :  { %2644 = vmatpush1.msra.mxu0 %v9150_v12  ;;  %vm901_vm6 = vcmp.ge.f32.partialorder %v6834_v57, 0.0  ;;  %v741_v36 = vmul.f32 %v4859_v3, %v7362_v54  ;;  %v4873_v30 = vadd.f32 -0.3333295, %v767_v6  ;;  %v9151_v4 = vand.u32 4294901760, %v6691_v10  ;;  %2748 = vmatprep.subr.mxu1 %v7166_v55 }
 0x243   :  { %2645 = vmatprep.subr.mxu0 %v7166_v55  ;;  %v499_v2 = vmul.f32 %v7327_v47, %v7082_v13  ;;  %v818_v8 = vadd.f32 %v806_v15, %v7234_v53  ;;  %vm889_vm11 = vcmp.lt.f32.partialorder %v9152_v35, 0.0  ;;  %vm902_vm7 = vcmp.ge.f32.partialorder %v6836_v24, 0.0  ;;  %v9153_v47 = vld [vmem:[#allocation46_spill] sm:$0xff]  ;;  %2750 = vmatpush1.msra.mxu1 %v6637_v62 }
 0x244   :  { %2649 = vmatpush1.msra.mxu0 %v9151_v4  ;;  %v742_v11 = vmul.f32 %v4860_v29, %v7370_v9  ;;  %v4874_v31 = vadd.f32 -0.3333295, %v768_v46  ;;  %vm500_vm1 = vcmp.eq.f32.partialorder %v7082_v13, inf  ;;  %v829_v10 = vadd.f32 %v817_v59, %v7139_v0  ;;  %2751 = vmatprep.subr.mxu1 %v7166_v55  ;;  %v9157_v4 = vld [vmem:[#allocation9_spill] sm:$0xff] }
 0x245   :  { %2650 = vmatprep.subr.mxu0 %v7166_v55  ;;  %vm877_vm5 = vcmp.gt.f32.partialorder %v9152_v35, 0.0  ;;  %vm890_vm12 = vcmp.lt.f32.partialorder %v9153_v47, 0.0  ;;  %v753_v53 = vadd.f32 0.19977711, %v741_v36  ;;  %v791_v40 = vmul.f32 %v4873_v30, %v7298_v34  ;;  %2753 = vmatpush1.msra.mxu1 %v6650_v28 }
 0x246   :  { %v7434_v60 = vsel %vm948_vm9, 1.5707964, %v972_v37  ;;  %v9154_v19 = vand.u32 4294901760, %v6710_v22  ;;  %v830_v58 = vadd.f32 %v818_v8, %v7143_v51  ;;  %vm878_vm4 = vcmp.gt.f32.partialorder %v9153_v47, 0.0  ;;  %2754 = vmatprep.subr.mxu1 %v7166_v55  ;;  %2694 = vmatprep.mubr.f32.mxu0 %v9157_v4  ;;  %v9165_v47 = vld [vmem:[#allocation43_spill] sm:$0xff] }
 0x247   :  { %v754_v0 = vadd.f32 0.19977711, %v742_v11  ;;  %v792_v23 = vmul.f32 %v4874_v31, %v7317_v48  ;;  %v1162_v3 = vsub.f32 1.0, %v7261_v63  ;;  %v853_v34 = vsub.f32 0.0, %v829_v10  ;;  %2756 = vmatpush1.msra.mxu1 %v6666_v32  ;;  %2798 = vmatprep.mubr.f32.mxu1 %v9157_v4 }
 0x248   :  { %2654 = vmatpush1.msra.mxu0 %v9154_v19  ;;  %v765_v37 = vmul.f32 %v753_v53, %v7362_v54  ;;  %v803_v6 = vmul.f32 %v791_v40, %v7287_v50  ;;  %vm839_vm14 = vcmp.lt.f32.partialorder %v7027_v39, 0.0  ;;  %v9155_v22 = vand.u32 4294901760, %v6727_v45  ;;  %2757 = vmatprep.subr.mxu1 %v7166_v55  ;;  %v9161_v19 = vld [vmem:[#allocation35_spill] sm:$0xff] }
 0x249   :  { %2683 = vmatprep.subr.mxu0 %v7166_v55  ;;  %v501_v51 = vsel %vm500_vm1, %v7082_v13, %v499_v2  ;;  %v854_v48 = vsub.f32 0.0, %v830_v58  ;;  %v766_v62 = vmul.f32 %v754_v0, %v7370_v9  ;;  %v804_v12 = vmul.f32 %v792_v23, %v7307_v1  ;;  %2759 = vmatpush1.msra.mxu1 %v6684_v16  ;;  %v9160_v16 = vld [vmem:[#allocation59_spill] sm:$0xff] }
 0x24a   :  { %2687 = vmatpush2.msra.mxu0 %v9155_v22  ;;  %vm840_vm10 = vcmp.lt.f32.partialorder %v7046_v61, 0.0  ;;  %vm502_vm2 = vcmp.eq.f32.partialorder %v7082_v13, 0.0  ;;  %v865_v45 = vsel %vm841_vm3, %v853_v34, %v829_v10  ;;  %v4871_v15 = vadd.f32 -0.3333295, %v765_v37  ;;  %2760 = vmatprep.subr.mxu1 %v7166_v55  ;;  %v9162_v0 = vld [vmem:[#allocation63_spill] sm:$0xff]  ;;  %v9163_v34 = vld [vmem:[#allocation41_spill] sm:$0xff] }
 0x24b   :  { %2688 = vmatprep.subr.mxu0 %v7166_v55  ;;  %v815_v29 = vadd.f32 %v803_v6, %v7287_v50  ;;  %v9156_v46 = vand.u32 4294901760, %v6744_v42  ;;  %5222 = vrsqrt.f32 %v7079_v20  ;;  %v866_v28 = vsel %vm842_vm13, %v854_v48, %v830_v58  ;;  %v9158_v42 = vld [vmem:[#allocation31_spill] sm:$0xff]  ;;  %2762 = vmatpush1.msra.mxu1 %v9161_v19  ;;  %v9164_v22 = vld [vmem:[#allocation37_spill] sm:$0xff] }
 0x24c   :  { %v913_v59 = vadd.f32 3.1415927, %v865_v45  ;;  %v4887_v36 = vadd.f32 -3.1415927, %v865_v45  ;;  %v4872_v30 = vadd.f32 -0.3333295, %v766_v62  ;;  %v789_v50 = vmul.f32 %v4871_v15, %v7362_v54  ;;  %2791 = vmatprep.subr.mxu1 %v7166_v55 }
 0x24d   :  { %2692 = vmatpush2.msra.mxu0 %v9156_v46  ;;  %v914_v49 = vadd.f32 3.1415927, %v866_v28  ;;  %v4888_v2 = vadd.f32 -3.1415927, %v866_v28  ;;  %v816_v8 = vadd.f32 %v804_v12, %v7307_v1  ;;  %v827_v31 = vadd.f32 %v815_v29, %v7191_v38  ;;  %v9159_v38 = vld [vmem:[#allocation61_spill] sm:$0xff]  ;;  %2793 = vmatpush2.msra.mxu1 %v9164_v22  ;;  %v9166_v48 = vld [vmem:[#allocation47_spill] sm:$0xff] }
 0x24e   :  { %2696 = vmatmul.mubr.f32.vlgmr.msra.gmra.mxu0 %v9158_v42  ;;  %v937_v14 = vsel %vm901_vm6, %v913_v59, %v4887_v36  ;;  %v790_v11 = vmul.f32 %v4872_v30, %v7370_v9  ;;  %vm899_vm0 = vcmp.ge.f32.partialorder %v6989_v5, 0.0  ;;  %v503_v32 = vand.u32 2147483648, %v7082_v13  ;;  %2794 = vmatprep.subr.mxu1 %v7166_v55  ;;  %v9167_v13 = vld [vmem:[#allocation50_spill] sm:$0xff]  ;;  %v9169_v61 = vld [vmem:[#allocation39_spill] sm:$0xff]  ;;  %v9170_v36 = vld [vmem:[#allocation45_spill] sm:$0xff] }
 0x24f   :  { %2701 = vmatprep.mubr.f32.mxu0 %v6669_v25  ;;  %v938_v1 = vsel %vm902_vm7, %v914_v49, %v4888_v2  ;;  %v997_v57 = vsel %vm889_vm11, %v937_v14, %v7069_v27  ;;  %v801_v54 = vmul.f32 %v789_v50, %v7352_v43  ;;  %v828_v9 = vadd.f32 %v816_v8, %v7197_v18  ;;  %v9171_v50 = vld [vmem:[#allocation55_spill] sm:$0xff]  ;;  %v9172_v8 = vld [vmem:[#allocation56_spill] sm:$0xff] }
 0x250   :  { %vm837_vm15 = vcmp.lt.f32.partialorder %v9159_v38, 0.0  ;;  %v998_v10 = vsel %vm890_vm12, %v938_v1, %v9160_v16  ;;  %v1009_v24 = vsel %vm877_vm5, %v865_v45, %v997_v57  ;;  %v802_v53 = vmul.f32 %v790_v11, %v7358_v56  ;;  %4961 = vmatprep.subr.mxu0 %v7166_v55  ;;  %2796 = vmatpush2.msra.mxu1 %v9169_v61  ;;  %v9175_v16 = vld [vmem:[#allocation62_spill] sm:$0xff] }
 0x251   :  { %v851_v40 = vsub.f32 0.0, %v827_v31  ;;  %v1010_v27 = vsel %vm878_vm4, %v866_v28, %v998_v10  ;;  %v1022_v18 = vmul.f32 0.31830987, %v1009_v24  ;;  %v813_v58 = vadd.f32 %v801_v54, %v7352_v43  ;;  %2800 = vmatmul.mubr.f32.vlgmr.msra.gmra.mxu1 %v9158_v42  ;;  %4974 = vmatprep.subr.mxu1 %v7166_v55 }
 0x252   :  { %vm838_vm8 = vcmp.lt.f32.partialorder %v9162_v0, 0.0  ;;  %v852_v23 = vsub.f32 0.0, %v828_v9  ;;  %2703 = vmatmul.mubr.f32.gmra.mxu0 %v9163_v34  ;;  %v1023_v35 = vmul.f32 0.31830987, %v1010_v27  ;;  %v814_v37 = vadd.f32 %v802_v53, %v7358_v56  ;;  %2805 = vmatprep.mubr.f32.mxu1 %v6669_v25 }
 0x253   :  { %v7509_v6 = vsel %vm839_vm14, %v851_v40, %v827_v31  ;;  %2708 = vmatprep.mubr.f32.mxu0 %v9165_v47  ;;  %v7515_v43 = vsel %vm502_vm2, %v503_v32, %v501_v51  ;;  %vm887_vm9 = vcmp.lt.f32.partialorder %v9166_v48, 0.0  ;;  %v1034_v62 = vmul.f32 9.0, %v1022_v18 }
 0x254   :  { %v825_v12 = vadd.f32 %v813_v58, %v7265_v52  ;;  %v7521_v56 = vsel %vm840_vm10, %v852_v23, %v828_v9  ;;  %vm900_vm3 = vcmp.ge.f32.partialorder %v7003_v7, 0.0  ;;  %v911_v39 = vadd.f32 3.1415927, %v7509_v6  ;;  %v9168_v52 = vld [vmem:[#allocation15_spill] sm:$0xff] }
 0x255   :  { %vm888_vm13 = vcmp.lt.f32.partialorder %v9167_v13, 0.0  ;;  %v1035_v51 = vmul.f32 9.0, %v1023_v35  ;;  %v826_v45 = vadd.f32 %v814_v37, %v7275_v41  ;;  %v4885_v15 = vadd.f32 -3.1415927, %v7509_v6  ;;  %2807 = vmatmul.mubr.f32.gmra.mxu1 %v9163_v34 }
 0x256   :  { %v1163_v29 = vsub.f32 1.0, %v9168_v52  ;;  %v1046_v46 = vfloor.f32 %v1034_v62  ;;  %v1058_v28 = vceil.f32 %v1034_v62  ;;  %v849_v59 = vsub.f32 0.0, %v825_v12  ;;  %2710 = vmatmul.mubr.f32.gmra.mxu0 %v9170_v36  ;;  %2812 = vmatprep.mubr.f32.mxu1 %v9165_v47 }
 0x257   :  { %vm897_vm11 = vcmp.ge.f32.partialorder %v6944_v26, 0.0  ;;  %vm898_vm7 = vcmp.ge.f32.partialorder %v6987_v33, 0.0  ;;  %v1165_v41 = vsub.f32 1.0, %v7515_v43  ;;  %v1047_v30 = vfloor.f32 %v1035_v51 }
 0x258   :  { %v1059_v49 = vceil.f32 %v1035_v51  ;;  %v850_v2 = vsub.f32 0.0, %v826_v45  ;;  %v912_v14 = vadd.f32 3.1415927, %v7521_v56  ;;  %vm1082_vm12 = vcmp.lt.f32.partialorder %v1046_v46, 0.0  ;;  %v5223_v1 = vpop.eup %5222 }
 0x259   :  { %v1094_v11 = vadd.f32 9.0, %v1046_v46  ;;  %vm873_vm4 = vcmp.gt.f32.partialorder %v9171_v50, 0.0  ;;  %vm874_vm14 = vcmp.gt.f32.partialorder %v9172_v8, 0.0  ;;  %v4886_v31 = vadd.f32 -3.1415927, %v7521_v56  ;;  %2814 = vmatmul.mubr.f32.gmra.mxu1 %v9170_v36 }
 0x25a   :  { %v935_v32 = vsel %vm899_vm0, %v911_v39, %v4885_v15  ;;  %vm493_vm10 = vcmp.eq.f32.partialorder %v7079_v20, inf  ;;  %vm1071_vm2 = vcmp.eq.f32.partialorder %v1047_v30, %v1059_v49  ;;  %vm1083_vm5 = vcmp.lt.f32.partialorder %v1047_v30, 0.0 }
 0x25b   :  { %v1095_v57 = vadd.f32 9.0, %v1047_v30  ;;  %v861_v55 = vsel %vm837_vm15, %v849_v59, %v825_v12  ;;  %vm875_vm1 = vcmp.gt.f32.partialorder %v9166_v48, 0.0  ;;  %vm7552_vm6 = vcmp.eq.f32.partialorder %v1046_v46, %v1058_v28 }
 0x25c   :  { %v1106_v9 = vsel %vm1082_vm12, %v1094_v11, %v1046_v46  ;;  %v7557_v10 = vsel %vm1071_vm2, 1.0, %v9175_v16  ;;  %v9176_v5 = vsub.f32 1.0, %v9175_v16  ;;  %vm495_vm0 = vcmp.eq.f32.partialorder %v7079_v20, 0.0  ;;  %v9180_v46 = vld [vmem:[#allocation60_spill] sm:$0xff] }
 0x25d   :  { %v1107_v38 = vsel %vm1083_vm5, %v1095_v57, %v1047_v30  ;;  %vm1118_vm15 = vcmp.ge.f32.partialorder %v1106_v9, 9.0  ;;  %v4899_v53 = vadd.f32 -9.0, %v1106_v9  ;;  %v862_v40 = vsel %vm838_vm8, %v850_v2, %v826_v45 }
 0x25e   :  { %v7561_v24 = vsel %vm1071_vm2, 0.0, %v9176_v5  ;;  %vm1119_vm12 = vcmp.ge.f32.partialorder %v1107_v38, 9.0  ;;  %v4900_v19 = vadd.f32 -9.0, %v1107_v38  ;;  %v909_v27 = vadd.f32 3.1415927, %v861_v55 }
 0x25f   :  { %v910_v18 = vadd.f32 3.1415927, %v862_v40  ;;  %v4883_v58 = vadd.f32 -3.1415927, %v861_v55  ;;  %v4884_v23 = vadd.f32 -3.1415927, %v862_v40  ;;  %v936_v35 = vsel %vm900_vm3, %v912_v14, %v4886_v31 }
 0x260   :  { %v995_v37 = vsel %vm887_vm9, %v935_v32, %v7409_v44  ;;  %v996_v0 = vsel %vm888_vm13, %v936_v35, %v7434_v60  ;;  %v7577_v22 = vsel %vm1119_vm12, %v4900_v19, %v1107_v38  ;;  %v492_v62 = vmul.f32 %v5223_v1, %v7079_v20 }
 0x261   :  { %v496_v12 = vand.u32 2147483648, %v7079_v20  ;;  %v933_v7 = vsel %vm897_vm11, %v909_v27, %v4883_v58  ;;  %v934_v39 = vsel %vm898_vm7, %v910_v18, %v4884_v23  ;;  %vm9177_vm8 = vcmp.gt.f32.partialorder %v9167_v13, 0.0 }
 0x262   :  { %v1008_v44 = vsel %vm9177_vm8, %v7521_v56, %v996_v0  ;;  %vm1263_vm9 = vcmp.eq.f32.partialorder %v7577_v22, 6.0  ;;  %vm9178_vm3 = vcmp.lt.f32.partialorder %v9171_v50, 0.0  ;;  %vm9179_vm13 = vcmp.lt.f32.partialorder %v9172_v8, 0.0 }
 0x263   :  { %v993_v60 = vsel %vm9178_vm3, %v933_v7, %v7391_v17  ;;  %v994_v51 = vsel %vm9179_vm13, %v934_v39, %v7400_v21  ;;  %v1021_v45 = vmul.f32 0.31830987, %v1008_v44  ;;  %vm1275_vm11 = vcmp.eq.f32.partialorder %v7577_v22, 7.0 }
 0x264   :  { %v1005_v26 = vsel %vm873_vm4, %v861_v55, %v993_v60  ;;  %v1006_v33 = vsel %vm874_vm14, %v862_v40, %v994_v51  ;;  %v1551_v56 = vsel %vm1275_vm11, %v7557_v10, 0.0  ;;  %v1563_v17 = vsel %vm1263_vm9, %v7561_v24, 0.0 }
 0x265   :  { %v1018_v13 = vmul.f32 0.31830987, %v1005_v26  ;;  %v1019_v15 = vmul.f32 0.31830987, %v1006_v33  ;;  %v1033_v21 = vmul.f32 9.0, %v1021_v45  ;;  %v7606_v61 = vadd.f32 %v1563_v17, %v1551_v56 }
 0x266   :  { %v7611_v28 = vsel %vm7552_vm6, 1.0, %v9180_v46  ;;  %v494_v59 = vsel %vm493_vm10, %v7079_v20, %v492_v62  ;;  %v1007_v30 = vsel %vm875_vm1, %v7509_v6, %v995_v37  ;;  %v7620_v49 = vsel %vm1118_vm15, %v4899_v53, %v1106_v9 }
 0x267   :  { %v1030_v2 = vmul.f32 9.0, %v1018_v13  ;;  %v1031_v50 = vmul.f32 9.0, %v1019_v15  ;;  %v1045_v8 = vfloor.f32 %v1033_v21  ;;  %v1057_v14 = vceil.f32 %v1033_v21 }
 0x268   :  { %v9181_v11 = vsub.f32 1.0, %v9180_v46  ;;  %v1867_v32 = vrot.slane %v7606_v61, 7  ;;  %v497_v1 = vsel %vm495_vm0, %v496_v12, %v494_v59  ;;  %v1020_v48 = vmul.f32 0.31830987, %v1007_v30 }
 0x269   :  { %v1042_v6 = vfloor.f32 %v1030_v2  ;;  %v1043_v57 = vfloor.f32 %v1031_v50  ;;  %v1054_v55 = vceil.f32 %v1030_v2  ;;  %v1055_v9 = vceil.f32 %v1031_v50 }
 0x26a   :  { %v7626_v31 = vsel %vm7552_vm6, 0.0, %v9181_v11  ;;  %vm1262_vm7 = vcmp.eq.f32.partialorder %v7620_v49, 6.0  ;;  %vm7632_vm1 = vcmp.eq.f32.partialorder %v1045_v8, %v1057_v14  ;;  %vm1081_vm5 = vcmp.lt.f32.partialorder %v1045_v8, 0.0 }
 0x26b   :  { %v1093_v54 = vadd.f32 9.0, %v1045_v8  ;;  %v1032_v5 = vmul.f32 9.0, %v1020_v48  ;;  %vm1066_vm6 = vcmp.eq.f32.partialorder %v1042_v6, %v1054_v55  ;;  %vm1067_vm4 = vcmp.eq.f32.partialorder %v1043_v57, %v1055_v9 }
 0x26c   :  { %vm1078_vm14 = vcmp.lt.f32.partialorder %v1042_v6, 0.0  ;;  %vm1079_vm10 = vcmp.lt.f32.partialorder %v1043_v57, 0.0  ;;  %v1090_v20 = vadd.f32 9.0, %v1042_v6  ;;  %v1091_v38 = vadd.f32 9.0, %v1043_v57 }
 0x26d   :  { %v7637_v53 = vsel %vm1066_vm6, 1.0, %v7261_v63  ;;  %v7640_v40 = vsel %vm1067_vm4, 1.0, %v9168_v52  ;;  %v7644_v19 = vsel %vm1066_vm6, 0.0, %v1162_v3  ;;  %v7648_v27 = vsel %vm1067_vm4, 0.0, %v1163_v29 }
 0x26e   :  { %v1105_v18 = vsel %vm1081_vm5, %v1093_v54, %v1045_v8  ;;  %v7653_v58 = vsel %vm7632_vm1, 1.0, %v7515_v43  ;;  %v1102_v23 = vsel %vm1078_vm14, %v1090_v20, %v1042_v6  ;;  %v1103_v35 = vsel %vm1079_vm10, %v1091_v38, %v1043_v57 }
 0x26f   :  { %vm1117_vm2 = vcmp.ge.f32.partialorder %v1105_v18, 9.0  ;;  %v4898_v37 = vadd.f32 -9.0, %v1105_v18  ;;  %vm1114_vm0 = vcmp.ge.f32.partialorder %v1102_v23, 9.0  ;;  %vm1115_vm15 = vcmp.ge.f32.partialorder %v1103_v35, 9.0 }
 0x270   :  { %v4895_v0 = vadd.f32 -9.0, %v1102_v23  ;;  %v4896_v63 = vadd.f32 -9.0, %v1103_v35  ;;  %v7661_v52 = vsel %vm7632_vm1, 0.0, %v1165_v41  ;;  %v1044_v29 = vfloor.f32 %v1032_v5 }
 0x271   :  { %v7655_v3 = vsel %vm1117_vm2, %v4898_v37, %v1105_v18  ;;  %v1056_v62 = vceil.f32 %v1032_v5  ;;  %v1164_v12 = vsub.f32 1.0, %v497_v1  ;;  %vm1274_vm3 = vcmp.eq.f32.partialorder %v7620_v49, 7.0 }
 0x272   :  { %vm1261_vm12 = vcmp.eq.f32.partialorder %v7655_v3, 6.0  ;;  %vm1273_vm8 = vcmp.eq.f32.partialorder %v7655_v3, 7.0  ;;  %vm1251_vm13 = vcmp.eq.f32.partialorder %v7577_v22, 5.0  ;;  %vm1080_vm5 = vcmp.lt.f32.partialorder %v1044_v29, 0.0 }
 0x273   :  { %v1549_v7 = vsel %vm1273_vm8, %v7653_v58, 0.0  ;;  %v1561_v43 = vsel %vm1261_vm12, %v7661_v52, 0.0  ;;  %vm1068_vm1 = vcmp.eq.f32.partialorder %v1044_v29, %v1056_v62  ;;  %v1092_v39 = vadd.f32 9.0, %v1044_v29 }
 0x274   :  { %v1573_v41 = vadd.f32 %v1561_v43, %v1549_v7  ;;  %v7673_v44 = vsel %vm1068_vm1, 1.0, %v497_v1  ;;  %v7675_v60 = vsel %vm1068_vm1, 0.0, %v1164_v12  ;;  %v1550_v51 = vsel %vm1274_vm3, %v7611_v28, 0.0 }
 0x275   :  { %v1562_v45 = vsel %vm1262_vm7, %v7626_v31, 0.0  ;;  %v7684_v26 = vsel %vm1115_vm15, %v4896_v63, %v1103_v35  ;;  %v7687_v33 = vsel %vm1114_vm0, %v4895_v0, %v1102_v23  ;;  %v1104_v17 = vsel %vm1080_vm5, %v1092_v39, %v1044_v29 }
 0x276   :  { %v1863_v56 = vrot.slane %v1573_v41, 7  ;;  %v1574_v13 = vadd.f32 %v1562_v45, %v1550_v51  ;;  %vm1259_vm6 = vcmp.eq.f32.partialorder %v7684_v26, 6.0  ;;  %vm1116_vm4 = vcmp.ge.f32.partialorder %v1104_v17, 9.0 }
 0x277   :  { %v4897_v15 = vadd.f32 -9.0, %v1104_v17  ;;  %vm1271_vm14 = vcmp.eq.f32.partialorder %v7684_v26, 7.0  ;;  %v1559_v21 = vsel %vm1259_vm6, %v7648_v27, 0.0  ;;  %vm9184_vm10 = vcmask 1040384  }
 0x278   :  { %v1868_v61 = vsel %vm9184_vm10, %v1863_v56, %v1867_v32  ;;  %v1865_v46 = vrot.slane %v1574_v13, 7  ;;  %v1547_v59 = vsel %vm1271_vm14, %v7640_v40, 0.0  ;;  %vm1258_vm2 = vcmp.eq.f32.partialorder %v7687_v33, 6.0 }
 0x279   :  { %3435 = vrot.lane.b32.xlu1 %v1868_v61, %s5281_s26  ;;  %v7700_v30 = vsel %vm1116_vm4, %v4897_v15, %v1104_v17  ;;  %v1571_v2 = vadd.f32 %v1559_v21, %v1547_v59  ;;  %vm8970_vm0 = vcmp.eq.f32.partialorder %v7687_v33, 7.0  ;;  %v1558_v50 = vsel %vm1258_vm2, %v7644_v19, 0.0  ;;  %vm9185_vm4 = vmmov %vm9184_vm10 }
 0x27a   :  { %vm1260_vm15 = vcmp.eq.f32.partialorder %v7700_v30, 6.0  ;;  %vm1272_vm1 = vcmp.eq.f32.partialorder %v7700_v30, 7.0  ;;  %v1546_v8 = vsel %vm8970_vm0, %v7637_v53, 0.0  ;;  %vm1249_vm5 = vcmp.eq.f32.partialorder %v7655_v3, 5.0  ;;  %vm9186_vm10 = vmmov %vm9185_vm4 }
 0x27b   :  { %v1548_v14 = vsel %vm1272_vm1, %v7673_v44, 0.0  ;;  %v1560_v11 = vsel %vm1260_vm15, %v7675_v60, 0.0  ;;  %v1862_v32 = vrot.slane %v1571_v2, 7  ;;  %v1570_v1 = vadd.f32 %v1558_v50, %v1546_v8 }
 0x27c   :  { %v1572_v48 = vadd.f32 %v1560_v11, %v1548_v14  ;;  %v1513_v6 = vsel %vm1261_vm12, %v7653_v58, 0.0  ;;  %v1515_v57 = vsel %vm1263_vm9, %v7557_v10, 0.0  ;;  %v1525_v55 = vsel %vm1249_vm5, %v7661_v52, 0.0 }
 0x27d   :  { %v1864_v9 = vsel %vm9185_vm4, %v1862_v32, %v1863_v56  ;;  %v1859_v16 = vrot.slane %v1570_v1, 7  ;;  %v1527_v54 = vsel %vm1251_vm13, %v7561_v24, 0.0  ;;  %v1537_v5 = vadd.f32 %v1525_v55, %v1513_v6 }
 0x27e   :  { %v1860_v20 = vrot.slane %v1572_v48, 7  ;;  %3431 = vrot.lane.b32.xlu1 %v1864_v9, %s5281_s26  ;;  %v1539_v38 = vadd.f32 %v1527_v54, %v1515_v57  ;;  %vm1248_vm12 = vcmp.eq.f32.partialorder %v7700_v30, 5.0  ;;  %vm1250_vm9 = vcmp.eq.f32.partialorder %v7620_v49, 5.0 }
 0x27f   :  { %v1831_v18 = vrot.slane %v1537_v5, 7  ;;  %v1512_v23 = vsel %vm1260_vm15, %v7673_v44, 0.0  ;;  %v1514_v35 = vsel %vm1262_vm7, %v7611_v28, 0.0  ;;  %v1524_v37 = vsel %vm1248_vm12, %v7675_v60, 0.0  ;;  %vm9187_vm7 = vmmov %vm9185_vm4 }
 0x280   :  { %v1866_v0 = vsel %vm9186_vm10, %v1860_v20, %v1865_v46  ;;  %v1861_v63 = vsel %vm9185_vm4, %v1859_v16, %v1860_v20  ;;  %v1835_v29 = vrot.slane %v1539_v38, 7  ;;  %v1526_v62 = vsel %vm1250_vm9, %v7626_v31, 0.0 }
 0x281   :  { %3433 = vrot.lane.b32.xlu0 %v1866_v0, %s5281_s26  ;;  %v1536_v12 = vadd.f32 %v1524_v37, %v1512_v23  ;;  %v1538_v7 = vadd.f32 %v1526_v62, %v1514_v35  ;;  %vm1247_vm15 = vcmp.eq.f32.partialorder %v7684_v26, 5.0  ;;  %v1511_v43 = vsel %vm1259_vm6, %v7640_v40, 0.0 }
 0x282   :  { %v1836_v41 = vsel %vm9187_vm7, %v1831_v18, %v1835_v29  ;;  %v1523_v39 = vsel %vm1247_vm15, %v7648_v27, 0.0  ;;  %vm1246_vm10 = vcmp.eq.f32.partialorder %v7687_v33, 5.0  ;;  %v1510_v51 = vsel %vm1258_vm2, %v7637_v53, 0.0  ;;  %vm9188_vm2 = vmmov %vm9187_vm7 }
 0x283   :  { %3427 = vrot.lane.b32.xlu1 %v1836_v41, %s5281_s26  ;;  %v1828_v45 = vrot.slane %v1536_v12, 7  ;;  %v1833_v56 = vrot.slane %v1538_v7, 7  ;;  %v1535_v17 = vadd.f32 %v1523_v39, %v1511_v43  ;;  %v1522_v13 = vsel %vm1246_vm10, %v7644_v19, 0.0  ;;  %vm9189_vm7 = vmmov %vm9188_vm2 }
 0x284   :  { %v1534_v15 = vadd.f32 %v1522_v13, %v1510_v51  ;;  %vm1237_vm6 = vcmp.eq.f32.partialorder %v7655_v3, 4.0  ;;  %vm1239_vm4 = vcmp.eq.f32.partialorder %v7577_v22, 4.0  ;;  %v1477_v21 = vsel %vm1249_vm5, %v7653_v58, 0.0 }
 0x285   :  { %3429 = vrot.lane.b32.xlu0 %v1861_v63, %s5281_s26  ;;  %v1834_v61 = vsel %vm9188_vm2, %v1828_v45, %v1833_v56  ;;  %v1830_v46 = vrot.slane %v1535_v17, 7  ;;  %v1479_v59 = vsel %vm1251_vm13, %v7557_v10, 0.0  ;;  %v1489_v2 = vsel %vm1237_vm6, %v7661_v52, 0.0  ;;  %vm9190_vm13 = vmmov %vm9189_vm7 }
 0x286   :  { %v1827_v50 = vrot.slane %v1534_v15, 7  ;;  %v1491_v8 = vsel %vm1239_vm4, %v7561_v24, 0.0  ;;  %v1501_v14 = vadd.f32 %v1489_v2, %v1477_v21  ;;  %vm1236_vm5 = vcmp.eq.f32.partialorder %v7700_v30, 4.0 }
 0x287   :  { %v1832_v11 = vsel %vm9189_vm7, %v1830_v46, %v1831_v18  ;;  %v1503_v32 = vadd.f32 %v1491_v8, %v1479_v59  ;;  %vm1238_vm2 = vcmp.eq.f32.partialorder %v7620_v49, 4.0  ;;  %v1476_v1 = vsel %vm1248_vm12, %v7673_v44, 0.0 }
 0x288   :  { %3423 = vrot.lane.b32.xlu1 %v1832_v11, %s5281_s26  ;;  %v1829_v48 = vsel %vm9190_vm13, %v1827_v50, %v1828_v45  ;;  %v1799_v6 = vrot.slane %v1501_v14, 7  ;;  %v1478_v57 = vsel %vm1250_vm9, %v7611_v28, 0.0  ;;  %v1488_v55 = vsel %vm1236_vm5, %v7675_v60, 0.0 }
 0x289   :  { %3425 = vrot.lane.b32.xlu0 %v1834_v61, %s5281_s26  ;;  %v1803_v9 = vrot.slane %v1503_v32, 7  ;;  %v1490_v16 = vsel %vm1238_vm2, %v7626_v31, 0.0  ;;  %v1500_v54 = vadd.f32 %v1488_v55, %v1476_v1  ;;  %vm1235_vm12 = vcmp.eq.f32.partialorder %v7684_v26, 4.0 }
 0x28a   :  { %v1502_v5 = vadd.f32 %v1490_v16, %v1478_v57  ;;  %v1475_v20 = vsel %vm1247_vm15, %v7640_v40, 0.0  ;;  %v1487_v38 = vsel %vm1235_vm12, %v7648_v27, 0.0  ;;  %vm1234_vm9 = vcmp.eq.f32.partialorder %v7687_v33, 4.0 }
 0x28b   :  { %v1804_v18 = vsel %vm9189_vm7, %v1799_v6, %v1803_v9  ;;  %v1796_v23 = vrot.slane %v1500_v54, 7  ;;  %v1499_v35 = vadd.f32 %v1487_v38, %v1475_v20  ;;  %v1474_v37 = vsel %vm1246_vm10, %v7637_v53, 0.0  ;;  %vm9191_vm10 = vmmov %vm9189_vm7 }
 0x28c   :  { %3419 = vrot.lane.b32.xlu1 %v1804_v18, %s5281_s26  ;;  %v1801_v0 = vrot.slane %v1502_v5, 7  ;;  %v1486_v63 = vsel %vm1234_vm9, %v7644_v19, 0.0  ;;  %vm1225_vm15 = vcmp.eq.f32.partialorder %v7655_v3, 3.0  ;;  %vm1227_vm13 = vcmp.eq.f32.partialorder %v7577_v22, 3.0  ;;  %vm9192_vm0 = vmmov %vm9191_vm10 }
 0x28d   :  { %3421 = vrot.lane.b32.xlu0 %v1829_v48, %s5281_s26  ;;  %v1798_v29 = vrot.slane %v1499_v35, 7  ;;  %v1498_v62 = vadd.f32 %v1486_v63, %v1474_v37  ;;  %v1441_v12 = vsel %vm1237_vm6, %v7653_v58, 0.0  ;;  %v1443_v7 = vsel %vm1239_vm4, %v7557_v10, 0.0 }
 0x28e   :  { %v1802_v43 = vsel %vm9191_vm10, %v1796_v23, %v1801_v0  ;;  %v1453_v41 = vsel %vm1225_vm15, %v7661_v52, 0.0  ;;  %v1455_v39 = vsel %vm1227_vm13, %v7561_v24, 0.0  ;;  %vm1224_vm7 = vcmp.eq.f32.partialorder %v7700_v30, 3.0 }
 0x28f   :  { %v1800_v51 = vsel %vm9192_vm0, %v1798_v29, %v1799_v6  ;;  %v1795_v45 = vrot.slane %v1498_v62, 7  ;;  %v1465_v56 = vadd.f32 %v1453_v41, %v1441_v12  ;;  %v1467_v17 = vadd.f32 %v1455_v39, %v1443_v7 }
 0x290   :  { %3415 = vrot.lane.b32.xlu1 %v1800_v51, %s5281_s26  ;;  %vm1226_vm6 = vcmp.eq.f32.partialorder %v7620_v49, 3.0  ;;  %v1440_v13 = vsel %vm1236_vm5, %v7673_v44, 0.0  ;;  %v1442_v15 = vsel %vm1238_vm2, %v7611_v28, 0.0  ;;  %v1452_v21 = vsel %vm1224_vm7, %v7675_v60, 0.0  ;;  %vm9193_vm5 = vmmov %vm9192_vm0 }
 0x291   :  { %3417 = vrot.lane.b32.xlu0 %v1802_v43, %s5281_s26  ;;  %v1797_v61 = vsel %vm9192_vm0, %v1795_v45, %v1796_v23  ;;  %v1767_v46 = vrot.slane %v1465_v56, 7  ;;  %v1771_v59 = vrot.slane %v1467_v17, 7  ;;  %v1454_v2 = vsel %vm1226_vm6, %v7626_v31, 0.0 }
 0x292   :  { %v1464_v50 = vadd.f32 %v1452_v21, %v1440_v13  ;;  %v1466_v8 = vadd.f32 %v1454_v2, %v1442_v15  ;;  %vm1223_vm4 = vcmp.eq.f32.partialorder %v7684_v26, 3.0  ;;  %v1439_v14 = vsel %vm1235_vm12, %v7640_v40, 0.0 }
 0x293   :  { %v1772_v11 = vsel %vm9193_vm5, %v1767_v46, %v1771_v59  ;;  %v1451_v32 = vsel %vm1223_vm4, %v7648_v27, 0.0  ;;  %vm1222_vm2 = vcmp.eq.f32.partialorder %v7687_v33, 3.0  ;;  %v1438_v1 = vsel %vm1234_vm9, %v7637_v53, 0.0  ;;  %vm9194_vm9 = vmmov %vm9192_vm0 }
 0x294   :  { %3411 = vrot.lane.b32.xlu1 %v1772_v11, %s5281_s26  ;;  %v1764_v48 = vrot.slane %v1464_v50, 7  ;;  %v1769_v6 = vrot.slane %v1466_v8, 7  ;;  %v1463_v57 = vadd.f32 %v1451_v32, %v1439_v14  ;;  %v1450_v55 = vsel %vm1222_vm2, %v7644_v19, 0.0 }
 0x295   :  { %3413 = vrot.lane.b32.xlu0 %v1797_v61, %s5281_s26  ;;  %v1462_v9 = vadd.f32 %v1450_v55, %v1438_v1  ;;  %vm1213_vm12 = vcmp.eq.f32.partialorder %v7655_v3, 2.0  ;;  %vm1215_vm10 = vcmp.eq.f32.partialorder %v7577_v22, 2.0  ;;  %v1405_v16 = vsel %vm1225_vm15, %v7653_v58, 0.0  ;;  %vm9195_vm15 = vmmov %vm9193_vm5 }
 0x296   :  { %v1770_v54 = vsel %vm9194_vm9, %v1764_v48, %v1769_v6  ;;  %v1766_v5 = vrot.slane %v1463_v57, 7  ;;  %v1407_v20 = vsel %vm1227_vm13, %v7557_v10, 0.0  ;;  %v1417_v38 = vsel %vm1213_vm12, %v7661_v52, 0.0  ;;  %vm9196_vm13 = vmmov %vm9194_vm9 }
 0x297   :  { %v1763_v18 = vrot.slane %v1462_v9, 7  ;;  %v1419_v23 = vsel %vm1215_vm10, %v7561_v24, 0.0  ;;  %v1429_v35 = vadd.f32 %v1417_v38, %v1405_v16  ;;  %vm1212_vm0 = vcmp.eq.f32.partialorder %v7700_v30, 2.0 }
 0x298   :  { %v1768_v37 = vsel %vm9195_vm15, %v1766_v5, %v1767_v46  ;;  %v1431_v0 = vadd.f32 %v1419_v23, %v1407_v20  ;;  %vm1214_vm5 = vcmp.eq.f32.partialorder %v7620_v49, 2.0  ;;  %v1404_v63 = vsel %vm1224_vm7, %v7673_v44, 0.0 }
 0x299   :  { %3409 = vrot.lane.b32.xlu0 %v1770_v54, %s5281_s26  ;;  %3407 = vrot.lane.b32.xlu1 %v1768_v37, %s5281_s26  ;;  %v1765_v29 = vsel %vm9196_vm13, %v1763_v18, %v1764_v48  ;;  %v1735_v62 = vrot.slane %v1429_v35, 7  ;;  %v1406_v12 = vsel %vm1226_vm6, %v7611_v28, 0.0  ;;  %v1416_v7 = vsel %vm1212_vm0, %v7675_v60, 0.0 }
 0x29a   :  { %v1739_v43 = vrot.slane %v1431_v0, 7  ;;  %v1418_v41 = vsel %vm1214_vm5, %v7626_v31, 0.0  ;;  %v1428_v39 = vadd.f32 %v1416_v7, %v1404_v63  ;;  %vm1211_vm7 = vcmp.eq.f32.partialorder %v7684_v26, 2.0 }
 0x29b   :  { %v1430_v51 = vadd.f32 %v1418_v41, %v1406_v12  ;;  %v1403_v45 = vsel %vm1223_vm4, %v7640_v40, 0.0  ;;  %v1415_v56 = vsel %vm1211_vm7, %v7648_v27, 0.0  ;;  %vm1210_vm6 = vcmp.eq.f32.partialorder %v7687_v33, 2.0 }
 0x29c   :  { %v1740_v17 = vsel %vm9194_vm9, %v1735_v62, %v1739_v43  ;;  %v1732_v13 = vrot.slane %v1428_v39, 7  ;;  %v1427_v15 = vadd.f32 %v1415_v56, %v1403_v45  ;;  %v1402_v21 = vsel %vm1222_vm2, %v7637_v53, 0.0  ;;  %vm9197_vm2 = vmmov %vm9194_vm9 }
 0x29d   :  { %3405 = vrot.lane.b32.xlu0 %v1765_v29, %s5281_s26  ;;  %3403 = vrot.lane.b32.xlu1 %v1740_v17, %s5281_s26  ;;  %v1737_v61 = vrot.slane %v1430_v51, 7  ;;  %v1414_v46 = vsel %vm1210_vm6, %v7644_v19, 0.0  ;;  %vm1201_vm4 = vcmp.eq.f32.partialorder %v7655_v3, 1.0  ;;  %vm1203_vm15 = vcmp.eq.f32.partialorder %v7577_v22, 1.0  ;;  %vm9198_vm9 = vmmov %vm9197_vm2 }
 0x29e   :  { %v1734_v59 = vrot.slane %v1427_v15, 7  ;;  %v1426_v2 = vadd.f32 %v1414_v46, %v1402_v21  ;;  %v1369_v50 = vsel %vm1213_vm12, %v7653_v58, 0.0  ;;  %v1371_v8 = vsel %vm1215_vm10, %v7557_v10, 0.0  ;;  %vm9199_vm10 = vmmov %vm9197_vm2 }
 0x29f   :  { %v1738_v14 = vsel %vm9197_vm2, %v1732_v13, %v1737_v61  ;;  %v1381_v11 = vsel %vm1201_vm4, %v7661_v52, 0.0  ;;  %v1383_v32 = vsel %vm1203_vm15, %v7561_v24, 0.0  ;;  %vm1200_vm13 = vcmp.eq.f32.partialorder %v7700_v30, 1.0 }
 0x2a0   :  { %v1736_v1 = vsel %vm9198_vm9, %v1734_v59, %v1735_v62  ;;  %v1731_v48 = vrot.slane %v1426_v2, 7  ;;  %v1393_v6 = vadd.f32 %v1381_v11, %v1369_v50  ;;  %v1395_v57 = vadd.f32 %v1383_v32, %v1371_v8 }
 0x2a1   :  { %3401 = vrot.lane.b32.xlu0 %v1738_v14, %s5281_s26  ;;  %3399 = vrot.lane.b32.xlu1 %v1736_v1, %s5281_s26  ;;  %vm1202_vm12 = vcmp.eq.f32.partialorder %v7620_v49, 1.0  ;;  %v1368_v55 = vsel %vm1212_vm0, %v7673_v44, 0.0  ;;  %v1370_v9 = vsel %vm1214_vm5, %v7611_v28, 0.0  ;;  %v1380_v16 = vsel %vm1200_vm13, %v7675_v60, 0.0  ;;  %vm9200_vm5 = vmmov %vm9197_vm2 }
 0x2a2   :  { %v1733_v54 = vsel %vm9199_vm10, %v1731_v48, %v1732_v13  ;;  %v1703_v5 = vrot.slane %v1393_v6, 7  ;;  %v1707_v20 = vrot.slane %v1395_v57, 7  ;;  %v1382_v38 = vsel %vm1202_vm12, %v7626_v31, 0.0 }
 0x2a3   :  { %v1392_v18 = vadd.f32 %v1380_v16, %v1368_v55  ;;  %v1394_v23 = vadd.f32 %v1382_v38, %v1370_v9  ;;  %vm1199_vm0 = vcmp.eq.f32.partialorder %v7684_v26, 1.0  ;;  %v1367_v35 = vsel %vm1211_vm7, %v7640_v40, 0.0 }
 0x2a4   :  { %v1708_v37 = vsel %vm9200_vm5, %v1703_v5, %v1707_v20  ;;  %v1379_v0 = vsel %vm1199_vm0, %v7648_v27, 0.0  ;;  %vm1198_vm2 = vcmp.eq.f32.partialorder %v7687_v33, 1.0  ;;  %v1366_v63 = vsel %vm1210_vm6, %v7637_v53, 0.0  ;;  %vm9201_vm6 = vmmov %vm9200_vm5 }
 0x2a5   :  { %3397 = vrot.lane.b32.xlu0 %v1733_v54, %s5281_s26  ;;  %3395 = vrot.lane.b32.xlu1 %v1708_v37, %s5281_s26  ;;  %v1700_v29 = vrot.slane %v1392_v18, 7  ;;  %v1705_v62 = vrot.slane %v1394_v23, 7  ;;  %v1391_v12 = vadd.f32 %v1379_v0, %v1367_v35  ;;  %v1378_v7 = vsel %vm1198_vm2, %v7644_v19, 0.0 }
 0x2a6   :  { %v1390_v43 = vadd.f32 %v1378_v7, %v1366_v63  ;;  %vm1189_vm7 = vcmp.eq.f32.partialorder %v7655_v3, 0.0  ;;  %vm1191_vm9 = vcmp.eq.f32.partialorder %v7577_v22, 0.0  ;;  %v1333_v41 = vsel %vm1201_vm4, %v7653_v58, 0.0  ;;  %vm9202_vm4 = vmmov %vm9200_vm5 }
 0x2a7   :  { %v1706_v39 = vsel %vm9201_vm6, %v1700_v29, %v1705_v62  ;;  %v1702_v51 = vrot.slane %v1391_v12, 7  ;;  %v1335_v45 = vsel %vm1203_vm15, %v7557_v10, 0.0  ;;  %v1345_v56 = vsel %vm1189_vm7, %v7661_v52, 0.0  ;;  %vm9203_vm15 = vmmov %vm9202_vm4 }
 0x2a8   :  { %v1699_v17 = vrot.slane %v1390_v43, 7  ;;  %v1347_v13 = vsel %vm1191_vm9, %v7561_v24, 0.0  ;;  %v1357_v15 = vadd.f32 %v1345_v56, %v1333_v41  ;;  %vm1188_vm10 = vcmp.eq.f32.partialorder %v7700_v30, 0.0  ;;  %vm9204_vm6 = vmmov %vm9202_vm4 }
 0x2a9   :  { %3393 = vrot.lane.b32.xlu0 %v1706_v39, %s5281_s26  ;;  %v1704_v21 = vsel %vm9202_vm4, %v1702_v51, %v1703_v5  ;;  %v1359_v61 = vadd.f32 %v1347_v13, %v1335_v45  ;;  %vm1190_vm5 = vcmp.eq.f32.partialorder %v7620_v49, 0.0  ;;  %v1332_v46 = vsel %vm1200_vm13, %v7673_v44, 0.0 }
 0x2aa   :  { %3391 = vrot.lane.b32.xlu1 %v1704_v21, %s5281_s26  ;;  %v1701_v59 = vsel %vm9203_vm15, %v1699_v17, %v1700_v29  ;;  %v1671_v2 = vrot.slane %v1357_v15, 7  ;;  %v1334_v50 = vsel %vm1202_vm12, %v7611_v28, 0.0  ;;  %v1344_v8 = vsel %vm1188_vm10, %v7675_v60, 0.0 }
 0x2ab   :  { %v1675_v14 = vrot.slane %v1359_v61, 7  ;;  %v1346_v11 = vsel %vm1190_vm5, %v7626_v31, 0.0  ;;  %v1356_v32 = vadd.f32 %v1344_v8, %v1332_v46  ;;  %vm1187_vm13 = vcmp.eq.f32.partialorder %v7684_v26, 0.0 }
 0x2ac   :  { %v1358_v1 = vadd.f32 %v1346_v11, %v1334_v50  ;;  %v1331_v48 = vsel %vm1199_vm0, %v7640_v40, 0.0  ;;  %v1343_v6 = vsel %vm1187_vm13, %v7648_v27, 0.0  ;;  %vm1186_vm12 = vcmp.eq.f32.partialorder %v7687_v33, 0.0 }
 0x2ad   :  { %3389 = vrot.lane.b32.xlu0 %v1701_v59, %s5281_s26  ;;  %v1676_v57 = vsel %vm9204_vm6, %v1671_v2, %v1675_v14  ;;  %v1668_v55 = vrot.slane %v1356_v32, 7  ;;  %v1355_v9 = vadd.f32 %v1343_v6, %v1331_v48  ;;  %v1330_v16 = vsel %vm1198_vm2, %v7637_v53, 0.0  ;;  %vm9205_vm2 = vmmov %vm9204_vm6 }
 0x2ae   :  { %3387 = vrot.lane.b32.xlu1 %v1676_v57, %s5281_s26  ;;  %v1673_v54 = vrot.slane %v1358_v1, 7  ;;  %v1342_v5 = vsel %vm1186_vm12, %v7644_v19, 0.0  ;;  %vm1285_vm0 = vcmp.eq.f32.partialorder %v7655_v3, 8.0  ;;  %vm1287_vm4 = vcmp.eq.f32.partialorder %v7577_v22, 8.0  ;;  %vm9206_vm6 = vmmov %vm9205_vm2 }
 0x2af   :  { %v1670_v20 = vrot.slane %v1355_v9, 7  ;;  %v1354_v38 = vadd.f32 %v1342_v5, %v1330_v16  ;;  %v1297_v18 = vsel %vm1189_vm7, %v7653_v58, 0.0  ;;  %v1299_v23 = vsel %vm1191_vm9, %v7557_v10, 0.0  ;;  %vm9207_vm9 = vmmov %vm9205_vm2 }
 0x2b0   :  { %v1674_v35 = vsel %vm9205_vm2, %v1668_v55, %v1673_v54  ;;  %v1309_v37 = vsel %vm1285_vm0, %v7661_v52, 0.0  ;;  %v1311_v0 = vsel %vm1287_vm4, %v7561_v24, 0.0  ;;  %vm1284_vm15 = vcmp.eq.f32.partialorder %v7700_v30, 8.0 }
 0x2b1   :  { %3385 = vrot.lane.b32.xlu0 %v1674_v35, %s5281_s26  ;;  %v1672_v63 = vsel %vm9206_vm6, %v1670_v20, %v1671_v2  ;;  %v1667_v29 = vrot.slane %v1354_v38, 7  ;;  %v1321_v62 = vadd.f32 %v1309_v37, %v1297_v18  ;;  %v1323_v12 = vadd.f32 %v1311_v0, %v1299_v23  ;;  %v2121_v38 = vpop.f32.mrf.mxu0 }
 0x2b2   :  { %3383 = vrot.lane.b32.xlu1 %v1672_v63, %s5281_s26  ;;  %vm1286_vm7 = vcmp.eq.f32.partialorder %v7620_v49, 8.0  ;;  %v1296_v7 = vsel %vm1188_vm10, %v7673_v44, 0.0  ;;  %v1298_v43 = vsel %vm1190_vm5, %v7611_v28, 0.0  ;;  %v1308_v41 = vsel %vm1284_vm15, %v7675_v60, 0.0  ;;  %vm9208_vm5 = vmmov %vm9205_vm2 }
 0x2b3   :  { %v1669_v39 = vsel %vm9207_vm9, %v1667_v29, %v1668_v55  ;;  %v1639_v51 = vrot.slane %v1321_v62, 7  ;;  %v1643_v45 = vrot.slane %v1323_v12, 7  ;;  %v1310_v56 = vsel %vm1286_vm7, %v7626_v31, 0.0 }
 0x2b4   :  { %v1320_v17 = vadd.f32 %v1308_v41, %v1296_v7  ;;  %v1322_v13 = vadd.f32 %v1310_v56, %v1298_v43  ;;  %vm1283_vm10 = vcmp.eq.f32.partialorder %v7684_v26, 8.0  ;;  %v1295_v15 = vsel %vm1187_vm13, %v7640_v40, 0.0  ;;  %vm9209_vm13 = vmmov %vm9208_vm5 }
 0x2b5   :  { %3381 = vrot.lane.b32.xlu0 %v1669_v39, %s5281_s26  ;;  %v1644_v21 = vsel %vm9208_vm5, %v1639_v51, %v1643_v45  ;;  %v1307_v61 = vsel %vm1283_vm10, %v7648_v27, 0.0  ;;  %vm1282_vm2 = vcmp.eq.f32.partialorder %v7687_v33, 8.0  ;;  %v1294_v46 = vsel %vm1186_vm12, %v7637_v53, 0.0 }
 0x2b6   :  { %3379 = vrot.lane.b32.xlu1 %v1644_v21, %s5281_s26  ;;  %v1636_v59 = vrot.slane %v1320_v17, 7  ;;  %v1641_v2 = vrot.slane %v1322_v13, 7  ;;  %v1319_v50 = vadd.f32 %v1307_v61, %v1295_v15  ;;  %v1306_v8 = vsel %vm1282_vm2, %v7644_v19, 0.0 }
 0x2b7   :  { %v1318_v14 = vadd.f32 %v1306_v8, %v1294_v46  ;;  %v1585_v11 = vsel %vm1285_vm0, %v7653_v58, 0.0  ;;  %v1587_v32 = vsel %vm1287_vm4, %v7557_v10, 0.0  ;;  %v1597_v1 = vsel %vm1273_vm8, %v7661_v52, 0.0  ;;  %vm9210_vm8 = vmmov %vm9208_vm5 }
 0x2b8   :  { %v1642_v48 = vsel %vm9209_vm13, %v1636_v59, %v1641_v2  ;;  %v1638_v6 = vrot.slane %v1319_v50, 7  ;;  %v1599_v57 = vsel %vm1275_vm11, %v7561_v24, 0.0  ;;  %v1609_v55 = vadd.f32 %v1597_v1, %v1585_v11  ;;  %vm9211_vm11 = vmmov %vm9208_vm5 }
 0x2b9   :  { %3377 = vrot.lane.b32.xlu0 %v1642_v48, %s5281_s26  ;;  %v1635_v9 = vrot.slane %v1318_v14, 7  ;;  %v1611_v58 = vadd.f32 %v1599_v57, %v1587_v32  ;;  %v1584_v10 = vsel %vm1284_vm15, %v7673_v44, 0.0  ;;  %v1586_v3 = vsel %vm1286_vm7, %v7611_v28, 0.0  ;;  %v1908_v28 = vld [vmem:[%s8861_s2 + $0x8] sm:$0xff] }
 0x2ba   :  { %v1640_v52 = vsel %vm9210_vm8, %v1638_v6, %v1639_v51  ;;  %v1895_v16 = vrot.slane %v1609_v55, 7  ;;  %v1596_v24 = vsel %vm1272_vm1, %v7675_v60, 0.0  ;;  %v1598_v22 = vsel %vm1274_vm3, %v7626_v31, 0.0  ;;  %v1907_v60 = vld [vmem:[%s8861_s2] sm:$0xff]  ;;  %vm9213_vm1 = vmmov %vm9208_vm5  ;;  %v2313_v51 = vpop.f32.mrf.mxu1 }
 0x2bb   :  { %3375 = vrot.lane.b32.xlu1 %v1640_v52, %s5281_s26  ;;  %v1637_v54 = vsel %vm9211_vm11, %v1635_v9, %v1636_v59  ;;  %v1899_v44 = vrot.slane %v1611_v58, 7  ;;  %v1608_v5 = vadd.f32 %v1596_v24, %v1584_v10  ;;  %v1610_v20 = vadd.f32 %v1598_v22, %v1586_v3  ;;  %vm9215_vm0 = vmmov %vm9213_vm1 }
 0x2bc   :  { %v1583_v49 = vsel %vm1283_vm10, %v7640_v40, 0.0  ;;  %v1595_v31 = vsel %vm1271_vm14, %v7648_v27, 0.0  ;;  %v1582_v30 = vsel %vm1282_vm2, %v7637_v53, 0.0  ;;  %vm9212_vm3 = vcmp.eq.f32.partialorder %v7687_v33, 7.0  ;;  %v2123_v40 = vpop.f32.mrf.mxu0  ;;  %vm9214_vm14 = vmmov %vm9213_vm1  ;;  %v8121_v33 = vld [vmem:[#allocation2] sm:$0xff]  ;;  %v2315_v13 = vpop.f32.mrf.mxu1 }
 0x2bd   :  { %v1594_v18 = vsel %vm9212_vm3, %v7644_v19, 0.0  ;;  %3373 = vrot.lane.b32.xlu0 %v1637_v54, %s5281_s26  ;;  %v1900_v23 = vsel %vm9213_vm1, %v1895_v16, %v1899_v44  ;;  %v1892_v35 = vrot.slane %v1608_v5, 7  ;;  %v1897_v37 = vrot.slane %v1610_v20, 7  ;;  %vm9216_vm4 = vmmov %vm9215_vm0 }
 0x2be   :  { %v1607_v0 = vadd.f32 %v1595_v31, %v1583_v49  ;;  %v1606_v63 = vadd.f32 %v1594_v18, %v1582_v30  ;;  %v8115_v29 = vand.u32 4294901760, %v1908_v28  ;;  %v8117_v27 = vand.u32 4294901760, %v1907_v60 }
 0x2bf   :  { %3443 = vrot.lane.b32.xlu1 %v1900_v23, %s5281_s26  ;;  %v1898_v53 = vsel %vm9214_vm14, %v1892_v35, %v1897_v37  ;;  %vm5282_vm12 = vmmov 0   ;;  %v2314_v17 = vadd.f32 %v2313_v51, %v2121_v38  ;;  %vm9217_vm15 = vcmask 130048  }
 0x2c0   :  { %v1894_v26 = vrot.slane %v1607_v0, 7  ;;  %4978 = vmatprep.mubr.msk.f32.mxu1 %vm5282_vm12, %v8121_v33  ;;  %v1891_v19 = vrot.slane %v1606_v63, 7  ;;  %4962 = vmatpush3.msra.mxu0 %v8115_v29  ;;  %v8127_v62 = vsub.f32 %v1908_v28, %v8115_v29  ;;  %v8130_v12 = vsub.f32 %v1907_v60, %v8117_v27  ;;  %vm9218_vm6 = vmmov %vm9217_vm15 }
 0x2c1   :  { %4965 = vmatprep.mubr.msk.f32.mxu0 %vm5282_vm12, %v8121_v33  ;;  %3441 = vrot.lane.b32.xlu0 %v1898_v53, %s5281_s26  ;;  %vm9219_vm7 = vcmask 7168   ;;  %vm9220_vm9 = vmmov %vm9218_vm6 }
 0x2c2   :  { %v1896_v7 = vsel %vm9215_vm0, %v1894_v26, %v1895_v16  ;;  %4963 = vmatprep.subr.mxu0 %v8121_v33  ;;  %v1893_v43 = vsel %vm9216_vm4, %v1891_v19, %v1892_v35  ;;  %v8139_v41 = vand.u32 4294901760, %v8127_v62  ;;  %v8142_v39 = vand.u32 4294901760, %v8130_v12  ;;  %vm9221_vm10 = vmmov %vm9219_vm7 }
 0x2c3   :  { %4964 = vmatpush3.msra.mxu0 %v8117_v27  ;;  %3439 = vrot.lane.b32.xlu1 %v1896_v7, %s5281_s26  ;;  %vm9222_vm5 = vmmov %vm9219_vm7 }
 0x2c4   :  { %4987 = vmatprep.subr.mxu0 %v8121_v33  ;;  %v2957_v45 = vsub.f32 %v8127_v62, %v8139_v41  ;;  %v2964_v56 = vsub.f32 %v8130_v12, %v8142_v39  ;;  %vm9223_vm2 = vmmov %vm9222_vm5 }
 0x2c5   :  { %3437 = vrot.lane.b32.xlu0 %v1893_v43, %s5281_s26  ;;  %vm9224_vm13 = vmmov %vm9223_vm2 }
 0x2c6   :  { %v8152_v15 = vand.u32 4294901760, %v2957_v45  ;;  %v8154_v21 = vand.u32 4294901760, %v2964_v56  ;;  %vm9225_vm8 = vmmov %vm9223_vm2 }
 0x2c7   :  { %vm9226_vm11 = vmmov %vm9223_vm2 }
 0x2c8   :  { %4975 = vmatpush3.msra.mxu1 %v8152_v15  ;;  %vm9227_vm3 = vmmov %vm9223_vm2 }
 0x2c9   :  { %4976 = vmatprep.subr.mxu1 %v8121_v33  ;;  %vm9228_vm1 = vmmov %vm9223_vm2 }
 0x2ca   :  { %4977 = vmatpush3.msra.mxu1 %v8154_v21  ;;  %vm9229_vm14 = vmmov %vm9228_vm1 }
 0x2cb   :  { %5000 = vmatprep.subr.mxu1 %v8121_v33  ;;  %vm9230_vm0 = vmmov %vm9228_vm1 }
 0x2cc   :  { %vm9231_vm4 = vmmov %vm9230_vm0 }
 0x2cf   :  { %v2136_v61 = vpop.f32.mrf.mxu0 }
 0x2d1   :  { %v2138_v46 = vpop.f32.mrf.mxu0 }
 0x2d4   :  { %v2151_v59 = vpop.f32.mrf.mxu0 }
 0x2d6   :  { %v2153_v2 = vpop.f32.mrf.mxu0 }
 0x2d8   :  { %v2320_v50 = vpop.f32.mrf.mxu1 }
 0x2d9   :  { %v2321_v43 = vadd.f32 %v2320_v50, %v2136_v61 }
 0x2da   :  { %v2437_v8 = vpop.f32.mrf.mxu0  ;;  %v2322_v14 = vpop.f32.mrf.mxu1 }
 0x2db   :  { %v2438_v26 = vadd.f32 %v2437_v8, %v2314_v17 }
 0x2dc   :  { %v2439_v11 = vpop.f32.mrf.mxu0 }
 0x2dd   :  { %v2327_v1 = vpop.f32.mrf.mxu1 }
 0x2de   :  { %v2328_v14 = vadd.f32 %v2327_v1, %v2151_v59 }
 0x2df   :  { %v2329_v6 = vpop.f32.mrf.mxu1 }
 0x2e0   :  { %v2446_v48 = vpop.f32.mrf.mxu0 }
 0x2e1   :  { %v2447_v13 = vadd.f32 %v2446_v48, %v2321_v43 }
 0x2e2   :  { %v2448_v57 = vpop.f32.mrf.mxu0 }
 0x2e4   :  { %v2455_v10 = vpop.f32.mrf.mxu0 }
 0x2e5   :  { %v2456_v8 = vadd.f32 %v2455_v10, %v2328_v14 }
 0x2e6   :  { %v2549_v9 = vpop.f32.mrf.mxu1  ;;  %v2457_v16 = vpop.f32.mrf.mxu0 }
 0x2e7   :  { %v2550_v51 = vadd.f32 %v2549_v9, %v2438_v26 }
 0x2e8   :  { %v2551_v3 = vpop.f32.mrf.mxu1 }
 0x2eb   :  { %v8160_v32 = vpop.permute.xlu1 %3435 }
 0x2ec   :  { %v2560_v22 = vpop.f32.mrf.mxu1 }
 0x2ed   :  { %v2561_v11 = vadd.f32 %v2560_v22, %v2447_v13 }
 0x2ee   :  { %v2562_v44 = vpop.f32.mrf.mxu1 }
 0x2f0   :  { %v8162_v55 = vpop.permute.xlu1 %3431  ;;  %v2571_v20 = vpop.f32.mrf.mxu1 }
 0x2f1   :  { %v2572_v48 = vadd.f32 %v2571_v20, %v2456_v8 }
 0x2f2   :  { %v2573_v60 = vpop.f32.mrf.mxu1 }
 0x2f3   :  { %v8164_v58 = vpop.permute.xlu0 %3433 }
 0x2f5   :  { %v8166_v52 = vpop.permute.xlu1 %3427 }
 0x2f7   :  { %v8168_v24 = vpop.permute.xlu0 %3429 }
 0x2fa   :  { %v8170_v54 = vpop.permute.xlu1 %3423 }
 0x2fb   :  { %v8172_v5 = vpop.permute.xlu0 %3425 }
 0x2fe   :  { %v8174_v38 = vpop.permute.xlu1 %3419 }
 0x2ff   :  { %v8176_v28 = vpop.permute.xlu0 %3421 }
 0x302   :  { %v8178_v49 = vpop.permute.xlu1 %3415 }
 0x303   :  { %v8180_v31 = vpop.permute.xlu0 %3417 }
 0x306   :  { %v8182_v30 = vpop.permute.xlu1 %3411 }
 0x307   :  { %v8184_v18 = vpop.permute.xlu0 %3413 }
 0x30b   :  { %v8186_v23 = vpop.permute.xlu0 %3409  ;;  %v8188_v35 = vpop.permute.xlu1 %3407 }
 0x30e   :  { %v2697_v40 = vpop.f32.mrf.mxu0 }
 0x30f   :  { %v8190_v37 = vpop.permute.xlu0 %3405  ;;  %v8192_v0 = vpop.permute.xlu1 %3403  ;;  %v2698_v46 = vadd.f32 %v2697_v40, %v2550_v51 }
 0x310   :  { %v2699_v53 = vpop.f32.mrf.mxu0 }
 0x311   :  { %v2801_v2 = vpop.f32.mrf.mxu1 }
 0x312   :  { %v2704_v7 = vpop.f32.mrf.mxu0  ;;  %v2802_v3 = vadd.f32 %v2801_v2, %v2698_v46 }
 0x313   :  { %v8194_v63 = vpop.permute.xlu0 %3401  ;;  %v8196_v19 = vpop.permute.xlu1 %3399  ;;  %v2705_v44 = vadd.f32 %v2704_v7, %v2561_v11  ;;  %v3459_v11 = vsel %vm9221_vm10, %v8168_v24, %v8162_v55  ;;  %v3458_v24 = vsel %vm9222_vm5, %v8172_v5, %v8166_v52  ;;  %v3457_v52 = vsel %vm9223_vm2, %v8176_v28, %v8170_v54  ;;  %vm9236_vm10 = vmmov %vm9230_vm0 }
 0x314   :  { %v2706_v56 = vpop.f32.mrf.mxu0  ;;  %v2803_v17 = vpop.f32.mrf.mxu1  ;;  %v2820_v61 = vsel %vm9217_vm15, %v2802_v3, 0  ;;  %v8253_v55 = vand.u32 4294901760, %v3459_v11  ;;  %v8272_v5 = vand.u32 4294901760, %v3458_v24  ;;  %v8285_v54 = vand.u32 4294901760, %v3457_v52  ;;  %vm9232_vm15 = vmmov %vm9230_vm0 }
 0x315   :  { %v8205_v9 = vand.u32 4294901760, %v2820_v61  ;;  %v3460_v56 = vsel %vm9219_vm7, %v8164_v58, %v8160_v32  ;;  %vm9234_vm7 = vmmov %vm9230_vm0  ;;  %vm4827_vm2 = vcmask 15360  }
 0x316   :  { %v2711_v57 = vpop.f32.mrf.mxu0  ;;  %v2808_v60 = vpop.f32.mrf.mxu1  ;;  %v8242_v3 = vand.u32 4294901760, %v3460_v56  ;;  %vm9237_vm5 = vmmov %vm9230_vm0 }
 0x317   :  { %v8198_v45 = vpop.permute.xlu0 %3397  ;;  %v8200_v6 = vpop.permute.xlu1 %3395  ;;  %v2809_v40 = vadd.f32 %v2808_v60, %v2705_v44  ;;  %v8208_v59 = vsub.f32 %v2820_v61, %v8205_v9  ;;  %4979 = vmatmul.mubr.f32.vlgmr.msra.gmra.mxu1 %v8205_v9  ;;  %v2712_v53 = vadd.f32 %v2711_v57, %v2572_v48 }
 0x318   :  { %v2713_v50 = vpop.f32.mrf.mxu0  ;;  %v2810_v1 = vpop.f32.mrf.mxu1  ;;  %4981 = vmatprep.mubr.msk.f32.mxu1 %vm5282_vm12, %v8121_v33  ;;  %5001 = vmatpush3.msra.mxu1 %v8115_v29  ;;  %v8266_v48 = vsub.f32 %v3460_v56, %v8242_v3 }
 0x319   :  { %v2823_v10 = vsel %vm9218_vm6, %v2809_v40, 0  ;;  %v2897_v20 = vand.u32 4294901760, %v8208_v59  ;;  %5002 = vmatprep.subr.mxu1 %v8121_v33  ;;  %v8276_v1 = vsub.f32 %v3459_v11, %v8253_v55  ;;  %vm9233_vm6 = vmmov %vm9230_vm0 }
 0x31a   :  { %v8220_v7 = vand.u32 4294901760, %v2823_v10  ;;  %v2815_v43 = vpop.f32.mrf.mxu1  ;;  %5003 = vmatpush3.msra.mxu1 %v8117_v27 }
 0x31b   :  { %v8202_v16 = vpop.permute.xlu0 %3393  ;;  %v2816_v51 = vadd.f32 %v2815_v43, %v2712_v53  ;;  %v2898_v13 = vsub.f32 %v8208_v59, %v2897_v20  ;;  %5026 = vmatprep.subr.mxu1 %v8121_v33  ;;  %v3456_v53 = vsel %vm9224_vm13, %v8180_v31, %v8174_v38  ;;  %v3612_v43 = vand.u32 4294901760, %v8266_v48 }
 0x31c   :  { %v8211_v22 = vpop.permute.xlu1 %3391  ;;  %v8229_v46 = vsub.f32 %v2823_v10, %v8220_v7  ;;  %v2817_v2 = vpop.f32.mrf.mxu1  ;;  %4982 = vmatmul.mubr.f32.gmra.mxu1 %v8220_v7  ;;  %v3455_v38 = vsel %vm9225_vm8, %v8184_v18, %v8178_v49  ;;  %v8299_v31 = vsub.f32 %v3458_v24, %v8272_v5  ;;  %v8978_v56 = vand.u32 4294901760, %v8276_v1 }
 0x31d   :  { %v2826_v14 = vsel %vm9220_vm9, %v2816_v51, 0  ;;  %4984 = vmatprep.mubr.msk.f32.mxu1 %vm5282_vm12, %v8121_v33  ;;  %v2899_v32 = vand.u32 4294901760, %v2898_v13  ;;  %v8301_v51 = vand.u32 4294901760, %v3456_v53  ;;  %v8309_v13 = vsub.f32 %v3457_v52, %v8285_v54  ;;  %vm9235_vm9 = vmmov %vm9230_vm0 }
 0x31e   :  { %v8239_v58 = vand.u32 4294901760, %v2826_v14  ;;  %v2907_v57 = vand.u32 4294901760, %v8229_v46  ;;  %v8311_v49 = vand.u32 4294901760, %v3455_v38  ;;  %v3454_v18 = vsel %vm9226_vm11, %v8186_v23, %v8182_v30 }
 0x31f   :  { %v8217_v26 = vpop.permute.xlu0 %3389  ;;  %4966 = vmatmul.mubr.f32.vlgmr.msra.gmra.mxu0 %v2899_v32  ;;  %v3613_v2 = vsub.f32 %v8266_v48, %v3612_v43  ;;  %v8323_v11 = vsub.f32 %v3456_v53, %v8301_v51  ;;  %v3453_v32 = vsel %vm9227_vm3, %v8190_v37, %v8188_v35  ;;  %v3620_v23 = vsub.f32 %v8276_v1, %v8978_v56 }
 0x320   :  { %v8244_v17 = vpop.permute.xlu1 %3387  ;;  %v8249_v44 = vsub.f32 %v2826_v14, %v8239_v58  ;;  %4985 = vmatmul.mubr.f32.gmra.mxu1 %v8239_v58  ;;  %v2908_v61 = vsub.f32 %v8229_v46, %v2907_v57  ;;  %4988 = vmatpush3.msra.mxu0 %v8127_v62  ;;  %v8976_v14 = vand.u32 4294901760, %v8299_v31  ;;  %v8971_v35 = vand.u32 4294901760, %v8309_v13 }
 0x321   :  { %4968 = vmatprep.mubr.msk.f32.mxu0 %vm5282_vm12, %v8121_v33  ;;  %5004 = vmatprep.mubr.msk.f32.mxu1 %vm5282_vm12, %v8121_v33  ;;  %v8343_v37 = vsub.f32 %v3455_v38, %v8311_v49  ;;  %v8351_v24 = vand.u32 4294901760, %v3453_v32  ;;  %v8973_v52 = vand.u32 4294901760, %v8323_v11  ;;  %v3621_v53 = vand.u32 4294901760, %v3620_v23 }
 0x322   :  { %v2909_v50 = vand.u32 4294901760, %v2908_v61  ;;  %4989 = vmatprep.subr.mxu0 %v8121_v33  ;;  %v2917_v60 = vand.u32 4294901760, %v8249_v44  ;;  %v8336_v61 = vand.u32 4294901760, %v3454_v18  ;;  %vm4830_vm13 = vcmask 9216  }
 0x323   :  { %v8246_v8 = vpop.permute.xlu0 %3385  ;;  %4990 = vmatpush3.msra.mxu0 %v8130_v12  ;;  %v8378_v38 = vsub.f32 %v3453_v32, %v8351_v24  ;;  %v3641_v23 = vsub.f32 %v8323_v11, %v8973_v52  ;;  %vm9268_vm8 = vcmask 130048  }
 0x324   :  { %4969 = vmatmul.mubr.f32.gmra.mxu0 %v2909_v50  ;;  %5005 = vmatmul.mubr.f32.vlgmr.msra.gmra.mxu1 %v2897_v20  ;;  %v2918_v40 = vsub.f32 %v8249_v44, %v2917_v60  ;;  %v8287_v28 = vpop.permute.xlu1 %3383  ;;  %v3614_v50 = vand.u32 4294901760, %v3613_v2  ;;  %v3450_v2 = vsel %vm9230_vm0, %v8202_v16, %v8200_v6  ;;  %v3449_v6 = vsel %vm9231_vm4, %v8217_v26, %v8211_v22  ;;  %vm9269_vm11 = vmmov %vm9268_vm8 }
 0x325   :  { %4971 = vmatprep.mubr.msk.f32.mxu0 %vm5282_vm12, %v8121_v33  ;;  %5007 = vmatprep.mubr.msk.f32.mxu1 %vm5282_vm12, %v8121_v33  ;;  %v3448_v26 = vsel %vm9232_vm15, %v8246_v8, %v8244_v17  ;;  %vm9270_vm3 = vmmov %vm9268_vm8 }
 0x326   :  { %v2919_v20 = vand.u32 4294901760, %v2918_v40  ;;  %5013 = vmatprep.subr.mxu0 %v8121_v33  ;;  %5027 = vmatpush3.msra.mxu1 %v8115_v29 }
 0x327   :  { %v8289_v10 = vpop.permute.xlu0 %3381  ;;  %5028 = vmatprep.subr.mxu1 %v8121_v33 }
 0x328   :  { %4972 = vmatmul.mubr.f32.gmra.mxu0 %v2919_v20  ;;  %5008 = vmatmul.mubr.f32.gmra.mxu1 %v2907_v57  ;;  %v8328_v57 = vpop.permute.xlu1 %3379  ;;  %v3634_v20 = vsub.f32 %v8309_v13, %v8971_v35  ;;  %v3447_v17 = vsel %vm9233_vm6, %v8289_v10, %v8287_v28 }
 0x329   :  { %4991 = vmatprep.mubr.msk.f32.mxu0 %vm5282_vm12, %v8121_v33  ;;  %5010 = vmatprep.mubr.msk.f32.mxu1 %vm5282_vm12, %v8121_v33 }
 0x32a   :  { %5029 = vmatpush3.msra.mxu1 %v8117_v27 }
 0x32b   :  { %3609 = vmatprep.subr.mxu1 %v8121_v33  ;;  %v8330_v30 = vpop.permute.xlu0 %3377 }
 0x32c   :  { %4992 = vmatmul.mubr.f32.vlgmr.msra.gmra.mxu0 %v8208_v59  ;;  %5011 = vmatmul.mubr.f32.gmra.mxu1 %v2917_v60  ;;  %v3452_v59 = vsel %vm9228_vm1, %v8194_v63, %v8192_v0  ;;  %v3627_v60 = vsub.f32 %v8299_v31, %v8976_v14  ;;  %v3451_v0 = vsel %vm9229_vm14, %v8198_v45, %v8196_v19  ;;  %v8972_v19 = vand.u32 4294901760, %v8343_v37 }
 0x32d   :  { %5014 = vmatpush3.msra.mxu0 %v8139_v41  ;;  %4994 = vmatprep.mubr.msk.f32.mxu0 %vm5282_vm12, %v8121_v33  ;;  %v8364_v63 = vsub.f32 %v3454_v18, %v8336_v61  ;;  %v8366_v40 = vand.u32 4294901760, %v3452_v59  ;;  %v3376_v45 = vpop.permute.xlu1 %3375  ;;  %v8380_v18 = vand.u32 4294901760, %v3451_v0  ;;  %v3446_v28 = vsel %vm9234_vm7, %v8330_v30, %v8328_v57 }
 0x32e   :  { %5030 = vmatprep.mubr.msk.f32.mxu1 %vm5282_vm12, %v8121_v33  ;;  %5015 = vmatprep.subr.mxu0 %v8121_v33  ;;  %v3648_v16 = vsub.f32 %v8343_v37, %v8972_v19 }
 0x32f   :  { %5016 = vmatpush3.msra.mxu0 %v8142_v39  ;;  %v8974_v32 = vand.u32 4294901760, %v8364_v63  ;;  %v8393_v35 = vsub.f32 %v3452_v59, %v8366_v40  ;;  %v8975_v59 = vand.u32 4294901760, %v8378_v38  ;;  %v8410_v22 = vsub.f32 %v3451_v0, %v8380_v18 }
 0x330   :  { %4995 = vmatmul.mubr.f32.gmra.mxu0 %v8229_v46  ;;  %5031 = vmatmul.mubr.f32.vlgmr.msra.gmra.mxu1 %v8205_v9  ;;  %v3374_v46 = vpop.permute.xlu0 %3373 }
 0x331   :  { %3615 = vmatpush1.msra.mxu1 %v3614_v50  ;;  %4997 = vmatprep.mubr.msk.f32.mxu0 %vm5282_vm12, %v8121_v33  ;;  %v3628_v50 = vand.u32 4294901760, %v3627_v60  ;;  %v3635_v60 = vand.u32 4294901760, %v3634_v20  ;;  %v3444_v19 = vpop.permute.xlu1 %3443  ;;  %v3642_v20 = vand.u32 4294901760, %v3641_v23  ;;  %v8977_v0 = vand.u32 4294901760, %v8393_v35 }
 0x332   :  { %3616 = vmatprep.subr.mxu1 %v8121_v33  ;;  %5033 = vmatprep.mubr.msk.f32.mxu1 %vm5282_vm12, %v8121_v33  ;;  %v3662_v23 = vsub.f32 %v8378_v38, %v8975_v59  ;;  %v8460_v59 = vand.u32 4294901760, %v3446_v28 }
 0x333   :  { %3622 = vmatpush1.msra.mxu1 %v3621_v53  ;;  %3481 = vmatprep.subr.mxu0 %v8121_v33  ;;  %v8416_v53 = vand.u32 4294901760, %v3449_v6 }
 0x334   :  { %3623 = vmatprep.subr.mxu1 %v8121_v33  ;;  %4998 = vmatmul.mubr.f32.gmra.mxu0 %v8249_v44  ;;  %v8404_v44 = vand.u32 4294901760, %v3450_v2  ;;  %v3442_v52 = vpop.permute.xlu0 %3441 }
 0x335   :  { %5034 = vmatmul.mubr.f32.gmra.mxu1 %v8220_v7  ;;  %5017 = vmatprep.mubr.msk.f32.mxu0 %vm5282_vm12, %v8121_v33  ;;  %v8444_v10 = vsub.f32 %v3449_v6, %v8416_v53 }
 0x336   :  { %3629 = vmatpush1.msra.mxu1 %v3628_v50  ;;  %5036 = vmatprep.mubr.msk.f32.mxu1 %vm5282_vm12, %v8121_v33  ;;  %v3655_v50 = vsub.f32 %v8364_v63, %v8974_v32  ;;  %v8429_v8 = vsub.f32 %v3450_v2, %v8404_v44  ;;  %v3675_v32 = vand.u32 4294901760, %v8410_v22  ;;  %v8446_v2 = vand.u32 4294901760, %v3447_v17 }
 0x337   :  { %3630 = vmatprep.subr.mxu1 %v8121_v33 }
 0x338   :  { %3636 = vmatpush1.msra.mxu1 %v3635_v60  ;;  %5018 = vmatmul.mubr.f32.vlgmr.msra.gmra.mxu0 %v8205_v9  ;;  %v8431_v60 = vand.u32 4294901760, %v3448_v26  ;;  %v3649_v9 = vand.u32 4294901760, %v3648_v16  ;;  %v3669_v16 = vsub.f32 %v8393_v35, %v8977_v0  ;;  %v3656_v57 = vand.u32 4294901760, %v3655_v50  ;;  %v3438_v14 = vpop.permute.xlu0 %3437 }
 0x339   :  { %3637 = vmatprep.subr.mxu1 %v8121_v33  ;;  %5037 = vmatmul.mubr.f32.gmra.mxu1 %v8239_v58  ;;  %v8980_v30 = vand.u32 4294901760, %v8429_v8  ;;  %v3663_v50 = vand.u32 4294901760, %v3662_v23  ;;  %v8471_v0 = vsub.f32 %v3447_v17, %v8446_v2  ;;  %v8484_v17 = vsub.f32 %v3446_v28, %v8460_v59 }
 0x33a   :  { %3483 = vmatpush1.msra.mxu0 %v8242_v3  ;;  %3643 = vmatpush1.msra.mxu1 %v3642_v20  ;;  %v3445_v20 = vsel %vm9235_vm9, %v3374_v46, %v3376_v45  ;;  %v8458_v6 = vsub.f32 %v3448_v26, %v8431_v60  ;;  %v3676_v45 = vsub.f32 %v8410_v22, %v3675_v32  ;;  %v8979_v26 = vand.u32 4294901760, %v8444_v10 }
 0x33b   :  { %3484 = vmatprep.subr.mxu0 %v8121_v33  ;;  %3644 = vmatprep.subr.mxu1 %v8121_v33  ;;  %v3462_v46 = vsel %vm9236_vm10, %v3442_v52, %v3444_v19  ;;  %v8473_v56 = vand.u32 4294901760, %v3445_v20  ;;  %v3670_v52 = vand.u32 4294901760, %v3669_v16  ;;  %v3683_v19 = vsub.f32 %v8429_v8, %v8980_v30 }
 0x33c   :  { %3486 = vmatpush1.msra.mxu0 %v8253_v55  ;;  %3650 = vmatpush1.msra.mxu1 %v3649_v9  ;;  %v3440_v9 = vpop.permute.xlu1 %3439  ;;  %v8981_v23 = vand.u32 4294901760, %v8458_v6  ;;  %v3690_v16 = vsub.f32 %v8444_v10, %v8979_v26 }
 0x33d   :  { %5020 = vmatprep.mubr.msk.f32.mxu0 %vm5282_vm12, %v8121_v33  ;;  %3487 = vmatprep.subr.mxu0 %v8121_v33  ;;  %v8498_v28 = vsub.f32 %v3445_v20, %v8473_v56  ;;  %v3684_v20 = vand.u32 4294901760, %v3683_v19 }
 0x33e   :  { %3651 = vmatprep.subr.mxu1 %v8121_v33  ;;  %5021 = vmatmul.mubr.f32.gmra.mxu0 %v8220_v7  ;;  %v3461_v7 = vsel %vm9237_vm5, %v3438_v14, %v3440_v9  ;;  %v3677_v14 = vand.u32 4294901760, %v3676_v45  ;;  %v8982_v9 = vand.u32 4294901760, %v8471_v0  ;;  %v3710_v45 = vand.u32 4294901760, %v8484_v17 }
 0x33f   :  { %3489 = vmatpush1.msra.mxu0 %v8272_v5  ;;  %3657 = vmatpush1.msra.mxu1 %v3656_v57  ;;  %v8486_v57 = vand.u32 4294901760, %v3462_v46  ;;  %v3717_v30 = vand.u32 4294901760, %v8498_v28 }
 0x340   :  { %3490 = vmatprep.subr.mxu0 %v8121_v33  ;;  %3658 = vmatprep.subr.mxu1 %v8121_v33  ;;  %v3711_v19 = vsub.f32 %v8484_v17, %v3710_v45 }
 0x341   :  { %3492 = vmatpush1.msra.mxu0 %v8285_v54  ;;  %3664 = vmatpush1.msra.mxu1 %v3663_v50  ;;  %v8500_v50 = vand.u32 4294901760, %v3461_v7  ;;  %v8510_v26 = vsub.f32 %v3462_v46, %v8486_v57  ;;  %v3691_v46 = vand.u32 4294901760, %v3690_v16 }
 0x342   :  { %5023 = vmatprep.mubr.msk.f32.mxu0 %vm5282_vm12, %v8121_v33  ;;  %3493 = vmatprep.subr.mxu0 %v8121_v33 }
 0x343   :  { %3665 = vmatprep.subr.mxu1 %v8121_v33  ;;  %5024 = vmatmul.mubr.f32.gmra.mxu0 %v8239_v58  ;;  %v3697_v58 = vsub.f32 %v8458_v6, %v8981_v23  ;;  %v8520_v23 = vsub.f32 %v3461_v7, %v8500_v50  ;;  %v3718_v7 = vsub.f32 %v8498_v28, %v3717_v30 }
 0x344   :  { %3495 = vmatpush1.msra.mxu0 %v8301_v51  ;;  %3671 = vmatpush1.msra.mxu1 %v3670_v52  ;;  %v3704_v52 = vsub.f32 %v8471_v0, %v8982_v9 }
 0x345   :  { %3496 = vmatprep.subr.mxu0 %v8121_v33  ;;  %3672 = vmatprep.subr.mxu1 %v8121_v33  ;;  %v3698_v9 = vand.u32 4294901760, %v3697_v58  ;;  %v3759_v16 = vand.u32 4294901760, %v8520_v23 }
 0x346   :  { %3498 = vmatpush1.msra.mxu0 %v8311_v49  ;;  %3678 = vmatpush1.msra.mxu1 %v3677_v14  ;;  %v3752_v14 = vand.u32 4294901760, %v8510_v26 }
 0x347   :  { %3499 = vmatprep.subr.mxu0 %v8121_v33  ;;  %3679 = vmatprep.subr.mxu1 %v8121_v33 }
 0x348   :  { %3501 = vmatpush1.msra.mxu0 %v8336_v61  ;;  %3685 = vmatpush1.msra.mxu1 %v3684_v20  ;;  %v3705_v20 = vand.u32 4294901760, %v3704_v52  ;;  %v3753_v58 = vsub.f32 %v8510_v26, %v3752_v14  ;;  %v3719_v52 = vand.u32 4294901760, %v3718_v7  ;;  %v9238_v7 = vld [vmem:[#allocation12_spill] sm:$0xff] }
 0x349   :  { %3502 = vmatprep.subr.mxu0 %v8121_v33  ;;  %3686 = vmatprep.subr.mxu1 %v8121_v33 }
 0x34a   :  { %3504 = vmatpush1.msra.mxu0 %v8351_v24  ;;  %3692 = vmatpush1.msra.mxu1 %v3691_v46  ;;  %v3712_v46 = vand.u32 4294901760, %v3711_v19  ;;  %v3754_v19 = vand.u32 4294901760, %v3753_v58  ;;  %v9239_v58 = vld [vmem:[#allocation38_spill] sm:$0xff] }
 0x34b   :  { %3505 = vmatprep.subr.mxu0 %v8121_v33  ;;  %3693 = vmatprep.subr.mxu1 %v8121_v33 }
 0x34c   :  { %3507 = vmatpush1.msra.mxu0 %v8366_v40  ;;  %3699 = vmatpush1.msra.mxu1 %v3698_v9  ;;  %v3760_v9 = vsub.f32 %v8520_v23, %v3759_v16 }
 0x34d   :  { %3508 = vmatprep.subr.mxu0 %v8121_v33  ;;  %3700 = vmatprep.subr.mxu1 %v8121_v33 }
 0x34e   :  { %3510 = vmatpush1.msra.mxu0 %v8380_v18  ;;  %3706 = vmatpush1.msra.mxu1 %v3705_v20  ;;  %v3761_v20 = vand.u32 4294901760, %v3760_v9  ;;  %v9241_v9 = vld [vmem:[#allocation54_spill] sm:$0xff] }
 0x34f   :  { %3511 = vmatprep.subr.mxu0 %v8121_v33  ;;  %3707 = vmatprep.subr.mxu1 %v8121_v33 }
 0x350   :  { %3513 = vmatpush1.msra.mxu0 %v8404_v44  ;;  %3713 = vmatpush1.msra.mxu1 %v3712_v46  ;;  %v9240_v46 = vld [vmem:[#allocation40_spill] sm:$0xff] }
 0x351   :  { %3514 = vmatprep.subr.mxu0 %v8121_v33  ;;  %3714 = vmatprep.subr.mxu1 %v8121_v33 }
 0x352   :  { %3516 = vmatpush1.msra.mxu0 %v8416_v53  ;;  %3720 = vmatpush1.msra.mxu1 %v3719_v52  ;;  %v9242_v52 = vld [vmem:[#allocation11_spill] sm:$0xff] }
 0x353   :  { %3517 = vmatprep.subr.mxu0 %v8121_v33  ;;  %3749 = vmatprep.subr.mxu1 %v8121_v33 }
 0x354   :  { %3519 = vmatpush1.msra.mxu0 %v8431_v60  ;;  %3755 = vmatpush2.msra.mxu1 %v3754_v19  ;;  %v9243_v19 = vld [vmem:[#allocation34_spill] sm:$0xff] }
 0x355   :  { %3520 = vmatprep.subr.mxu0 %v8121_v33  ;;  %3756 = vmatprep.subr.mxu1 %v8121_v33 }
 0x356   :  { %3522 = vmatpush1.msra.mxu0 %v8446_v2  ;;  %3762 = vmatpush2.msra.mxu1 %v3761_v20  ;;  %v9244_v20 = vld [vmem:[#allocation57_spill] sm:$0xff] }
 0x357   :  { %3523 = vmatprep.subr.mxu0 %v8121_v33  ;;  %3764 = vmatprep.mubr.f32.mxu1 %v9157_v4 }
 0x358   :  { %3913 = vmatprep.subr.mxu1 %v8121_v33  ;;  %3525 = vmatpush1.msra.mxu0 %v8460_v59 }
 0x359   :  { %3766 = vmatmul.mubr.f32.vlgmr.msra.gmra.mxu1 %v9158_v42  ;;  %3526 = vmatprep.subr.mxu0 %v8121_v33 }
 0x35a   :  { %3915 = vmatpush1.msra.mxu1 %v8242_v3  ;;  %3528 = vmatpush1.msra.mxu0 %v8473_v56 }
 0x35b   :  { %3916 = vmatprep.subr.mxu1 %v8121_v33  ;;  %3557 = vmatprep.subr.mxu0 %v8121_v33 }
 0x35c   :  { %3918 = vmatpush1.msra.mxu1 %v8253_v55  ;;  %3559 = vmatpush2.msra.mxu0 %v8486_v57 }
 0x35d   :  { %3919 = vmatprep.subr.mxu1 %v8121_v33  ;;  %3560 = vmatprep.subr.mxu0 %v8121_v33 }
 0x35e   :  { %3921 = vmatpush1.msra.mxu1 %v8272_v5  ;;  %3562 = vmatpush2.msra.mxu0 %v8500_v50 }
 0x35f   :  { %3922 = vmatprep.subr.mxu1 %v8121_v33  ;;  %3568 = vmatprep.mubr.f32.mxu0 %v9238_v7  ;;  %v9245_v7 = vld [vmem:[#allocation58_spill] sm:$0xff] }
 0x360   :  { %3924 = vmatpush1.msra.mxu1 %v8285_v54  ;;  %3574 = vmatmul.mubr.f32.vlgmr.msra.gmra.mxu0 %v9239_v58  ;;  %v9247_v58 = vld [vmem:[#allocation32_spill] sm:$0xff] }
 0x361   :  { %3785 = vmatprep.subr.mxu0 %v8121_v33  ;;  %3925 = vmatprep.subr.mxu1 %v8121_v33 }
 0x362   :  { %3788 = vmatpush1.msra.mxu0 %v8266_v48  ;;  %3927 = vmatpush1.msra.mxu1 %v8301_v51  ;;  %v9251_v48 = vld [vmem:[#allocation36_spill] sm:$0xff] }
 0x363   :  { %3789 = vmatprep.subr.mxu0 %v8121_v33  ;;  %3928 = vmatprep.subr.mxu1 %v8121_v33 }
 0x364   :  { %3792 = vmatpush1.msra.mxu0 %v8276_v1  ;;  %3930 = vmatpush1.msra.mxu1 %v8311_v49 }
 0x365   :  { %3793 = vmatprep.subr.mxu0 %v8121_v33  ;;  %3931 = vmatprep.subr.mxu1 %v8121_v33 }
 0x366   :  { %3796 = vmatpush1.msra.mxu0 %v8299_v31  ;;  %3933 = vmatpush1.msra.mxu1 %v8336_v61 }
 0x367   :  { %3797 = vmatprep.subr.mxu0 %v8121_v33  ;;  %3934 = vmatprep.subr.mxu1 %v8121_v33 }
 0x368   :  { %3800 = vmatpush1.msra.mxu0 %v8309_v13  ;;  %3936 = vmatpush1.msra.mxu1 %v8351_v24 }
 0x369   :  { %3801 = vmatprep.subr.mxu0 %v8121_v33  ;;  %3937 = vmatprep.subr.mxu1 %v8121_v33 }
 0x36a   :  { %3804 = vmatpush1.msra.mxu0 %v8323_v11  ;;  %3939 = vmatpush1.msra.mxu1 %v8366_v40 }
 0x36b   :  { %3805 = vmatprep.subr.mxu0 %v8121_v33  ;;  %3940 = vmatprep.subr.mxu1 %v8121_v33 }
 0x36c   :  { %3808 = vmatpush1.msra.mxu0 %v8343_v37  ;;  %3942 = vmatpush1.msra.mxu1 %v8380_v18 }
 0x36d   :  { %3809 = vmatprep.subr.mxu0 %v8121_v33  ;;  %3943 = vmatprep.subr.mxu1 %v8121_v33 }
 0x36e   :  { %3812 = vmatpush1.msra.mxu0 %v8364_v63  ;;  %3945 = vmatpush1.msra.mxu1 %v8404_v44 }
 0x36f   :  { %3813 = vmatprep.subr.mxu0 %v8121_v33  ;;  %3946 = vmatprep.subr.mxu1 %v8121_v33 }
 0x370   :  { %3816 = vmatpush1.msra.mxu0 %v8378_v38  ;;  %3948 = vmatpush1.msra.mxu1 %v8416_v53 }
 0x371   :  { %3817 = vmatprep.subr.mxu0 %v8121_v33  ;;  %3949 = vmatprep.subr.mxu1 %v8121_v33 }
 0x372   :  { %3820 = vmatpush1.msra.mxu0 %v8393_v35  ;;  %3951 = vmatpush1.msra.mxu1 %v8431_v60 }
 0x373   :  { %3821 = vmatprep.subr.mxu0 %v8121_v33  ;;  %3952 = vmatprep.subr.mxu1 %v8121_v33 }
 0x374   :  { %3824 = vmatpush1.msra.mxu0 %v8410_v22  ;;  %3954 = vmatpush1.msra.mxu1 %v8446_v2 }
 0x375   :  { %3771 = vmatprep.mubr.f32.mxu1 %v6669_v25  ;;  %3825 = vmatprep.subr.mxu0 %v8121_v33 }
 0x376   :  { %3955 = vmatprep.subr.mxu1 %v8121_v33  ;;  %3773 = vmatmul.mubr.f32.gmra.mxu1 %v9163_v34 }
 0x377   :  { %3828 = vmatpush1.msra.mxu0 %v8429_v8  ;;  %3957 = vmatpush1.msra.mxu1 %v8460_v59 }
 0x378   :  { %3829 = vmatprep.subr.mxu0 %v8121_v33  ;;  %3958 = vmatprep.subr.mxu1 %v8121_v33 }
 0x379   :  { %3832 = vmatpush1.msra.mxu0 %v8444_v10  ;;  %3960 = vmatpush1.msra.mxu1 %v8473_v56 }
 0x37a   :  { %3778 = vmatprep.mubr.f32.mxu1 %v9165_v47  ;;  %3833 = vmatprep.subr.mxu0 %v8121_v33 }
 0x37b   :  { %3989 = vmatprep.subr.mxu1 %v8121_v33  ;;  %3780 = vmatmul.mubr.f32.gmra.mxu1 %v9170_v36 }
 0x37c   :  { %3836 = vmatpush1.msra.mxu0 %v8458_v6  ;;  %3991 = vmatpush2.msra.mxu1 %v8486_v57 }
 0x37d   :  { %3583 = vmatprep.mubr.f32.mxu0 %v9240_v46  ;;  %3837 = vmatprep.subr.mxu0 %v8121_v33  ;;  %v9256_v46 = vld [vmem:[#allocation51_spill] sm:$0xff] }
 0x37e   :  { %3992 = vmatprep.subr.mxu1 %v8121_v33  ;;  %3589 = vmatmul.mubr.f32.gmra.mxu0 %v9241_v9  ;;  %v9259_v9 = vld [vmem:[#allocation53_spill] sm:$0xff] }
 0x37f   :  { %3840 = vmatpush1.msra.mxu0 %v8471_v0  ;;  %3994 = vmatpush2.msra.mxu1 %v8500_v50 }
 0x380   :  { %3841 = vmatprep.subr.mxu0 %v8121_v33  ;;  %3998 = vmatprep.mubr.f32.mxu1 %v9242_v52 }
 0x381   :  { %4169 = vmatprep.subr.mxu1 %v8121_v33  ;;  %3844 = vmatpush1.msra.mxu0 %v8484_v17 }
 0x382   :  { %4002 = vmatmul.mubr.f32.vlgmr.msra.gmra.mxu1 %v9243_v19  ;;  %3598 = vmatprep.mubr.f32.mxu0 %v9244_v20 }
 0x383   :  { %4171 = vmatpush1.msra.mxu1 %v8242_v3  ;;  %3845 = vmatprep.subr.mxu0 %v8121_v33  ;;  %v9246_v3 = vld [vmem:[#allocation10_spill] sm:$0xff] }
 0x384   :  { %4172 = vmatprep.subr.mxu1 %v8121_v33  ;;  %3604 = vmatmul.mubr.f32.gmra.mxu0 %v9245_v7 }
 0x385   :  { %3848 = vmatpush1.msra.mxu0 %v8498_v28  ;;  %4174 = vmatpush1.msra.mxu1 %v8253_v55  ;;  %v9248_v55 = vld [vmem:[#allocation33_spill] sm:$0xff] }
 0x386   :  { %3877 = vmatprep.subr.mxu0 %v8121_v33  ;;  %4175 = vmatprep.subr.mxu1 %v8121_v33 }
 0x387   :  { %3880 = vmatpush2.msra.mxu0 %v8510_v26  ;;  %4177 = vmatpush1.msra.mxu1 %v8272_v5  ;;  %v9249_v5 = vand.u32 4294901760, %v8276_v1  ;;  %v9254_v1 = vld [vmem:[#allocation49_spill] sm:$0xff] }
 0x388   :  { %3881 = vmatprep.subr.mxu0 %v8121_v33  ;;  %4178 = vmatprep.subr.mxu1 %v8121_v33 }
 0x389   :  { %3884 = vmatpush2.msra.mxu0 %v8520_v23  ;;  %3887 = vmatprep.mubr.f32.mxu0 %v9246_v3 }
 0x38a   :  { %4180 = vmatpush1.msra.mxu1 %v8285_v54  ;;  %3890 = vmatmul.mubr.f32.vlgmr.msra.gmra.mxu0 %v9247_v58  ;;  %v9250_v54 = vld [vmem:[#allocation42_spill] sm:$0xff] }
 0x38b   :  { %4029 = vmatprep.subr.mxu0 %v8121_v33  ;;  %4181 = vmatprep.subr.mxu1 %v8121_v33 }
 0x38c   :  { %4033 = vmatpush1.msra.mxu0 %v3612_v43  ;;  %4183 = vmatpush1.msra.mxu1 %v8301_v51  ;;  %v9252_v43 = vand.u32 4294901760, %v8299_v31  ;;  %v9253_v51 = vld [vmem:[#allocation48_spill] sm:$0xff] }
 0x38d   :  { %4034 = vmatprep.subr.mxu0 %v8121_v33  ;;  %4184 = vmatprep.subr.mxu1 %v8121_v33  ;;  %v9257_v31 = vld [vmem:[#allocation52_spill] sm:$0xff] }
 0x38e   :  { %3896 = vmatprep.mubr.f32.mxu0 %v9248_v55  ;;  %4038 = vmatpush1.msra.mxu0 %v9249_v5 }
 0x38f   :  { %4186 = vmatpush1.msra.mxu1 %v8311_v49  ;;  %3899 = vmatmul.mubr.f32.gmra.mxu0 %v9250_v54  ;;  %v9255_v49 = vand.u32 4294901760, %v8309_v13  ;;  %v9260_v13 = vand.u32 4294901760, %v8343_v37  ;;  %v9263_v37 = vand.u32 4294901760, %v8393_v35  ;;  %v9265_v35 = vand.u32 4294901760, %v8444_v10 }
 0x390   :  { %4039 = vmatprep.subr.mxu0 %v8121_v33  ;;  %4187 = vmatprep.subr.mxu1 %v8121_v33 }
 0x391   :  { %4009 = vmatprep.mubr.f32.mxu1 %v9251_v48  ;;  %4043 = vmatpush1.msra.mxu0 %v9252_v43 }
 0x392   :  { %4189 = vmatpush1.msra.mxu1 %v8336_v61  ;;  %4044 = vmatprep.subr.mxu0 %v8121_v33  ;;  %v9258_v61 = vand.u32 4294901760, %v8323_v11  ;;  %v9261_v11 = vand.u32 4294901760, %v8364_v63  ;;  %v9264_v63 = vand.u32 4294901760, %v8429_v8 }
 0x393   :  { %4013 = vmatmul.mubr.f32.gmra.mxu1 %v9253_v51  ;;  %4190 = vmatprep.subr.mxu1 %v8121_v33 }
 0x394   :  { %3905 = vmatprep.mubr.f32.mxu0 %v9254_v1  ;;  %4048 = vmatpush1.msra.mxu0 %v9255_v49 }
 0x395   :  { %4192 = vmatpush1.msra.mxu1 %v8351_v24  ;;  %3908 = vmatmul.mubr.f32.gmra.mxu0 %v9256_v46  ;;  %v9262_v24 = vand.u32 4294901760, %v8378_v38  ;;  %v8736_v38 = vld [vmem:[#allocation2] sm:$0xff] }
 0x396   :  { %4049 = vmatprep.subr.mxu0 %v8121_v33  ;;  %4193 = vmatprep.subr.mxu1 %v8121_v33 }
 0x397   :  { %4020 = vmatprep.mubr.f32.mxu1 %v9257_v31  ;;  %4053 = vmatpush1.msra.mxu0 %v9258_v61 }
 0x398   :  { %4195 = vmatpush1.msra.mxu1 %v8366_v40  ;;  %4054 = vmatprep.subr.mxu0 %v8121_v33  ;;  %v9266_v40 = vand.u32 4294901760, %v8458_v6 }
 0x399   :  { %4024 = vmatmul.mubr.f32.gmra.mxu1 %v9259_v9  ;;  %4196 = vmatprep.subr.mxu1 %v8121_v33 }
 0x39a   :  { %4058 = vmatpush1.msra.mxu0 %v9260_v13  ;;  %4198 = vmatpush1.msra.mxu1 %v8380_v18  ;;  %v9267_v18 = vand.u32 4294901760, %v8471_v0 }
 0x39b   :  { %4059 = vmatprep.subr.mxu0 %v8121_v33  ;;  %4199 = vmatprep.subr.mxu1 %v8121_v33 }
 0x39c   :  { %4063 = vmatpush1.msra.mxu0 %v9261_v11  ;;  %4201 = vmatpush1.msra.mxu1 %v8404_v44 }
 0x39d   :  { %4064 = vmatprep.subr.mxu0 %v8121_v33  ;;  %4202 = vmatprep.subr.mxu1 %v8121_v33 }
 0x39e   :  { %4068 = vmatpush1.msra.mxu0 %v9262_v24  ;;  %4204 = vmatpush1.msra.mxu1 %v8416_v53 }
 0x39f   :  { %4069 = vmatprep.subr.mxu0 %v8121_v33  ;;  %4205 = vmatprep.subr.mxu1 %v8121_v33 }
 0x3a0   :  { %4073 = vmatpush1.msra.mxu0 %v9263_v37  ;;  %4207 = vmatpush1.msra.mxu1 %v8431_v60 }
 0x3a1   :  { %4074 = vmatprep.subr.mxu0 %v8121_v33  ;;  %4208 = vmatprep.subr.mxu1 %v8121_v33 }
 0x3a2   :  { %4078 = vmatpush1.msra.mxu0 %v3675_v32  ;;  %4210 = vmatpush1.msra.mxu1 %v8446_v2 }
 0x3a3   :  { %4079 = vmatprep.subr.mxu0 %v8121_v33  ;;  %4211 = vmatprep.subr.mxu1 %v8121_v33 }
 0x3a4   :  { %4083 = vmatpush1.msra.mxu0 %v9264_v63  ;;  %4213 = vmatpush1.msra.mxu1 %v8460_v59 }
 0x3a5   :  { %4084 = vmatprep.subr.mxu0 %v8121_v33  ;;  %4214 = vmatprep.subr.mxu1 %v8121_v33 }
 0x3a6   :  { %4088 = vmatpush1.msra.mxu0 %v9265_v35  ;;  %4216 = vmatpush1.msra.mxu1 %v8473_v56 }
 0x3a7   :  { %4089 = vmatprep.subr.mxu0 %v8121_v33  ;;  %4245 = vmatprep.subr.mxu1 %v8121_v33 }
 0x3a8   :  { %4093 = vmatpush1.msra.mxu0 %v9266_v40  ;;  %4247 = vmatpush2.msra.mxu1 %v8486_v57 }
 0x3a9   :  { %4094 = vmatprep.subr.mxu0 %v8121_v33  ;;  %4248 = vmatprep.subr.mxu1 %v8736_v38 }
 0x3aa   :  { %4098 = vmatpush1.msra.mxu0 %v9267_v18  ;;  %4250 = vmatpush2.msra.mxu1 %v8500_v50 }
 0x3ab   :  { %4099 = vmatprep.subr.mxu0 %v8736_v38  ;;  %4148 = vmatprep.mubr.f32.mxu0 %v9157_v4 }
 0x3ac   :  { %4103 = vmatpush1.msra.mxu0 %v3710_v45  ;;  %4252 = vmatprep.mubr.f32.mxu1 %v9157_v4 }
 0x3ad   :  { %4104 = vmatprep.subr.mxu0 %v8736_v38  ;;  %4254 = vmatmul.mubr.f32.vlgmr.msra.gmra.mxu1 %v9158_v42 }
 0x3ae   :  { %4108 = vmatpush1.msra.mxu0 %v3717_v30  ;;  %4259 = vmatprep.mubr.f32.mxu1 %v6669_v25 }
 0x3af   :  { %4137 = vmatprep.subr.mxu0 %v8736_v38  ;;  %5052 = vmatprep.subr.mxu1 %v8736_v38 }
 0x3b0   :  { %4141 = vmatpush2.msra.mxu0 %v3752_v14  ;;  %5053 = vmatpush3.msra.mxu1 %v8152_v15 }
 0x3b1   :  { %4142 = vmatprep.subr.mxu0 %v8736_v38  ;;  %4261 = vmatmul.mubr.f32.gmra.mxu1 %v9163_v34 }
 0x3b2   :  { %4146 = vmatpush2.msra.mxu0 %v3759_v16  ;;  %4266 = vmatprep.mubr.f32.mxu1 %v9165_v47 }
 0x3b3   :  { %4150 = vmatmul.mubr.f32.vlgmr.msra.gmra.mxu0 %v9158_v42  ;;  %5039 = vmatprep.subr.mxu0 %v8736_v38 }
 0x3b4   :  { %4155 = vmatprep.mubr.f32.mxu0 %v6669_v25  ;;  %5040 = vmatpush3.msra.mxu0 %v8115_v29 }
 0x3b5   :  { %4268 = vmatmul.mubr.f32.gmra.mxu1 %v9170_v36  ;;  %5054 = vmatprep.subr.mxu1 %v8736_v38 }
 0x3b6   :  { %5055 = vmatpush3.msra.mxu1 %v8154_v21  ;;  %5056 = vmatprep.mubr.msk.f32.mxu1 %vm5282_vm12, %v8736_v38 }
 0x3b7   :  { %4157 = vmatmul.mubr.f32.gmra.mxu0 %v9163_v34  ;;  %5041 = vmatprep.subr.mxu0 %v8736_v38 }
 0x3b8   :  { %4162 = vmatprep.mubr.f32.mxu0 %v9165_v47  ;;  %5042 = vmatpush3.msra.mxu0 %v8117_v27 }
 0x3b9   :  { %5065 = vmatprep.subr.mxu0 %v8736_v38  ;;  %5078 = vmatprep.subr.mxu1 %v8736_v38 }
 0x3bb   :  { %4164 = vmatmul.mubr.f32.gmra.mxu0 %v9170_v36 }
 0x3bc   :  { %5043 = vmatprep.mubr.msk.f32.mxu0 %vm5282_vm12, %v8736_v38 }
 0x3d7   :  { %v3002_v25 = vpop.f32.mrf.mxu1 }
 0x3d9   :  { %v4980_v4 = vpop.f32.mrf.mxu1 }
 0x3dc   :  { %v3008_v42 = vpop.f32.mrf.mxu1 }
 0x3de   :  { %v4983_v33 = vpop.f32.mrf.mxu1 }
 0x3df   :  { %v2901_v34 = vpop.f32.mrf.mxu0 }
 0x3e0   :  { %v3014_v15 = vpop.f32.mrf.mxu1  ;;  %v3003_v26 = vadd.f32 %v3002_v25, %v2901_v34 }
 0x3e1   :  { %v4967_v21 = vpop.f32.mrf.mxu0 }
 0x3e2   :  { %v4986_v56 = vpop.f32.mrf.mxu1 }
 0x3e4   :  { %v2911_v47 = vpop.f32.mrf.mxu0  ;;  %v3179_v32 = vpop.f32.mrf.mxu1 }
 0x3e5   :  { %v3009_v14 = vadd.f32 %v3008_v42, %v2911_v47 }
 0x3e6   :  { %v4970_v44 = vpop.f32.mrf.mxu0  ;;  %v5006_v59 = vpop.f32.mrf.mxu1 }
 0x3e8   :  { %v2921_v22 = vpop.f32.mrf.mxu0  ;;  %v3187_v53 = vpop.f32.mrf.mxu1 }
 0x3e9   :  { %v3015_v54 = vadd.f32 %v3014_v15, %v2921_v22 }
 0x3ea   :  { %v4973_v0 = vpop.f32.mrf.mxu0  ;;  %v5009_v8 = vpop.f32.mrf.mxu1 }
 0x3ec   :  { %v3090_v36 = vpop.f32.mrf.mxu0  ;;  %v3195_v60 = vpop.f32.mrf.mxu1 }
 0x3ed   :  { %v3091_v57 = vadd.f32 %v3090_v36, %v3003_v26 }
 0x3ee   :  { %v4993_v10 = vpop.f32.mrf.mxu0  ;;  %v5012_v2 = vpop.f32.mrf.mxu1 }
 0x3ef   :  { %v3180_v52 = vadd.f32 %v3179_v32, %v3091_v57 }
 0x3f0   :  { %v3097_v30 = vpop.f32.mrf.mxu0  ;;  %v3357_v6 = vpop.f32.mrf.mxu1 }
 0x3f1   :  { %v3098_v20 = vadd.f32 %v3097_v30, %v3009_v14 }
 0x3f2   :  { %v4996_v23 = vpop.f32.mrf.mxu0  ;;  %v5032_v17 = vpop.f32.mrf.mxu1 }
 0x3f3   :  { %v3188_v48 = vadd.f32 %v3187_v53, %v3098_v20 }
 0x3f4   :  { %v3104_v28 = vpop.f32.mrf.mxu0 }
 0x3f5   :  { %v3363_v50 = vpop.f32.mrf.mxu1  ;;  %v3105_v43 = vadd.f32 %v3104_v28, %v3015_v54 }
 0x3f6   :  { %v4999_v45 = vpop.f32.mrf.mxu0 }
 0x3f7   :  { %v5035_v16 = vpop.f32.mrf.mxu1  ;;  %v3196_v31 = vadd.f32 %v3195_v60, %v3105_v43 }
 0x3f8   :  { %v3272_v19 = vpop.f32.mrf.mxu0 }
 0x3f9   :  { %v3273_v7 = vadd.f32 %v3272_v19, %v3180_v52  ;;  %v3369_v3 = vpop.f32.mrf.mxu1 }
 0x3fa   :  { %v5019_v58 = vpop.f32.mrf.mxu0 }
 0x3fb   :  { %v3358_v55 = vadd.f32 %v3357_v6, %v3273_v7  ;;  %v5038_v5 = vpop.f32.mrf.mxu1 }
 0x3fd   :  { %4828 = vst.msk [vmem:[%s8862_s3] sm:$0xff] %vm4827_vm2, %v3358_v55 }
 0x3fe   :  { %v3278_v51 = vpop.f32.mrf.mxu0 }
 0x3ff   :  { %v3279_v1 = vadd.f32 %v3278_v51, %v3188_v48 }
 0x400   :  { %v5022_v49 = vpop.f32.mrf.mxu0 }
 0x401   :  { %v3364_v46 = vadd.f32 %v3363_v50, %v3279_v1 }
 0x403   :  { %4829 = vst.msk [vmem:[%s8862_s3 + $0x8] sm:$0xff] %vm4827_vm2, %v3364_v46  ;;  %v3284_v61 = vpop.f32.mrf.mxu0 }
 0x404   :  { %v3285_v9 = vadd.f32 %v3284_v61, %v3196_v31 }
 0x405   :  { %v5025_v13 = vpop.f32.mrf.mxu0 }
 0x406   :  { %v3370_v11 = vadd.f32 %v3369_v3, %v3285_v9 }
 0x408   :  { %4831 = vst.msk [vmem:[%s8862_s3 + $0x10] sm:$0x3] %vm4830_vm13, %v3370_v11 }
 0x419   :  { %v3767_v24 = vpop.f32.mrf.mxu1 }
 0x41b   :  { %v3769_v37 = vpop.f32.mrf.mxu1 }
 0x420   :  { %v3575_v63 = vpop.f32.mrf.mxu0 }
 0x421   :  { %v3768_v35 = vadd.f32 %v3767_v24, %v3575_v63 }
 0x422   :  { %v3577_v40 = vpop.f32.mrf.mxu0 }
 0x436   :  { %v3774_v18 = vpop.f32.mrf.mxu1 }
 0x438   :  { %v3776_v25 = vpop.f32.mrf.mxu1 }
 0x43b   :  { %v3781_v4 = vpop.f32.mrf.mxu1 }
 0x43d   :  { %v3783_v42 = vpop.f32.mrf.mxu1 }
 0x43e   :  { %v3590_v33 = vpop.f32.mrf.mxu0 }
 0x43f   :  { %v3775_v26 = vadd.f32 %v3774_v18, %v3590_v33 }
 0x440   :  { %v3592_v34 = vpop.f32.mrf.mxu0 }
 0x442   :  { %v4003_v15 = vpop.f32.mrf.mxu1 }
 0x444   :  { %v3605_v21 = vpop.f32.mrf.mxu0  ;;  %v4005_v56 = vpop.f32.mrf.mxu1 }
 0x445   :  { %v3782_v45 = vadd.f32 %v3781_v4, %v3605_v21 }
 0x446   :  { %v3607_v47 = vpop.f32.mrf.mxu0 }
 0x44a   :  { %v3891_v32 = vpop.f32.mrf.mxu0 }
 0x44b   :  { %v3892_v30 = vadd.f32 %v3891_v32, %v3768_v35 }
 0x44c   :  { %v3893_v44 = vpop.f32.mrf.mxu0 }
 0x44d   :  { %v4004_v17 = vadd.f32 %v4003_v15, %v3892_v30 }
 0x44f   :  { %v3900_v59 = vpop.f32.mrf.mxu0 }
 0x450   :  { %v3901_v57 = vadd.f32 %v3900_v59, %v3775_v26 }
 0x451   :  { %v3902_v22 = vpop.f32.mrf.mxu0 }
 0x453   :  { %v4014_v53 = vpop.f32.mrf.mxu1 }
 0x454   :  { %v4015_v19 = vadd.f32 %v4014_v53, %v3901_v57 }
 0x455   :  { %v3909_v0 = vpop.f32.mrf.mxu0  ;;  %v4016_v8 = vpop.f32.mrf.mxu1 }
 0x456   :  { %v3910_v20 = vadd.f32 %v3909_v0, %v3782_v45 }
 0x457   :  { %v3911_v36 = vpop.f32.mrf.mxu0 }
 0x459   :  { %v4025_v60 = vpop.f32.mrf.mxu1 }
 0x45a   :  { %v4026_v43 = vadd.f32 %v4025_v60, %v3910_v20 }
 0x45b   :  { %v4027_v10 = vpop.f32.mrf.mxu1 }
 0x46d   :  { %v4255_v2 = vpop.f32.mrf.mxu1 }
 0x46f   :  { %v4257_v6 = vpop.f32.mrf.mxu1 }
 0x471   :  { %v4262_v23 = vpop.f32.mrf.mxu1 }
 0x473   :  { %v4151_v28 = vpop.f32.mrf.mxu0  ;;  %v4264_v50 = vpop.f32.mrf.mxu1 }
 0x474   :  { %v4152_v14 = vadd.f32 %v4151_v28, %v4004_v17 }
 0x475   :  { %v4153_v16 = vpop.f32.mrf.mxu0  ;;  %v4269_v52 = vpop.f32.mrf.mxu1 }
 0x476   :  { %v4256_v7 = vadd.f32 %v4255_v2, %v4152_v14 }
 0x477   :  { %v4158_v3 = vpop.f32.mrf.mxu0  ;;  %v4271_v58 = vpop.f32.mrf.mxu1 }
 0x478   :  { %v4274_v55 = vsel %vm9268_vm8, %v4256_v7, 0  ;;  %v4159_v5 = vadd.f32 %v4158_v3, %v4015_v19 }
 0x479   :  { %v8793_v54 = vand.u32 4294901760, %v4274_v55  ;;  %v4160_v48 = vpop.f32.mrf.mxu0 }
 0x47a   :  { %v4263_v51 = vadd.f32 %v4262_v23, %v4159_v5 }
 0x47b   :  { %v4350_v1 = vsub.f32 %v4274_v55, %v8793_v54  ;;  %v4165_v49 = vpop.f32.mrf.mxu0  ;;  %5057 = vmatmul.mubr.f32.vlgmr.msra.gmra.mxu1 %v8793_v54 }
 0x47c   :  { %v4277_v46 = vsel %vm9269_vm11, %v4263_v51, 0  ;;  %v4166_v31 = vadd.f32 %v4165_v49, %v4026_v43  ;;  %5059 = vmatprep.mubr.msk.f32.mxu1 %vm5282_vm12, %v8736_v38  ;;  %5079 = vmatpush3.msra.mxu1 %v8115_v29 }
 0x47d   :  { %v4351_v61 = vand.u32 4294901760, %v4350_v1  ;;  %v4359_v9 = vand.u32 4294901760, %v4277_v46  ;;  %v4167_v13 = vpop.f32.mrf.mxu0  ;;  %5080 = vmatprep.subr.mxu1 %v8736_v38 }
 0x47e   :  { %v4270_v11 = vadd.f32 %v4269_v52, %v4166_v31  ;;  %5081 = vmatpush3.msra.mxu1 %v8117_v27 }
 0x47f   :  { %v4352_v24 = vsub.f32 %v4350_v1, %v4351_v61  ;;  %v4360_v37 = vsub.f32 %v4277_v46, %v4359_v9  ;;  %5060 = vmatmul.mubr.f32.gmra.mxu1 %v4359_v9  ;;  %5104 = vmatprep.subr.mxu1 %v8736_v38 }
 0x480   :  { %v4280_v63 = vsel %vm9270_vm3, %v4270_v11, 0  ;;  %5062 = vmatprep.mubr.msk.f32.mxu1 %vm5282_vm12, %v8736_v38 }
 0x481   :  { %v4353_v35 = vand.u32 4294901760, %v4352_v24  ;;  %v4369_v40 = vand.u32 4294901760, %v4280_v63  ;;  %v4361_v18 = vand.u32 4294901760, %v4360_v37 }
 0x483   :  { %v4370_v25 = vsub.f32 %v4280_v63, %v4369_v40  ;;  %5044 = vmatmul.mubr.f32.vlgmr.msra.gmra.mxu0 %v4353_v35  ;;  %5063 = vmatmul.mubr.f32.gmra.mxu1 %v4369_v40  ;;  %v4362_v4 = vsub.f32 %v4360_v37, %v4361_v18 }
 0x484   :  { %5066 = vmatpush3.msra.mxu0 %v8127_v62  ;;  %5046 = vmatprep.mubr.msk.f32.mxu0 %vm5282_vm12, %v8736_v38 }
 0x485   :  { %5082 = vmatprep.mubr.msk.f32.mxu1 %vm5282_vm12, %v8736_v38  ;;  %v4363_v42 = vand.u32 4294901760, %v4362_v4  ;;  %5067 = vmatprep.subr.mxu0 %v8736_v38  ;;  %v4371_v33 = vand.u32 4294901760, %v4370_v25 }
 0x486   :  { %5068 = vmatpush3.msra.mxu0 %v8130_v12 }
 0x487   :  { %5047 = vmatmul.mubr.f32.gmra.mxu0 %v4363_v42  ;;  %5083 = vmatmul.mubr.f32.vlgmr.msra.gmra.mxu1 %v4351_v61  ;;  %v4372_v34 = vsub.f32 %v4370_v25, %v4371_v33 }
 0x488   :  { %5049 = vmatprep.mubr.msk.f32.mxu0 %vm5282_vm12, %v8736_v38  ;;  %5085 = vmatprep.mubr.msk.f32.mxu1 %vm5282_vm12, %v8736_v38 }
 0x489   :  { %v4373_v62 = vand.u32 4294901760, %v4372_v34  ;;  %5091 = vmatprep.subr.mxu0 %v8736_v38  ;;  %5105 = vmatpush3.msra.mxu1 %v8115_v29 }
 0x48a   :  { %5106 = vmatprep.subr.mxu1 %v8736_v38 }
 0x48b   :  { %5050 = vmatmul.mubr.f32.gmra.mxu0 %v4373_v62  ;;  %5086 = vmatmul.mubr.f32.gmra.mxu1 %v4361_v18 }
 0x48c   :  { %5069 = vmatprep.mubr.msk.f32.mxu0 %vm5282_vm12, %v8736_v38  ;;  %5088 = vmatprep.mubr.msk.f32.mxu1 %vm5282_vm12, %v8736_v38 }
 0x48d   :  { %5107 = vmatpush3.msra.mxu1 %v8117_v27 }
 0x48f   :  { %5070 = vmatmul.mubr.f32.vlgmr.msra.gmra.mxu0 %v4350_v1  ;;  %5089 = vmatmul.mubr.f32.gmra.mxu1 %v4371_v33 }
 0x490   :  { %5092 = vmatpush3.msra.mxu0 %v8139_v41  ;;  %5072 = vmatprep.mubr.msk.f32.mxu0 %vm5282_vm12, %v8736_v38 }
 0x491   :  { %5108 = vmatprep.mubr.msk.f32.mxu1 %vm5282_vm12, %v8736_v38  ;;  %5093 = vmatprep.subr.mxu0 %v8736_v38 }
 0x492   :  { %5094 = vmatpush3.msra.mxu0 %v8142_v39 }
 0x493   :  { %5073 = vmatmul.mubr.f32.gmra.mxu0 %v4360_v37  ;;  %5109 = vmatmul.mubr.f32.vlgmr.msra.gmra.mxu1 %v8793_v54 }
 0x494   :  { %5075 = vmatprep.mubr.msk.f32.mxu0 %vm5282_vm12, %v8736_v38  ;;  %5111 = vmatprep.mubr.msk.f32.mxu1 %vm5282_vm12, %v8736_v38 }
 0x497   :  { %5076 = vmatmul.mubr.f32.gmra.mxu0 %v4370_v25  ;;  %5112 = vmatmul.mubr.f32.gmra.mxu1 %v4359_v9 }
 0x498   :  { %5095 = vmatprep.mubr.msk.f32.mxu0 %vm5282_vm12, %v8736_v38  ;;  %5114 = vmatprep.mubr.msk.f32.mxu1 %vm5282_vm12, %v8736_v38 }
 0x49b   :  { %5096 = vmatmul.mubr.f32.vlgmr.msra.gmra.mxu0 %v8793_v54  ;;  %5115 = vmatmul.mubr.f32.gmra.mxu1 %v4369_v40 }
 0x49c   :  { %5098 = vmatprep.mubr.msk.f32.mxu0 %vm5282_vm12, %v8736_v38 }
 0x49f   :  { %5099 = vmatmul.mubr.f32.gmra.mxu0 %v4359_v9 }
 0x4a0   :  { %5101 = vmatprep.mubr.msk.f32.mxu0 %vm5282_vm12, %v8736_v38 }
 0x4a3   :  { %5102 = vmatmul.mubr.f32.gmra.mxu0 %v4369_v40 }
 0x53b   :  { %v4456_v29 = vpop.f32.mrf.mxu1 }
 0x53d   :  { %v5058_v27 = vpop.f32.mrf.mxu1 }
 0x53f   :  { %v4462_v12 = vpop.f32.mrf.mxu1 }
 0x541   :  { %v5061_v41 = vpop.f32.mrf.mxu1 }
 0x543   :  { %v4355_v39 = vpop.f32.mrf.mxu0  ;;  %v4468_v15 = vpop.f32.mrf.mxu1 }
 0x544   :  { %v4457_v6 = vadd.f32 %v4456_v29, %v4355_v39 }
 0x545   :  { %v5045_v21 = vpop.f32.mrf.mxu0  ;;  %v5064_v56 = vpop.f32.mrf.mxu1 }
 0x547   :  { %v4365_v47 = vpop.f32.mrf.mxu0  ;;  %v4633_v32 = vpop.f32.mrf.mxu1 }
 0x548   :  { %v4463_v50 = vadd.f32 %v4462_v12, %v4365_v47 }
 0x549   :  { %v5048_v44 = vpop.f32.mrf.mxu0  ;;  %v5084_v59 = vpop.f32.mrf.mxu1 }
 0x54b   :  { %v4375_v22 = vpop.f32.mrf.mxu0  ;;  %v4641_v53 = vpop.f32.mrf.mxu1 }
 0x54c   :  { %v4469_v7 = vadd.f32 %v4468_v15, %v4375_v22 }
 0x54d   :  { %v5051_v0 = vpop.f32.mrf.mxu0  ;;  %v5087_v8 = vpop.f32.mrf.mxu1 }
 0x54f   :  { %v4544_v36 = vpop.f32.mrf.mxu0  ;;  %v4649_v60 = vpop.f32.mrf.mxu1 }
 0x550   :  { %v4545_v17 = vadd.f32 %v4544_v36, %v4457_v6 }
 0x551   :  { %v5071_v38 = vpop.f32.mrf.mxu0  ;;  %v5090_v10 = vpop.f32.mrf.mxu1 }
 0x552   :  { %v4634_v52 = vadd.f32 %v4633_v32, %v4545_v17 }
 0x553   :  { %v4551_v2 = vpop.f32.mrf.mxu0  ;;  %v4811_v30 = vpop.f32.mrf.mxu1 }
 0x554   :  { %v4552_v16 = vadd.f32 %v4551_v2, %v4463_v50 }
 0x555   :  { %v5074_v26 = vpop.f32.mrf.mxu0  ;;  %v5110_v23 = vpop.f32.mrf.mxu1 }
 0x556   :  { %v4642_v48 = vadd.f32 %v4641_v53, %v4552_v16 }
 0x557   :  { %v4558_v57 = vpop.f32.mrf.mxu0  ;;  %v4817_v28 = vpop.f32.mrf.mxu1 }
 0x558   :  { %v4559_v5 = vadd.f32 %v4558_v57, %v4469_v7 }
 0x559   :  { %v5077_v45 = vpop.f32.mrf.mxu0  ;;  %v5113_v14 = vpop.f32.mrf.mxu1 }
 0x55a   :  { %v4650_v46 = vadd.f32 %v4649_v60, %v4559_v5 }
 0x55b   :  { %v4726_v19 = vpop.f32.mrf.mxu0  ;;  %v4823_v20 = vpop.f32.mrf.mxu1 }
 0x55c   :  { %v4727_v3 = vadd.f32 %v4726_v19, %v4634_v52 }
 0x55d   :  { %v5097_v58 = vpop.f32.mrf.mxu0  ;;  %v5116_v55 = vpop.f32.mrf.mxu1 }
 0x55e   :  { %v4812_v54 = vadd.f32 %v4811_v30, %v4727_v3 }
 0x55f   :  { %v4732_v43 = vpop.f32.mrf.mxu0 }
 0x560   :  { %4832 = vst.msk [vmem:[%s8862_s3 + $0x18] sm:$0xff] %vm4827_vm2, %v4812_v54  ;;  %v4733_v51 = vadd.f32 %v4732_v43, %v4642_v48 }
 0x561   :  { %v5100_v1 = vpop.f32.mrf.mxu0 }
 0x562   :  { %v4818_v49 = vadd.f32 %v4817_v28, %v4733_v51 }
 0x563   :  { %v4738_v31 = vpop.f32.mrf.mxu0 }
 0x564   :  { %4833 = vst.msk [vmem:[%s8862_s3 + $0x20] sm:$0xff] %vm4827_vm2, %v4818_v49  ;;  %v4739_v61 = vadd.f32 %v4738_v31, %v4650_v46 }
 0x565   :  { %v5103_v9 = vpop.f32.mrf.mxu0 }
 0x566   :  { %v4824_v13 = vadd.f32 %v4823_v20, %v4739_v61 }
 0x568   :  { %4834 = vst.msk [vmem:[%s8862_s3 + $0x28] sm:$0x3] %vm4830_vm13, %v4824_v13 }
 0x569   :  { %4839 = vsyncpa [#allocation4], 1 }
 0x56a   :  { %4840 = vsyncpa [#allocation6], 1 }

</bundles_post_ra>
